<compile_context>
chip_gen: v7x
topology: tpu7x:2x2x1
jax: 0.10.0
libtpu: 0.0.40
codegen_flags: <defaults>
</compile_context>

<pallas_src>
import jax
import jax.numpy as jnp
from jax.experimental import pallas as pl
from jax.experimental.pallas import tpu as pltpu

HIDDEN1_UNITS = 300
HIDDEN2_UNITS = 600

H1 = HIDDEN1_UNITS
H2 = HIDDEN2_UNITS
H1P = 384          # 300 padded to a multiple of 128
H2P = 640          # 600 padded to a multiple of 128
OUTP = 128         # lane-dense output width (real q lives in column 0)
TB_TARGET = 512    # batch-tile target (sweep 512-1024 for very large batches)


def _round_up(x, m):
    return ((x + m - 1) // m) * m


def _is_v5():
    """v5-family chips have a 128-wide MXU -> prefer split fc2/fc3 dots."""
    try:
        kind = jax.devices()[0].device_kind.lower()
    except Exception:
        return False
    return "v5" in kind


def choose_batch_tiling(B, tb_target=TB_TARGET):
    """Pick (tile_rows, padded_batch). Large tiles amortize grid-step overhead;
    cap at ceil(B/2) so v7x's two TensorCores both get a parallel grid step."""
    tb = min(tb_target, _round_up(B, 8))
    if B >= 16:
        tb = min(tb, _round_up(pl.cdiv(B, 2), 8))
    b_pad = _round_up(B, tb)
    return tb, b_pad


def _make_kernel(split_fc23):
    def kernel(s_ref, a_ref,
               w1_ref, b1_ref,
               w23_ref, b23_ref,
               w4_ref, b4_ref,
               w5_ref, b5_ref,
               out_ref):
        # fc1 + ReLU (bf16 operands, f32 MXU accumulation); bf16 cast fused
        # into the bias/ReLU epilogue.
        h1 = jnp.dot(s_ref[...], w1_ref[...], preferred_element_type=jnp.float32)
        h1 = jnp.maximum(h1 + b1_ref[...], 0.0).astype(jnp.bfloat16)

        if split_fc23:
            # v5-family (128-wide MXU): K=384 and K=128 tile exactly, so two
            # accumulating dots cost no extra MXU passes and skip the concat copy.
            x = jnp.dot(h1, w23_ref[:H1P, :], preferred_element_type=jnp.float32)
            x = x + jnp.dot(a_ref[...], w23_ref[H1P:, :],
                            preferred_element_type=jnp.float32)
        else:
            # v6e/v7x (256-wide MXU): fused K=512 contraction (2 K-chunks vs 3).
            xin = jnp.concatenate([h1, a_ref[...]], axis=-1)
            x = jnp.dot(xin, w23_ref[...], preferred_element_type=jnp.float32)
        # x = fc3(h1) + fc2(a)  (no ReLU here), bf16 cast fused with bias add
        x = (x + b23_ref[...]).astype(jnp.bfloat16)

        # fc4 + ReLU
        h4 = jnp.dot(x, w4_ref[...], preferred_element_type=jnp.float32)
        h4 = jnp.maximum(h4 + b4_ref[...], 0.0)

        # fc5: N=1 head on VPU/XLU (broadcast-multiply + lane reduction);
        # store lane-dense bf16, real q is column 0.
        q = jnp.sum(h4 * w5_ref[...], axis=-1, keepdims=True)       # (TB,1) f32
        out_ref[...] = (jnp.broadcast_to(q, out_ref.shape)
                        + b5_ref[...]).astype(out_ref.dtype)
    return kernel


def init_params(key, state_size, action_dim):
    """PyTorch-Linear-style uniform init; weights stored as [in, out], f32."""
    def linear(key, fan_in, fan_out):
        kw, kb = jax.random.split(key)
        bound = 1.0 / jnp.sqrt(jnp.float32(fan_in))
        w = jax.random.uniform(kw, (fan_in, fan_out), jnp.float32, -bound, bound)
        b = jax.random.uniform(kb, (1, fan_out), jnp.float32, -bound, bound)
        return w, b

    k1, k2, k3, k4, k5 = jax.random.split(key, 5)
    w1, b1 = linear(k1, state_size, H1)   # fc1
    w2, b2 = linear(k2, action_dim, H2)   # fc2
    w3, b3 = linear(k3, H1, H2)           # fc3
    w4, b4 = linear(k4, H2, H2)           # fc4
    w5, b5 = linear(k5, H2, 1)            # fc5
    return (w1, b1, w2, b2, w3, b3, w4, b4, w5, b5)


def pack_params(params, state_size, action_dim):
    """One-time prep: pad to lane/sublane multiples, cast weights to bf16,
    fuse fc2/fc3 weights and biases. Zero-padding keeps the math exact."""
    (w1, b1, w2, b2, w3, b3, w4, b4, w5, b5) = params
    s_pad = _round_up(max(state_size, 1), 8)
    a_pad = _round_up(max(action_dim, 1), 128)
    bf16, f32 = jnp.bfloat16, jnp.float32

    w1p = jnp.zeros((s_pad, H1P), bf16).at[:state_size, :H1].set(w1.astype(bf16))
    b1p = jnp.zeros((1, H1P), f32).at[:, :H1].set(b1)

    w23p = jnp.zeros((H1P + a_pad, H2P), bf16)
    w23p = w23p.at[:H1, :H2].set(w3.astype(bf16))
    w23p = w23p.at[H1P:H1P + action_dim, :H2].set(w2.astype(bf16))
    b23p = jnp.zeros((1, H2P), f32).at[:, :H2].set(b2 + b3)

    w4p = jnp.zeros((H2P, H2P), bf16).at[:H2, :H2].set(w4.astype(bf16))
    b4p = jnp.zeros((1, H2P), f32).at[:, :H2].set(b4)

    w5p = jnp.zeros((1, H2P), f32).at[:, :H2].set(w5.T)       # f32 (VPU head)
    b5p = jnp.broadcast_to(b5.astype(f32).reshape(1, 1), (1, OUTP))

    return (w1p, b1p, w23p, b23p, w4p, b4p, w5p, b5p)


def _build_call(tb, n_tiles, s_pad, a_pad, split_fc23, single_buffer_weights, cost):
    wkw = {}
    if single_buffer_weights and hasattr(pl, "Buffered"):
        # Constant-index-map weights never change block -> one VMEM buffer.
        wkw = dict(pipeline_mode=pl.Buffered(1))

    def w_spec(shape):
        return pl.BlockSpec(shape, lambda i: (0, 0), **wkw)

    in_specs = [
        pl.BlockSpec((tb, s_pad), lambda i: (i, 0)),       # s tile
        pl.BlockSpec((tb, a_pad), lambda i: (i, 0)),       # a tile
        w_spec((s_pad, H1P)), w_spec((1, H1P)),            # fc1
        w_spec((H1P + a_pad, H2P)), w_spec((1, H2P)),      # fused fc2/fc3
        w_spec((H2P, H2P)), w_spec((1, H2P)),              # fc4
        w_spec((1, H2P)), w_spec((1, OUTP)),               # fc5 head
    ]
    return pl.pallas_call(
        _make_kernel(split_fc23),
        out_shape=jax.ShapeDtypeStruct((tb * n_tiles, OUTP), jnp.bfloat16),
        grid=(n_tiles,),
        in_specs=in_specs,
        out_specs=pl.BlockSpec((tb, OUTP), lambda i: (i, 0)),
        compiler_params=pltpu.CompilerParams(
            dimension_semantics=("parallel",),
            vmem_limit_bytes=32 * 1024 * 1024),
        cost_estimate=cost,
    )


def critic_forward(s, a, packed, tb_target=TB_TARGET, split_fc23=None):
    """Critic forward via one Pallas kernel, batch-tiled over a parallel grid
    with VMEM-resident weights.

    NOTE: the zero-pad + bf16 cast of s/a and the final slice are kept here for
    convenience; in a real training step fuse them into the producer (same jit)
    or keep the replay-buffer batches pre-padded/bf16 to avoid extra HBM passes.
    """
    (w1p, b1p, w23p, b23p, w4p, b4p, w5p, b5p) = packed
    s_pad = w1p.shape[0]
    a_pad = w23p.shape[0] - H1P

    B, state_size = s.shape
    action_dim = a.shape[1]

    if split_fc23 is None:
        split_fc23 = _is_v5()

    tb, b_pad = choose_batch_tiling(B, tb_target)
    n_tiles = b_pad // tb

    sp = jnp.zeros((b_pad, s_pad), jnp.bfloat16).at[:B, :state_size].set(
        s.astype(jnp.bfloat16))
    ap = jnp.zeros((b_pad, a_pad), jnp.bfloat16).at[:B, :action_dim].set(
        a.astype(jnp.bfloat16))

    flops = int(2 * b_pad * (s_pad * H1P + (H1P + a_pad) * H2P + H2P * H2P + H2P))
    bytes_accessed = int(
        sp.size * 2 + ap.size * 2
        + sum(int(w.size) * int(w.dtype.itemsize) for w in packed)
        + b_pad * OUTP * 2)
    cost = pl.CostEstimate(flops=flops, transcendentals=0,
                           bytes_accessed=bytes_accessed)

    args = (sp, ap, w1p, b1p, w23p, b23p, w4p, b4p, w5p, b5p)
    try:
        out = _build_call(tb, n_tiles, s_pad, a_pad, split_fc23, True, cost)(*args)
    except Exception:
        # Fallback if single-buffered (Buffered(1)) weight specs are unsupported.
        out = _build_call(tb, n_tiles, s_pad, a_pad, split_fc23, False, cost)(*args)

    # Lane-dense bf16 block; real q is column 0 of the first B rows.
    return out[:B, :1].astype(jnp.float32)


def reference_forward(s, a, params):
    """Pure-JAX reference on the same bf16-rounded weights (f32 math)."""
    (w1, b1, w2, b2, w3, b3, w4, b4, w5, b5) = params
    q16 = lambda x: x.astype(jnp.bfloat16).astype(jnp.float32)
    s32, a32 = q16(s), q16(a)
    h1 = jnp.maximum(s32 @ q16(w1) + b1, 0.0)
    x = h1 @ q16(w3) + a32 @ q16(w2) + (b2 + b3)
    h4 = jnp.maximum(x @ q16(w4) + b4, 0.0)
    return h4 @ w5 + b5


if __name__ == "__main__":
    key = jax.random.PRNGKey(0)
    k_params, k_s, k_a, k_s2, k_a2 = jax.random.split(key, 5)

    batch = 2
    state_size = 16
    action_dim = 4

    params = init_params(k_params, state_size, action_dim)
    packed = pack_params(params, state_size, action_dim)

    # Small demo batch (single 8-row tile).
    s = jax.random.normal(k_s, (batch, state_size), jnp.float32)
    a = jax.random.normal(k_a, (batch, action_dim), jnp.float32)
    q = jax.block_until_ready(critic_forward(s, a, packed))
    q_ref = reference_forward(s, a, params)
    assert q.shape == (batch, 1), q.shape
    # bf16 intermediates / bf16 output (f32 accumulation) -> loose tolerance.
    assert jnp.allclose(q, q_ref, atol=5e-2, rtol=5e-2), (q, q_ref)

    # Larger batch exercises the multi-tile "parallel" grid (>=2 steps, so both
    # v7x TensorCores are used).
    big = 600
    s2 = jax.random.normal(k_s2, (big, state_size), jnp.float32)
    a2 = jax.random.normal(k_a2, (big, action_dim), jnp.float32)
    q2 = jax.block_until_ready(critic_forward(s2, a2, packed))
    q2_ref = reference_forward(s2, a2, params)
    assert q2.shape == (big, 1), q2.shape
    assert jnp.allclose(q2, q2_ref, atol=5e-2, rtol=5e-2)

    print("KERNEL_OK")
</pallas_src>

<mosaic_0001>
module attributes {stable_mosaic.version = 11 : i64} {
  func.func @kernel(%arg0: i32, %arg1: memref<8x16xbf16, #tpu.memory_space<vmem>>, %arg2: memref<8x128xbf16, #tpu.memory_space<vmem>>, %arg3: memref<16x384xbf16, #tpu.memory_space<vmem>>, %arg4: memref<1x384xf32, #tpu.memory_space<vmem>>, %arg5: memref<512x640xbf16, #tpu.memory_space<vmem>>, %arg6: memref<1x640xf32, #tpu.memory_space<vmem>>, %arg7: memref<640x640xbf16, #tpu.memory_space<vmem>>, %arg8: memref<1x640xf32, #tpu.memory_space<vmem>>, %arg9: memref<1x640xf32, #tpu.memory_space<vmem>>, %arg10: memref<1x128xf32, #tpu.memory_space<vmem>>, %arg11: memref<8x128xbf16, #tpu.memory_space<vmem>>) attributes {dimension_semantics = [#tpu.dimension_semantics<parallel>], iteration_bounds = array<i64: 1>, scalar_prefetch = 0 : i64, scratch_operands = 0 : i64, tpu.core_type = #tpu.core_type<tc>, window_params = [{transform_indices = @transform_0, window_bounds = array<i64: 8, 16>}, {transform_indices = @transform_1, window_bounds = array<i64: 8, 128>}, {pipeline_mode = #tpu.pipeline_mode<synchronous>, transform_indices = @transform_2, window_bounds = array<i64: 16, 384>}, {pipeline_mode = #tpu.pipeline_mode<synchronous>, transform_indices = @transform_3, window_bounds = array<i64: 1, 384>}, {pipeline_mode = #tpu.pipeline_mode<synchronous>, transform_indices = @transform_4, window_bounds = array<i64: 512, 640>}, {pipeline_mode = #tpu.pipeline_mode<synchronous>, transform_indices = @transform_5, window_bounds = array<i64: 1, 640>}, {pipeline_mode = #tpu.pipeline_mode<synchronous>, transform_indices = @transform_6, window_bounds = array<i64: 640, 640>}, {pipeline_mode = #tpu.pipeline_mode<synchronous>, transform_indices = @transform_7, window_bounds = array<i64: 1, 640>}, {pipeline_mode = #tpu.pipeline_mode<synchronous>, transform_indices = @transform_8, window_bounds = array<i64: 1, 640>}, {pipeline_mode = #tpu.pipeline_mode<synchronous>, transform_indices = @transform_9, window_bounds = array<i64: 1, 128>}, {transform_indices = @transform_10, window_bounds = array<i64: 8, 128>}]} {
    %c0 = arith.constant 0 : index
    %c0_0 = arith.constant 0 : index
    %0 = vector.load %arg1[%c0, %c0_0] : memref<8x16xbf16, #tpu.memory_space<vmem>>, vector<8x16xbf16>
    %c0_1 = arith.constant 0 : index
    %c0_2 = arith.constant 0 : index
    %1 = vector.load %arg3[%c0_1, %c0_2] : memref<16x384xbf16, #tpu.memory_space<vmem>>, vector<16x384xbf16>
    %cst = arith.constant dense<0.000000e+00> : vector<8x384xf32>
    %2 = tpu.matmul %0, %1, %cst {dimension_numbers = #tpu.dot_dimension_numbers<[1], [0], [0], [1], [0, 0, 1, 1], [], []>} : vector<8x16xbf16>, vector<16x384xbf16>, vector<8x384xf32> -> vector<8x384xf32>
    %c0_3 = arith.constant 0 : index
    %c0_4 = arith.constant 0 : index
    %3 = vector.load %arg4[%c0_3, %c0_4] : memref<1x384xf32, #tpu.memory_space<vmem>>, vector<1x384xf32>
    %4 = vector.broadcast %3 : vector<1x384xf32> to vector<8x384xf32>
    %5 = arith.addf %2, %4 : vector<8x384xf32>
    %cst_5 = arith.constant 0.000000e+00 : f32
    %6 = vector.broadcast %cst_5 : f32 to vector<8x384xf32>
    %7 = arith.maximumf %5, %6 : vector<8x384xf32>
    %8 = arith.truncf %7 : vector<8x384xf32> to vector<8x384xbf16>
    %c0_6 = arith.constant 0 : index
    %c0_7 = arith.constant 0 : index
    %9 = vector.load %arg2[%c0_6, %c0_7] : memref<8x128xbf16, #tpu.memory_space<vmem>>, vector<8x128xbf16>
    %10 = tpu.concatenate %8, %9 in 1 : vector<8x384xbf16>, vector<8x128xbf16> -> vector<8x512xbf16>
    %c0_8 = arith.constant 0 : index
    %c0_9 = arith.constant 0 : index
    %11 = vector.load %arg5[%c0_8, %c0_9] : memref<512x640xbf16, #tpu.memory_space<vmem>>, vector<512x640xbf16>
    %cst_10 = arith.constant dense<0.000000e+00> : vector<8x640xf32>
    %12 = tpu.matmul %10, %11, %cst_10 {dimension_numbers = #tpu.dot_dimension_numbers<[1], [0], [0], [1], [0, 0, 1, 1], [], []>} : vector<8x512xbf16>, vector<512x640xbf16>, vector<8x640xf32> -> vector<8x640xf32>
    %c0_11 = arith.constant 0 : index
    %c0_12 = arith.constant 0 : index
    %13 = vector.load %arg6[%c0_11, %c0_12] : memref<1x640xf32, #tpu.memory_space<vmem>>, vector<1x640xf32>
    %14 = vector.broadcast %13 : vector<1x640xf32> to vector<8x640xf32>
    %15 = arith.addf %12, %14 : vector<8x640xf32>
    %16 = arith.truncf %15 : vector<8x640xf32> to vector<8x640xbf16>
    %c0_13 = arith.constant 0 : index
    %c0_14 = arith.constant 0 : index
    %17 = vector.load %arg7[%c0_13, %c0_14] : memref<640x640xbf16, #tpu.memory_space<vmem>>, vector<640x640xbf16>
    %cst_15 = arith.constant dense<0.000000e+00> : vector<8x640xf32>
    %18 = tpu.matmul %16, %17, %cst_15 {dimension_numbers = #tpu.dot_dimension_numbers<[1], [0], [0], [1], [0, 0, 1, 1], [], []>} : vector<8x640xbf16>, vector<640x640xbf16>, vector<8x640xf32> -> vector<8x640xf32>
    %c0_16 = arith.constant 0 : index
    %c0_17 = arith.constant 0 : index
    %19 = vector.load %arg8[%c0_16, %c0_17] : memref<1x640xf32, #tpu.memory_space<vmem>>, vector<1x640xf32>
    %20 = vector.broadcast %19 : vector<1x640xf32> to vector<8x640xf32>
    %21 = arith.addf %18, %20 : vector<8x640xf32>
    %cst_18 = arith.constant 0.000000e+00 : f32
    %22 = vector.broadcast %cst_18 : f32 to vector<8x640xf32>
    %23 = arith.maximumf %21, %22 : vector<8x640xf32>
    %c0_19 = arith.constant 0 : index
    %c0_20 = arith.constant 0 : index
    %24 = vector.load %arg9[%c0_19, %c0_20] : memref<1x640xf32, #tpu.memory_space<vmem>>, vector<1x640xf32>
    %25 = vector.broadcast %24 : vector<1x640xf32> to vector<8x640xf32>
    %26 = arith.mulf %23, %25 : vector<8x640xf32>
    %cst_21 = arith.constant dense<0.000000e+00> : vector<8xf32>
    %27 = vector.multi_reduction <add>, %26, %cst_21 [1] : vector<8x640xf32> to vector<8xf32>
    %28 = vector.shape_cast %27 : vector<8xf32> to vector<8x1xf32>
    %29 = vector.shape_cast %28 : vector<8x1xf32> to vector<8x1xf32>
    %30 = vector.broadcast %29 : vector<8x1xf32> to vector<8x128xf32>
    %c0_22 = arith.constant 0 : index
    %c0_23 = arith.constant 0 : index
    %31 = vector.load %arg10[%c0_22, %c0_23] : memref<1x128xf32, #tpu.memory_space<vmem>>, vector<1x128xf32>
    %32 = vector.broadcast %31 : vector<1x128xf32> to vector<8x128xf32>
    %33 = arith.addf %30, %32 : vector<8x128xf32>
    %34 = arith.truncf %33 : vector<8x128xf32> to vector<8x128xbf16>
    %c0_24 = arith.constant 0 : index
    %c0_25 = arith.constant 0 : index
    %35 = vector.load %arg11[%c0_24, %c0_25] : memref<8x128xbf16, #tpu.memory_space<vmem>>, vector<8x128xbf16>
    tpu.vector_store %arg11[%c0_24, %c0_25], %34 {strides = array<i32>} : memref<8x128xbf16, #tpu.memory_space<vmem>>, vector<8x128xbf16>,
    return
  }
  func.func @transform_0(%arg0: i32) -> (i32, i32) {
    %c0_i32 = arith.constant 0 : i32
    %c0_i32_0 = arith.constant 0 : i32
    return %arg0, %c0_i32 : i32, i32
  }
  func.func @transform_1(%arg0: i32) -> (i32, i32) {
    %c0_i32 = arith.constant 0 : i32
    %c0_i32_0 = arith.constant 0 : i32
    return %arg0, %c0_i32 : i32, i32
  }
  func.func @transform_2(%arg0: i32) -> (i32, i32) {
    %c0_i32 = arith.constant 0 : i32
    %c0_i32_0 = arith.constant 0 : i32
    %c0_i32_1 = arith.constant 0 : i32
    return %c0_i32, %c0_i32_0 : i32, i32
  }
  func.func @transform_3(%arg0: i32) -> (i32, i32) {
    %c0_i32 = arith.constant 0 : i32
    %c0_i32_0 = arith.constant 0 : i32
    %c0_i32_1 = arith.constant 0 : i32
    return %c0_i32, %c0_i32_0 : i32, i32
  }
  func.func @transform_4(%arg0: i32) -> (i32, i32) {
    %c0_i32 = arith.constant 0 : i32
    %c0_i32_0 = arith.constant 0 : i32
    %c0_i32_1 = arith.constant 0 : i32
    return %c0_i32, %c0_i32_0 : i32, i32
  }
  func.func @transform_5(%arg0: i32) -> (i32, i32) {
    %c0_i32 = arith.constant 0 : i32
    %c0_i32_0 = arith.constant 0 : i32
    %c0_i32_1 = arith.constant 0 : i32
    return %c0_i32, %c0_i32_0 : i32, i32
  }
  func.func @transform_6(%arg0: i32) -> (i32, i32) {
    %c0_i32 = arith.constant 0 : i32
    %c0_i32_0 = arith.constant 0 : i32
    %c0_i32_1 = arith.constant 0 : i32
    return %c0_i32, %c0_i32_0 : i32, i32
  }
  func.func @transform_7(%arg0: i32) -> (i32, i32) {
    %c0_i32 = arith.constant 0 : i32
    %c0_i32_0 = arith.constant 0 : i32
    %c0_i32_1 = arith.constant 0 : i32
    return %c0_i32, %c0_i32_0 : i32, i32
  }
  func.func @transform_8(%arg0: i32) -> (i32, i32) {
    %c0_i32 = arith.constant 0 : i32
    %c0_i32_0 = arith.constant 0 : i32
    %c0_i32_1 = arith.constant 0 : i32
    return %c0_i32, %c0_i32_0 : i32, i32
  }
  func.func @transform_9(%arg0: i32) -> (i32, i32) {
    %c0_i32 = arith.constant 0 : i32
    %c0_i32_0 = arith.constant 0 : i32
    %c0_i32_1 = arith.constant 0 : i32
    return %c0_i32, %c0_i32_0 : i32, i32
  }
  func.func @transform_10(%arg0: i32) -> (i32, i32) {
    %c0_i32 = arith.constant 0 : i32
    %c0_i32_0 = arith.constant 0 : i32
    return %arg0, %c0_i32 : i32, i32
  }
}

module attributes {stable_mosaic.version = 11 : i64} {
  func.func @kernel(%arg0: i32, %arg1: memref<8x16xbf16, #tpu.memory_space<vmem>>, %arg2: memref<8x128xbf16, #tpu.memory_space<vmem>>, %arg3: memref<16x384xbf16, #tpu.memory_space<vmem>>, %arg4: memref<1x384xf32, #tpu.memory_space<vmem>>, %arg5: memref<512x640xbf16, #tpu.memory_space<vmem>>, %arg6: memref<1x640xf32, #tpu.memory_space<vmem>>, %arg7: memref<640x640xbf16, #tpu.memory_space<vmem>>, %arg8: memref<1x640xf32, #tpu.memory_space<vmem>>, %arg9: memref<1x640xf32, #tpu.memory_space<vmem>>, %arg10: memref<1x128xf32, #tpu.memory_space<vmem>>, %arg11: memref<8x128xbf16, #tpu.memory_space<vmem>>) attributes {dimension_semantics = [#tpu.dimension_semantics<parallel>], iteration_bounds = array<i64: 1>, scalar_prefetch = 0 : i64, scratch_operands = 0 : i64, tpu.core_type = #tpu.core_type<tc>, window_params = [{transform_indices = @transform_0, window_bounds = array<i64: 8, 16>}, {transform_indices = @transform_1, window_bounds = array<i64: 8, 128>}, {pipeline_mode = #tpu.pipeline_mode<synchronous>, transform_indices = @transform_2, window_bounds = array<i64: 16, 384>}, {pipeline_mode = #tpu.pipeline_mode<synchronous>, transform_indices = @transform_3, window_bounds = array<i64: 1, 384>}, {pipeline_mode = #tpu.pipeline_mode<synchronous>, transform_indices = @transform_4, window_bounds = array<i64: 512, 640>}, {pipeline_mode = #tpu.pipeline_mode<synchronous>, transform_indices = @transform_5, window_bounds = array<i64: 1, 640>}, {pipeline_mode = #tpu.pipeline_mode<synchronous>, transform_indices = @transform_6, window_bounds = array<i64: 640, 640>}, {pipeline_mode = #tpu.pipeline_mode<synchronous>, transform_indices = @transform_7, window_bounds = array<i64: 1, 640>}, {pipeline_mode = #tpu.pipeline_mode<synchronous>, transform_indices = @transform_8, window_bounds = array<i64: 1, 640>}, {pipeline_mode = #tpu.pipeline_mode<synchronous>, transform_indices = @transform_9, window_bounds = array<i64: 1, 128>}, {transform_indices = @transform_10, window_bounds = array<i64: 8, 128>}]} {
    %c0 = arith.constant 0 : index
    %c0_0 = arith.constant 0 : index
    %0 = vector.load %arg1[%c0, %c0_0] : memref<8x16xbf16, #tpu.memory_space<vmem>>, vector<8x16xbf16>
    %c0_1 = arith.constant 0 : index
    %c0_2 = arith.constant 0 : index
    %1 = vector.load %arg3[%c0_1, %c0_2] : memref<16x384xbf16, #tpu.memory_space<vmem>>, vector<16x384xbf16>
    %cst = arith.constant dense<0.000000e+00> : vector<8x384xf32>
    %2 = tpu.matmul %0, %1, %cst {dimension_numbers = #tpu.dot_dimension_numbers<[1], [0], [0], [1], [0, 0, 1, 1], [], []>} : vector<8x16xbf16>, vector<16x384xbf16>, vector<8x384xf32> -> vector<8x384xf32>
    %c0_3 = arith.constant 0 : index
    %c0_4 = arith.constant 0 : index
    %3 = vector.load %arg4[%c0_3, %c0_4] : memref<1x384xf32, #tpu.memory_space<vmem>>, vector<1x384xf32>
    %4 = vector.broadcast %3 : vector<1x384xf32> to vector<8x384xf32>
    %5 = arith.addf %2, %4 : vector<8x384xf32>
    %cst_5 = arith.constant 0.000000e+00 : f32
    %6 = vector.broadcast %cst_5 : f32 to vector<8x384xf32>
    %7 = arith.maximumf %5, %6 : vector<8x384xf32>
    %8 = arith.truncf %7 : vector<8x384xf32> to vector<8x384xbf16>
    %c0_6 = arith.constant 0 : index
    %c0_7 = arith.constant 0 : index
    %9 = vector.load %arg2[%c0_6, %c0_7] : memref<8x128xbf16, #tpu.memory_space<vmem>>, vector<8x128xbf16>
    %10 = tpu.concatenate %8, %9 in 1 : vector<8x384xbf16>, vector<8x128xbf16> -> vector<8x512xbf16>
    %c0_8 = arith.constant 0 : index
    %c0_9 = arith.constant 0 : index
    %11 = vector.load %arg5[%c0_8, %c0_9] : memref<512x640xbf16, #tpu.memory_space<vmem>>, vector<512x640xbf16>
    %cst_10 = arith.constant dense<0.000000e+00> : vector<8x640xf32>
    %12 = tpu.matmul %10, %11, %cst_10 {dimension_numbers = #tpu.dot_dimension_numbers<[1], [0], [0], [1], [0, 0, 1, 1], [], []>} : vector<8x512xbf16>, vector<512x640xbf16>, vector<8x640xf32> -> vector<8x640xf32>
    %c0_11 = arith.constant 0 : index
    %c0_12 = arith.constant 0 : index
    %13 = vector.load %arg6[%c0_11, %c0_12] : memref<1x640xf32, #tpu.memory_space<vmem>>, vector<1x640xf32>
    %14 = vector.broadcast %13 : vector<1x640xf32> to vector<8x640xf32>
    %15 = arith.addf %12, %14 : vector<8x640xf32>
    %16 = arith.truncf %15 : vector<8x640xf32> to vector<8x640xbf16>
    %c0_13 = arith.constant 0 : index
    %c0_14 = arith.constant 0 : index
    %17 = vector.load %arg7[%c0_13, %c0_14] : memref<640x640xbf16, #tpu.memory_space<vmem>>, vector<640x640xbf16>
    %cst_15 = arith.constant dense<0.000000e+00> : vector<8x640xf32>
    %18 = tpu.matmul %16, %17, %cst_15 {dimension_numbers = #tpu.dot_dimension_numbers<[1], [0], [0], [1], [0, 0, 1, 1], [], []>} : vector<8x640xbf16>, vector<640x640xbf16>, vector<8x640xf32> -> vector<8x640xf32>
    %c0_16 = arith.constant 0 : index
    %c0_17 = arith.constant 0 : index
    %19 = vector.load %arg8[%c0_16, %c0_17] : memref<1x640xf32, #tpu.memory_space<vmem>>, vector<1x640xf32>
    %20 = vector.broadcast %19 : vector<1x640xf32> to vector<8x640xf32>
    %21 = arith.addf %18, %20 : vector<8x640xf32>
    %cst_18 = arith.constant 0.000000e+00 : f32
    %22 = vector.broadcast %cst_18 : f32 to vector<8x640xf32>
    %23 = arith.maximumf %21, %22 : vector<8x640xf32>
    %c0_19 = arith.constant 0 : index
    %c0_20 = arith.constant 0 : index
    %24 = vector.load %arg9[%c0_19, %c0_20] : memref<1x640xf32, #tpu.memory_space<vmem>>, vector<1x640xf32>
    %25 = vector.broadcast %24 : vector<1x640xf32> to vector<8x640xf32>
    %26 = arith.mulf %23, %25 : vector<8x640xf32>
    %cst_21 = arith.constant dense<0.000000e+00> : vector<8xf32>
    %27 = vector.multi_reduction <add>, %26, %cst_21 [1] : vector<8x640xf32> to vector<8xf32>
    %28 = vector.shape_cast %27 : vector<8xf32> to vector<8x1xf32>
    %29 = vector.shape_cast %28 : vector<8x1xf32> to vector<8x1xf32>
    %30 = vector.broadcast %29 : vector<8x1xf32> to vector<8x128xf32>
    %c0_22 = arith.constant 0 : index
    %c0_23 = arith.constant 0 : index
    %31 = vector.load %arg10[%c0_22, %c0_23] : memref<1x128xf32, #tpu.memory_space<vmem>>, vector<1x128xf32>
    %32 = vector.broadcast %31 : vector<1x128xf32> to vector<8x128xf32>
    %33 = arith.addf %30, %32 : vector<8x128xf32>
    %34 = arith.truncf %33 : vector<8x128xf32> to vector<8x128xbf16>
    %c0_24 = arith.constant 0 : index
    %c0_25 = arith.constant 0 : index
    %35 = vector.load %arg11[%c0_24, %c0_25] : memref<8x128xbf16, #tpu.memory_space<vmem>>, vector<8x128xbf16>
    tpu.vector_store %arg11[%c0_24, %c0_25], %34 {strides = array<i32>} : memref<8x128xbf16, #tpu.memory_space<vmem>>, vector<8x128xbf16>,
    return
  }
  func.func @transform_0(%arg0: i32) -> (i32, i32) {
    %c0_i32 = arith.constant 0 : i32
    %c0_i32_0 = arith.constant 0 : i32
    return %arg0, %c0_i32 : i32, i32
  }
  func.func @transform_1(%arg0: i32) -> (i32, i32) {
    %c0_i32 = arith.constant 0 : i32
    %c0_i32_0 = arith.constant 0 : i32
    return %arg0, %c0_i32 : i32, i32
  }
  func.func @transform_2(%arg0: i32) -> (i32, i32) {
    %c0_i32 = arith.constant 0 : i32
    %c0_i32_0 = arith.constant 0 : i32
    %c0_i32_1 = arith.constant 0 : i32
    return %c0_i32, %c0_i32_0 : i32, i32
  }
  func.func @transform_3(%arg0: i32) -> (i32, i32) {
    %c0_i32 = arith.constant 0 : i32
    %c0_i32_0 = arith.constant 0 : i32
    %c0_i32_1 = arith.constant 0 : i32
    return %c0_i32, %c0_i32_0 : i32, i32
  }
  func.func @transform_4(%arg0: i32) -> (i32, i32) {
    %c0_i32 = arith.constant 0 : i32
    %c0_i32_0 = arith.constant 0 : i32
    %c0_i32_1 = arith.constant 0 : i32
    return %c0_i32, %c0_i32_0 : i32, i32
  }
  func.func @transform_5(%arg0: i32) -> (i32, i32) {
    %c0_i32 = arith.constant 0 : i32
    %c0_i32_0 = arith.constant 0 : i32
    %c0_i32_1 = arith.constant 0 : i32
    return %c0_i32, %c0_i32_0 : i32, i32
  }
  func.func @transform_6(%arg0: i32) -> (i32, i32) {
    %c0_i32 = arith.constant 0 : i32
    %c0_i32_0 = arith.constant 0 : i32
    %c0_i32_1 = arith.constant 0 : i32
    return %c0_i32, %c0_i32_0 : i32, i32
  }
  func.func @transform_7(%arg0: i32) -> (i32, i32) {
    %c0_i32 = arith.constant 0 : i32
    %c0_i32_0 = arith.constant 0 : i32
    %c0_i32_1 = arith.constant 0 : i32
    return %c0_i32, %c0_i32_0 : i32, i32
  }
  func.func @transform_8(%arg0: i32) -> (i32, i32) {
    %c0_i32 = arith.constant 0 : i32
    %c0_i32_0 = arith.constant 0 : i32
    %c0_i32_1 = arith.constant 0 : i32
    return %c0_i32, %c0_i32_0 : i32, i32
  }
  func.func @transform_9(%arg0: i32) -> (i32, i32) {
    %c0_i32 = arith.constant 0 : i32
    %c0_i32_0 = arith.constant 0 : i32
    %c0_i32_1 = arith.constant 0 : i32
    return %c0_i32, %c0_i32_0 : i32, i32
  }
  func.func @transform_10(%arg0: i32) -> (i32, i32) {
    %c0_i32 = arith.constant 0 : i32
    %c0_i32_0 = arith.constant 0 : i32
    return %arg0, %c0_i32 : i32, i32
  }
}

</mosaic_0001>

<bundles_post_ra>
// kernel: tpu_custom_call.1
= control target key start
LH: loop header
LB: loop body
LE: loop exit
PB: predicated region body
PF: predicated region fallthrough
CT: control target
= control target key end

     0   :  { %15 = vsyncpa [#allocation3], 0  ;;  %s4788_s0 = inlined_call_operand.hbm [shape: bf16[8,16], index: 0, kind: input, shape index: {}]   ;;  %s4789_s1 = inlined_call_operand.hbm [shape: bf16[8,128], index: 1, kind: input, shape index: {}]   ;;  %s4790_s2 = inlined_call_operand.hbm [shape: bf16[16,384], index: 2, kind: input, shape index: {}]   ;;  %s4791_s3 = inlined_call_operand.hbm [shape: f32[1,384], index: 3, kind: input, shape index: {}]   ;;  %s4792_s4 = inlined_call_operand.hbm [shape: bf16[512,640], index: 4, kind: input, shape index: {}]   ;;  %s4793_s5 = inlined_call_operand.vmem [shape: f32[1,640], index: 5, kind: input, shape index: {}]   ;;  %s4794_s6 = inlined_call_operand.hbm [shape: bf16[640,640], index: 6, kind: input, shape index: {}]   ;;  %s4795_s7 = inlined_call_operand.vmem [shape: f32[1,640], index: 7, kind: input, shape index: {}]   ;;  %s4796_s8 = inlined_call_operand.vmem [shape: f32[1,640], index: 8, kind: input, shape index: {}]   ;;  %s4797_s9 = inlined_call_operand.vmem [shape: f32[1,128], index: 9, kind: input, shape index: {}]   ;;  %s4798_s10 = inlined_call_operand.hbm [shape: bf16[8,128], index: 10, kind: output, shape index: {}]  }
   0x1   :  { %16 = vsyncpa [#allocation6], 0 }
   0x2   :  { %17 = vsyncpa [#allocation9], 0 }
   0x3   :  { %18 = vsyncpa [#allocation12], 0 }
   0x4   :  { %19 = vsyncpa [#allocation4], 0  ;;  %s4496_s13 = smov [#allocation5]   ;;  %s4497_s15 = smov [#allocation8]  }
   0x5   :  { %s36_s14 = sshll.u32 %s4496_s13, 4  ;;  %s58_s16 = sshll.u32 %s4497_s15, 4  ;;  %s37_s14 = int_to_ptr.vmem [resolvable:$true] %s36_s14  ;;  %s59_s16 = int_to_ptr.vmem [resolvable:$true] %s58_s16 }
   0x6   :  { %s4332_s19 = scalar_lea.hbm %s4789_s1, 64 }
   0x7   :  { %p4333_p0 = scmp.ne.s32.totalorder %s4789_s1, %s4332_s19  ;;  %p4336_p1 = scmp.lt.u32.totalorder %s4332_s19, %s4789_s1 }
   0x9   :  { %p4338_p2 = pnand %p4336_p1, %p4333_p0 }
   0xb   :  { %4341 = shalt.err (!%p4338_p2)
}
   0xc   :  { %s4342_s24 = scalar_lea.vmem %s37_s14, 64  ;;  %p4347_p4 = scmp.lt.s32.totalorder %s37_s14, %s37_s14 }
   0xd   :  { %p4343_p3 = scmp.ne.s32.totalorder %s37_s14, %s4342_s24  ;;  %p4348_p5 = scmp.lt.s32.totalorder %s4342_s24, %s4342_s24 }
   0xf   :  { %p4349_p6 = por %p4348_p5, %p4347_p4 }
  0x11   :  { %p4350_p7 = pnand %p4349_p6, %p4343_p3 }
  0x13   :  { %4353 = shalt.err (!%p4350_p7)
}
  0x14   :  { %39 = dma.hbm_to_vmem [thread:$0]  %s4789_s1, 64, %s37_s14, [#allocation6]  }
  0x15   :  { %s4354_s29 = scalar_lea.hbm %s4791_s3, 48 }
  0x16   :  { %p4355_p8 = scmp.ne.s32.totalorder %s4791_s3, %s4354_s29  ;;  %p4358_p9 = scmp.lt.u32.totalorder %s4354_s29, %s4791_s3 }
  0x18   :  { %p4360_p10 = pnand %p4358_p9, %p4355_p8 }
  0x1a   :  { %4363 = shalt.err (!%p4360_p10)
}
  0x1b   :  { %s4364_s15 = scalar_lea.vmem %s59_s16, 48  ;;  %s4368_s17 = scalar_lea.vmem %s59_s16, 64 }
  0x1c   :  { %p4365_p11 = scmp.ne.s32.totalorder %s59_s16, %s4364_s15  ;;  %p4369_p12 = scmp.lt.s32.totalorder %s59_s16, %s59_s16 }
  0x1d   :  { %p4370_p13 = scmp.lt.s32.totalorder %s4368_s17, %s4364_s15 }
  0x1f   :  { %p4371_p0 = por %p4370_p13, %p4369_p12 }
  0x21   :  { %p4372_p1 = pnand %p4371_p0, %p4365_p11 }
  0x23   :  { %4375 = shalt.err (!%p4372_p1)
}
  0x24   :  { %61 = dma.hbm_to_vmem [thread:$0]  %s4791_s3, 48, %s59_s16, [#allocation9]  }
  0x25   :  { %s4498_s18 = smov [#allocation2]   ;;  %s4499_s20 = smov [#allocation7]  }
  0x26   :  { %s26_s19 = sshll.u32 %s4498_s18, 4  ;;  %s45_s21 = sshll.u32 %s4499_s20, 4  ;;  %s27_s19 = int_to_ptr.vmem [resolvable:$true] %s26_s19  ;;  %s4589_s21 = int_to_ptr.vmem [resolvable:$true] %s45_s21 }
  0x27   :  { %s4376_s24 = scalar_lea.hbm %s4788_s0, 64 }
  0x28   :  { %p4377_p2 = scmp.ne.s32.totalorder %s4788_s0, %s4376_s24  ;;  %p4380_p3 = scmp.lt.u32.totalorder %s4376_s24, %s4788_s0 }
  0x2a   :  { %p4382_p4 = pnand %p4380_p3, %p4377_p2 }
  0x2c   :  { %4385 = shalt.err (!%p4382_p4)
}
  0x2d   :  { %s4386_s3 = scalar_lea.vmem %s27_s19, 64  ;;  %p4391_p6 = scmp.lt.s32.totalorder %s27_s19, %s27_s19 }
  0x2e   :  { %p4387_p5 = scmp.ne.s32.totalorder %s27_s19, %s4386_s3  ;;  %p4392_p7 = scmp.lt.s32.totalorder %s4386_s3, %s4386_s3 }
  0x30   :  { %p4393_p8 = por %p4392_p7, %p4391_p6 }
  0x32   :  { %p4394_p9 = pnand %p4393_p8, %p4387_p5 }
  0x34   :  { %4397 = shalt.err (!%p4394_p9)
}
  0x35   :  { %29 = dma.hbm_to_vmem [thread:$0]  %s4788_s0, 64, %s27_s19, [#allocation3]  }
  0x36   :  { %s4398_s12 = scalar_lea.hbm %s4790_s2, 384 }
  0x37   :  { %p4399_p10 = scmp.ne.s32.totalorder %s4790_s2, %s4398_s12  ;;  %p4402_p11 = scmp.lt.u32.totalorder %s4398_s12, %s4790_s2 }
  0x39   :  { %p4404_p12 = pnand %p4402_p11, %p4399_p10 }
  0x3b   :  { %4407 = shalt.err (!%p4404_p12)
}
  0x3c   :  { %s4408_s14 = scalar_lea.vmem %s4589_s21, 384  ;;  %p4413_p0 = scmp.lt.s32.totalorder %s4589_s21, %s4589_s21 }
  0x3d   :  { %p4409_p13 = scmp.ne.s32.totalorder %s4589_s21, %s4408_s14  ;;  %p4414_p1 = scmp.lt.s32.totalorder %s4408_s14, %s4408_s14 }
  0x3f   :  { %p4415_p2 = por %p4414_p1, %p4413_p0 }
  0x41   :  { %p4416_p3 = pnand %p4415_p2, %p4409_p13 }
  0x43   :  { %4419 = shalt.err (!%p4416_p3)
}
  0x44   :  { %s4500_s0 = smov 192   ;;  %s4501_s18 = smov 12  }
  0x45   :  { %51 = dma.hbm_to_vmem [thread:$0]  %s4790_s2, 384, %s4589_s21, [#allocation6], %s4500_s0, %s4500_s0, %s4501_s18  }
  0x46   :  { %s4502_s22 = smov [#allocation10]   ;;  %s4420_s26 = scalar_lea.hbm %s4792_s4, 20480 }
  0x47   :  { %s67_s23 = sshll.u32 %s4502_s22, 4  ;;  %p4421_p4 = scmp.ne.s32.totalorder %s4792_s4, %s4420_s26  ;;  %s68_s23 = int_to_ptr.vmem [resolvable:$true] %s67_s23 }
  0x48   :  { %p4424_p5 = scmp.lt.u32.totalorder %s4420_s26, %s4792_s4 }
  0x4a   :  { %p4426_p6 = pnand %p4424_p5, %p4421_p4 }
  0x4c   :  { %4429 = shalt.err (!%p4426_p6)
}
  0x4d   :  { %s4430_s29 = scalar_lea.vmem %s68_s23, 20480  ;;  %p4435_p8 = scmp.lt.s32.totalorder %s68_s23, %s68_s23 }
  0x4e   :  { %p4431_p7 = scmp.ne.s32.totalorder %s68_s23, %s4430_s29  ;;  %p4436_p9 = scmp.lt.s32.totalorder %s4430_s29, %s4430_s29 }
  0x50   :  { %p4437_p10 = por %p4436_p9, %p4435_p8 }
  0x52   :  { %p4438_p11 = pnand %p4437_p10, %p4431_p7 }
  0x54   :  { %4441 = shalt.err (!%p4438_p11)
}
  0x55   :  { %s4503_s2 = smov 320   ;;  %s4504_s21 = smov 20  }
  0x56   :  { %73 = dma.hbm_to_vmem [thread:$0]  %s4792_s4, 20480, %s68_s23, [#allocation9], %s4503_s2, %s4503_s2, %s4504_s21  }
  0x57   :  { %s4505_s12 = smov [#allocation11]   ;;  %s4442_s1 = scalar_lea.hbm %s4794_s6, 25600 }
  0x58   :  { %s81_s13 = sshll.u32 %s4505_s12, 4  ;;  %p4443_p12 = scmp.ne.s32.totalorder %s4794_s6, %s4442_s1  ;;  %s82_s13 = int_to_ptr.vmem [resolvable:$true] %s81_s13 }
  0x59   :  { %p4446_p13 = scmp.lt.u32.totalorder %s4442_s1, %s4794_s6 }
  0x5b   :  { %p4448_p0 = pnand %p4446_p13, %p4443_p12 }
  0x5d   :  { %4451 = shalt.err (!%p4448_p0)
}
  0x5e   :  { %s4452_s20 = scalar_lea.vmem %s82_s13, 25600  ;;  %p4457_p2 = scmp.lt.s32.totalorder %s82_s13, %s82_s13 }
  0x5f   :  { %p4453_p1 = scmp.ne.s32.totalorder %s82_s13, %s4452_s20  ;;  %p4458_p3 = scmp.lt.s32.totalorder %s4452_s20, %s4452_s20 }
  0x61   :  { %p4459_p4 = por %p4458_p3, %p4457_p2 }
  0x63   :  { %p4460_p5 = pnand %p4459_p4, %p4453_p1 }
  0x65   :  { %4463 = shalt.err (!%p4460_p5)
}
  0x66   :  { %87 = dma.hbm_to_vmem [thread:$0]  %s4794_s6, 25600, %s82_s13, [#allocation12], %s4503_s2, %s4503_s2, %s4504_s21  }
  0x67   :  { %4486 = dma.done.wait [#allocation3], 64  }
  0x68   :  { %4487 = vsyncadd [#allocation3], 4294967232 }
  0x69   :  { %4488 = dma.done.wait [#allocation6], 448  }
  0x6a   :  { %4489 = vsyncadd [#allocation6], 4294966848 }
  0x6b   :  { %4490 = dma.done.wait [#allocation9], 20528  }
  0x6c   :  { %4491 = vsyncadd [#allocation9], 4294946768 }
  0x6d   :  { %4492 = dma.done.wait [#allocation12], 25600  }
  0x6e   :  { %4493 = vsyncadd [#allocation12], 4294941696  ;;  %v4506_v0 = vmov 0   ;;  %v3824_v1 = vld [vmem:[#allocation7 + $0x4] ss:$12 sps:$4 sm:$0xff]   ;;  %vm151_vm0 = vcmask 130048  }
  0x6f   :  { %187 = vmatprep.mubr.bf16.mxu1 %v4506_v0  ;;  %v3826_v2 = vld [vmem:[#allocation7] ss:$12 sps:$4 sm:$0xff]   ;;  %v113_v3 = vld [vmem:[#allocation2] sm:$0xf]  ;;  %155 = vmatprep.subr.bf16.mxu1 %v3824_v1  ;;  %v3827_v4 = vld [vmem:[#allocation7 + $0x8] ss:$12 sps:$4 sm:$0xff]  }
  0x70   :  { %156 = vmatpush1.bf16.msra.mxu1 %v3826_v2  ;;  %v3828_v5 = vld [vmem:[#allocation10 + $0x4] ss:$20 sps:$4 sm:$0xff]   ;;  %v4507_v6 = vmov 0.0   ;;  %v3832_v7 = vld [vmem:[#allocation10 + $0xc] ss:$20 sps:$4 sm:$0xff]   ;;  %vm4508_vm1 = vmmov 0  }
  0x71   :  { %3752 = vmatprep.subr.bf16.mxu1 %v4507_v6  ;;  %1294 = vmatprep.subr.bf16.mxu0 %v3828_v5  ;;  %v3833_v8 = vld [vmem:[#allocation10] ss:$20 sps:$4 sm:$0xff]   ;;  %v3839_v10 = vld [vmem:[#allocation10 + $0x28] ss:$20 sps:$4 sm:$0xff]   ;;  %v3845_v14 = vld [vmem:[#allocation10 + $0x50] ss:$20 sps:$4 sm:$0xff]  }
  0x72   :  { %v3834_v9 = vld [vmem:[#allocation10 + $0x2c] ss:$20 sps:$4 sm:$0xff]   ;;  %1295 = vmatpush1.bf16.msra.mxu0 %v3833_v8  ;;  %v3840_v11 = vld [vmem:[#allocation10 + $0x54] ss:$20 sps:$4 sm:$0xff]   ;;  %v3846_v15 = vld [vmem:[#allocation10 + $0x7c] ss:$20 sps:$4 sm:$0xff]  }
  0x73   :  { %3290 = vmatmul.mubr.msk.bf16.vlgmr.msra.gmra.mrb[0].mxu1 %vm151_vm0, %v113_v3  ;;  %1296 = vmatprep.subr.bf16.mxu0 %v3834_v9  ;;  %v3830_v12 = vld [vmem:[#allocation10 + $0x8] ss:$20 sps:$4 sm:$0xff]   ;;  %v3836_v16 = vld [vmem:[#allocation10 + $0x30] ss:$20 sps:$4 sm:$0xff]   ;;  %v3851_v18 = vld [vmem:[#allocation10 + $0x78] ss:$20 sps:$4 sm:$0xff]  }
  0x74   :  { %3753 = vmatpush3.bf16.msra.mxu1 %v3827_v4  ;;  %3754 = vmatprep.mubr.msk.bf16.mxu1 %vm4508_vm1, %v4507_v6  ;;  %v3838_v13 = vld [vmem:[#allocation10 + $0x34] ss:$20 sps:$4 sm:$0xff]   ;;  %v3844_v17 = vld [vmem:[#allocation10 + $0x5c] ss:$20 sps:$4 sm:$0xff]   ;;  %v3852_v19 = vld [vmem:[#allocation10 + $0xa4] ss:$20 sps:$4 sm:$0xff]  }
  0x75   :  { %1376 = vmatprep.subr.bf16.mxu1 %v3832_v7  ;;  %v3842_v20 = vld [vmem:[#allocation10 + $0x58] ss:$20 sps:$4 sm:$0xff]   ;;  %v3857_v22 = vld [vmem:[#allocation10 + $0xa0] ss:$20 sps:$4 sm:$0xff]   ;;  %v3863_v26 = vld [vmem:[#allocation10 + $0xc8] ss:$20 sps:$4 sm:$0xff]  }
  0x76   :  { %1297 = vmatpush1.bf16.msra.mxu0 %v3839_v10  ;;  %v3850_v21 = vld [vmem:[#allocation10 + $0x84] ss:$20 sps:$4 sm:$0xff]   ;;  %v3858_v23 = vld [vmem:[#allocation10 + $0xcc] ss:$20 sps:$4 sm:$0xff]   ;;  %v3864_v27 = vld [vmem:[#allocation10 + $0xf4] ss:$20 sps:$4 sm:$0xff]   ;;  %v120_v10 = vlaneseq }
  0x77   :  { %1298 = vmatprep.subr.bf16.mxu0 %v3840_v11  ;;  %v3848_v24 = vld [vmem:[#allocation10 + $0x80] ss:$20 sps:$4 sm:$0xff]   ;;  %v3854_v28 = vld [vmem:[#allocation10 + $0xa8] ss:$20 sps:$4 sm:$0xff]   ;;  %v3869_v30 = vld [vmem:[#allocation10 + $0xf0] ss:$20 sps:$4 sm:$0xff]  }
  0x78   :  { %v3856_v25 = vld [vmem:[#allocation10 + $0xac] ss:$20 sps:$4 sm:$0xff]   ;;  %v3862_v29 = vld [vmem:[#allocation10 + $0xd4] ss:$20 sps:$4 sm:$0xff]   ;;  %v3870_v31 = vld [vmem:[#allocation10 + $0x11c] ss:$20 sps:$4 sm:$0xff]  }
  0x79   :  { %v3860_v32 = vld [vmem:[#allocation10 + $0xd0] ss:$20 sps:$4 sm:$0xff]   ;;  %v3875_v34 = vld [vmem:[#allocation10 + $0x118] ss:$20 sps:$4 sm:$0xff]   ;;  %v3881_v38 = vld [vmem:[#allocation10 + $0x140] ss:$20 sps:$4 sm:$0xff]  }
  0x7a   :  { %1299 = vmatpush1.bf16.msra.mxu0 %v3845_v14  ;;  %v3868_v33 = vld [vmem:[#allocation10 + $0xfc] ss:$20 sps:$4 sm:$0xff]   ;;  %v3876_v35 = vld [vmem:[#allocation10 + $0x144] ss:$20 sps:$4 sm:$0xff]   ;;  %v3882_v39 = vld [vmem:[#allocation10 + $0x16c] ss:$20 sps:$4 sm:$0xff]  }
  0x7b   :  { %3755 = vmatmul.mubr.msk.bf16.vlgmr.msra.gmra.mrb[4].mxu1 %vm151_vm0, %v113_v3  ;;  %1300 = vmatprep.subr.bf16.mxu0 %v3846_v15  ;;  %v3866_v36 = vld [vmem:[#allocation10 + $0xf8] ss:$20 sps:$4 sm:$0xff]   ;;  %v3872_v40 = vld [vmem:[#allocation10 + $0x120] ss:$20 sps:$4 sm:$0xff]   ;;  %v3887_v42 = vld [vmem:[#allocation10 + $0x168] ss:$20 sps:$4 sm:$0xff]  }
  0x7c   :  { %1377 = vmatpush1.bf16.msra.mxu1 %v3830_v12  ;;  %v3874_v37 = vld [vmem:[#allocation10 + $0x124] ss:$20 sps:$4 sm:$0xff]   ;;  %v3880_v41 = vld [vmem:[#allocation10 + $0x14c] ss:$20 sps:$4 sm:$0xff]   ;;  %v3888_v43 = vld [vmem:[#allocation10 + $0x194] ss:$20 sps:$4 sm:$0xff]  }
  0x7d   :  { %1378 = vmatprep.subr.bf16.mxu1 %v3838_v13  ;;  %v3878_v44 = vld [vmem:[#allocation10 + $0x148] ss:$20 sps:$4 sm:$0xff]   ;;  %v3893_v46 = vld [vmem:[#allocation10 + $0x190] ss:$20 sps:$4 sm:$0xff]   ;;  %v3899_v50 = vld [vmem:[#allocation10 + $0x1b8] ss:$20 sps:$4 sm:$0xff]  }
  0x7e   :  { %1301 = vmatpush1.bf16.msra.mxu0 %v3851_v18  ;;  %v3886_v45 = vld [vmem:[#allocation10 + $0x174] ss:$20 sps:$4 sm:$0xff]   ;;  %v3894_v47 = vld [vmem:[#allocation10 + $0x1bc] ss:$20 sps:$4 sm:$0xff]   ;;  %v3900_v51 = vld [vmem:[#allocation10 + $0x1e4] ss:$20 sps:$4 sm:$0xff]  }
  0x7f   :  { %1302 = vmatprep.subr.bf16.mxu0 %v3852_v19  ;;  %v3884_v48 = vld [vmem:[#allocation10 + $0x170] ss:$20 sps:$4 sm:$0xff]   ;;  %v3890_v52 = vld [vmem:[#allocation10 + $0x198] ss:$20 sps:$4 sm:$0xff]   ;;  %v3905_v54 = vld [vmem:[#allocation10 + $0x1e0] ss:$20 sps:$4 sm:$0xff]  }
  0x80   :  { %1379 = vmatpush1.bf16.msra.mxu1 %v3836_v16  ;;  %v3892_v49 = vld [vmem:[#allocation10 + $0x19c] ss:$20 sps:$4 sm:$0xff]   ;;  %v3898_v53 = vld [vmem:[#allocation10 + $0x1c4] ss:$20 sps:$4 sm:$0xff]   ;;  %v3906_v55 = vld [vmem:[#allocation10 + $0x20c] ss:$20 sps:$4 sm:$0xff]  }
  0x81   :  { %1380 = vmatprep.subr.bf16.mxu1 %v3844_v17  ;;  %v3896_v56 = vld [vmem:[#allocation10 + $0x1c0] ss:$20 sps:$4 sm:$0xff]   ;;  %v3911_v58 = vld [vmem:[#allocation10 + $0x208] ss:$20 sps:$4 sm:$0xff]   ;;  %v3908_v61 = vld [vmem:[#allocation10 + $0x210] ss:$20 sps:$4 sm:$0xff]  }
  0x82   :  { %1303 = vmatpush1.bf16.msra.mxu0 %v3857_v22  ;;  %v3904_v57 = vld [vmem:[#allocation10 + $0x1ec] ss:$20 sps:$4 sm:$0xff]   ;;  %v3902_v59 = vld [vmem:[#allocation10 + $0x1e8] ss:$20 sps:$4 sm:$0xff]   ;;  %v3917_v2 = vld [vmem:[#allocation10 + $0x230] ss:$20 sps:$4 sm:$0xff]  }
  0x83   :  { %1304 = vmatprep.subr.bf16.mxu0 %v3858_v23  ;;  %v3910_v60 = vld [vmem:[#allocation10 + $0x214] ss:$20 sps:$4 sm:$0xff]   ;;  %v3916_v63 = vld [vmem:[#allocation10 + $0x23c] ss:$20 sps:$4 sm:$0xff]   ;;  %v3914_v1 = vld [vmem:[#allocation10 + $0x238] ss:$20 sps:$4 sm:$0xff]  }
  0x84   :  { %1381 = vmatpush1.bf16.msra.mxu1 %v3842_v20  ;;  %v3912_v62 = vld [vmem:[#allocation10 + $0x234] ss:$20 sps:$4 sm:$0xff]   ;;  %v3918_v3 = vld [vmem:[#allocation10 + $0x25c] ss:$20 sps:$4 sm:$0xff]   ;;  %v3922_v4 = vld [vmem:[#allocation10 + $0x264] ss:$20 sps:$4 sm:$0xff]  }
  0x85   :  { %1382 = vmatprep.subr.bf16.mxu1 %v3850_v21  ;;  %v3920_v5 = vld [vmem:[#allocation10 + $0x260] ss:$20 sps:$4 sm:$0xff]   ;;  %v3923_v7 = vld [vmem:[#allocation10 + $0x258] ss:$20 sps:$4 sm:$0xff]   ;;  %v4650_v11 = vshrl.u32 %v120_v10, 7  ;;  %s4509_s27 = smov [#allocation13]  }
  0x86   :  { %1305 = vmatpush1.bf16.msra.mxu0 %v3863_v26  ;;  %v3926_v8 = vld [vmem:[#allocation10 + $0x284] ss:$20 sps:$4 sm:$0xff]   ;;  %v3929_v9 = vld [vmem:[#allocation10 + $0x28c] ss:$20 sps:$4 sm:$0xff]   ;;  %v4655_v13 = vld [vmem:[#allocation8] sm:$0x7] }
  0x87   :  { %1306 = vmatprep.subr.bf16.mxu0 %v3864_v27  ;;  %v4653_v12 = vsub.s32 0, %v4650_v11  ;;  %v4658_v14 = vsub.s32 1, %v4650_v11  ;;  %v3924_v26 = vld [vmem:[#allocation10 + $0x280] ss:$20 sps:$4 sm:$0xff]   ;;  %v3927_v27 = vld [vmem:[#allocation10 + $0x288] ss:$20 sps:$4 sm:$0xff]  }
  0x88   :  { %1383 = vmatpush1.bf16.msra.mxu1 %v3848_v24  ;;  %v3984_v10 = vld [vmem:[#allocation10 + $0x410] ss:$20 sps:$4 sm:$0xff]   ;;  %s3275_s28 = sshll.u32 %s4509_s27, 4  ;;  %s3276_s28 = int_to_ptr.vmem [resolvable:$true] %s3275_s28 }
  0x89   :  { %1384 = vmatprep.subr.bf16.mxu1 %v3856_v25  ;;  %v123_v15 = vrot.slane %v4655_v13, %v4653_v12  ;;  %v127_v16 = vrot.slane %v4655_v13, %v4658_v14  ;;  %s4464_s3 = scalar_lea.vmem %s3276_s28, 64  ;;  %p4469_p7 = scmp.lt.s32.totalorder %s3276_s28, %s3276_s28 }
  0x8a   :  { %1307 = vmatpush1.bf16.msra.mxu0 %v3869_v30  ;;  %v3935_v30 = vld [vmem:[#allocation10 + $0x2b4] ss:$20 sps:$4 sm:$0xff]   ;;  %p4465_p6 = scmp.ne.s32.totalorder %s3276_s28, %s4464_s3  ;;  %p4470_p8 = scmp.lt.s32.totalorder %s4464_s3, %s4464_s3 }
  0x8b   :  { %1308 = vmatprep.subr.bf16.mxu0 %v3870_v31 }
  0x8c   :  { %1385 = vmatpush1.bf16.msra.mxu1 %v3854_v28  ;;  %p4471_p9 = por %p4470_p8, %p4469_p7 }
  0x8d   :  { %1386 = vmatprep.subr.bf16.mxu1 %v3862_v29  ;;  %v3932_v29 = vld [vmem:[#allocation10 + $0x2ac] ss:$20 sps:$4 sm:$0xff]  }
  0x8e   :  { %1309 = vmatpush1.bf16.msra.mxu0 %v3875_v34  ;;  %v3930_v34 = vld [vmem:[#allocation10 + $0x2a8] ss:$20 sps:$4 sm:$0xff]   ;;  %p4472_p10 = pnand %p4471_p9, %p4465_p6 }
  0x8f   :  { %1310 = vmatprep.subr.bf16.mxu0 %v3876_v35  ;;  %v3933_v35 = vld [vmem:[#allocation10 + $0x2b0] ss:$20 sps:$4 sm:$0xff]  }
  0x90   :  { %1387 = vmatpush1.bf16.msra.mxu1 %v3860_v32 }
  0x91   :  { %1388 = vmatprep.subr.bf16.mxu1 %v3868_v33  ;;  %v4674_v33 = vld [vmem:[#allocation5] sm:$0xf] }
  0x92   :  { %1311 = vmatpush1.bf16.msra.mxu0 %v3881_v38  ;;  %v3941_v38 = vld [vmem:[#allocation10 + $0x2dc] ss:$20 sps:$4 sm:$0xff]  }
  0x93   :  { %1312 = vmatprep.subr.bf16.mxu0 %v3882_v39 }
  0x94   :  { %1389 = vmatpush1.bf16.msra.mxu1 %v3866_v36 }
  0x95   :  { %1390 = vmatprep.subr.bf16.mxu1 %v3874_v37  ;;  %v3938_v37 = vld [vmem:[#allocation10 + $0x2d4] ss:$20 sps:$4 sm:$0xff]  }
  0x96   :  { %1313 = vmatpush1.bf16.msra.mxu0 %v3887_v42  ;;  %v3944_v42 = vld [vmem:[#allocation10 + $0x2fc] ss:$20 sps:$4 sm:$0xff]  }
  0x97   :  { %1314 = vmatprep.subr.bf16.mxu0 %v3888_v43  ;;  %v3947_v43 = vld [vmem:[#allocation10 + $0x304] ss:$20 sps:$4 sm:$0xff]  }
  0x98   :  { %1391 = vmatpush1.bf16.msra.mxu1 %v3872_v40  ;;  %v3936_v40 = vld [vmem:[#allocation10 + $0x2d0] ss:$20 sps:$4 sm:$0xff]  }
  0x99   :  { %1392 = vmatprep.subr.bf16.mxu1 %v3880_v41  ;;  %v3939_v41 = vld [vmem:[#allocation10 + $0x2d8] ss:$20 sps:$4 sm:$0xff]  }
  0x9a   :  { %1315 = vmatpush1.bf16.msra.mxu0 %v3893_v46  ;;  %v3950_v46 = vld [vmem:[#allocation10 + $0x324] ss:$20 sps:$4 sm:$0xff]  }
  0x9b   :  { %1316 = vmatprep.subr.bf16.mxu0 %v3894_v47  ;;  %v3953_v47 = vld [vmem:[#allocation10 + $0x32c] ss:$20 sps:$4 sm:$0xff]  }
  0x9c   :  { %1393 = vmatpush1.bf16.msra.mxu1 %v3878_v44  ;;  %v3942_v44 = vld [vmem:[#allocation10 + $0x2f8] ss:$20 sps:$4 sm:$0xff]  }
  0x9d   :  { %1394 = vmatprep.subr.bf16.mxu1 %v3886_v45  ;;  %v3945_v45 = vld [vmem:[#allocation10 + $0x300] ss:$20 sps:$4 sm:$0xff]  }
  0x9e   :  { %1317 = vmatpush1.bf16.msra.mxu0 %v3899_v50  ;;  %v3956_v50 = vld [vmem:[#allocation10 + $0x34c] ss:$20 sps:$4 sm:$0xff]  }
  0x9f   :  { %1318 = vmatprep.subr.bf16.mxu0 %v3900_v51  ;;  %v3959_v51 = vld [vmem:[#allocation10 + $0x354] ss:$20 sps:$4 sm:$0xff]  }
  0xa0   :  { %1395 = vmatpush1.bf16.msra.mxu1 %v3884_v48  ;;  %v3948_v48 = vld [vmem:[#allocation10 + $0x320] ss:$20 sps:$4 sm:$0xff]  }
  0xa1   :  { %1396 = vmatprep.subr.bf16.mxu1 %v3892_v49  ;;  %v3951_v49 = vld [vmem:[#allocation10 + $0x328] ss:$20 sps:$4 sm:$0xff]  }
  0xa2   :  { %1319 = vmatpush1.bf16.msra.mxu0 %v3905_v54  ;;  %v3962_v54 = vld [vmem:[#allocation10 + $0x374] ss:$20 sps:$4 sm:$0xff]  }
  0xa3   :  { %1320 = vmatprep.subr.bf16.mxu0 %v3906_v55  ;;  %v3965_v55 = vld [vmem:[#allocation10 + $0x37c] ss:$20 sps:$4 sm:$0xff]  }
  0xa4   :  { %1397 = vmatpush1.bf16.msra.mxu1 %v3890_v52  ;;  %v3954_v52 = vld [vmem:[#allocation10 + $0x348] ss:$20 sps:$4 sm:$0xff]  }
  0xa5   :  { %1398 = vmatprep.subr.bf16.mxu1 %v3898_v53  ;;  %v3957_v53 = vld [vmem:[#allocation10 + $0x350] ss:$20 sps:$4 sm:$0xff]  }
  0xa6   :  { %1321 = vmatpush1.bf16.msra.mxu0 %v3911_v58  ;;  %v3968_v58 = vld [vmem:[#allocation10 + $0x39c] ss:$20 sps:$4 sm:$0xff]  }
  0xa7   :  { %1322 = vmatprep.subr.bf16.mxu0 %v3912_v62  ;;  %v3974_v62 = vld [vmem:[#allocation10 + $0x3c4] ss:$20 sps:$4 sm:$0xff]  }
  0xa8   :  { %1399 = vmatpush1.bf16.msra.mxu1 %v3896_v56  ;;  %v3960_v56 = vld [vmem:[#allocation10 + $0x370] ss:$20 sps:$4 sm:$0xff]  }
  0xa9   :  { %1400 = vmatprep.subr.bf16.mxu1 %v3904_v57  ;;  %v3963_v57 = vld [vmem:[#allocation10 + $0x378] ss:$20 sps:$4 sm:$0xff]  }
  0xaa   :  { %1323 = vmatpush1.bf16.msra.mxu0 %v3917_v2  ;;  %v3975_v2 = vld [vmem:[#allocation10 + $0x3c8] ss:$20 sps:$4 sm:$0xff]  }
  0xab   :  { %1324 = vmatprep.subr.bf16.mxu0 %v3918_v3  ;;  %v3980_v3 = vld [vmem:[#allocation10 + $0x3ec] ss:$20 sps:$4 sm:$0xff]  }
  0xac   :  { %1401 = vmatpush1.bf16.msra.mxu1 %v3902_v59  ;;  %v3971_v59 = vld [vmem:[#allocation10 + $0x3a4] ss:$20 sps:$4 sm:$0xff]  }
  0xad   :  { %1402 = vmatprep.subr.bf16.mxu1 %v3910_v60  ;;  %v3966_v60 = vld [vmem:[#allocation10 + $0x398] ss:$20 sps:$4 sm:$0xff]  }
  0xae   :  { %1325 = vmatpush1.bf16.msra.mxu0 %v3923_v7  ;;  %v3981_v7 = vld [vmem:[#allocation10 + $0x3f0] ss:$20 sps:$4 sm:$0xff]  }
  0xaf   :  { %1335 = vmatprep.subr.bf16.mxu0 %v3926_v8  ;;  %v3986_v8 = vld [vmem:[#allocation10 + $0x414] ss:$20 sps:$4 sm:$0xff]  }
  0xb0   :  { %1403 = vmatpush1.bf16.msra.mxu1 %v3908_v61  ;;  %v3969_v61 = vld [vmem:[#allocation10 + $0x3a0] ss:$20 sps:$4 sm:$0xff]  }
  0xb1   :  { %1404 = vmatprep.subr.bf16.mxu1 %v3916_v63  ;;  %v3977_v63 = vld [vmem:[#allocation10 + $0x3cc] ss:$20 sps:$4 sm:$0xff]  }
  0xb4   :  { %1405 = vmatpush1.bf16.msra.mxu1 %v3914_v1  ;;  %v3972_v1 = vld [vmem:[#allocation10 + $0x3c0] ss:$20 sps:$4 sm:$0xff]  }
  0xb5   :  { %1406 = vmatprep.subr.bf16.mxu1 %v3922_v4  ;;  %v3983_v4 = vld [vmem:[#allocation10 + $0x3f4] ss:$20 sps:$4 sm:$0xff]  }
  0xb8   :  { %1407 = vmatpush1.bf16.msra.mxu1 %v3920_v5  ;;  %v3978_v5 = vld [vmem:[#allocation10 + $0x3e8] ss:$20 sps:$4 sm:$0xff]  }
  0xb9   :  { %1417 = vmatprep.subr.bf16.mxu1 %v3929_v9  ;;  %v3989_v9 = vld [vmem:[#allocation10 + $0x41c] ss:$20 sps:$4 sm:$0xff]  }
 0x146   :  { %v189_v17 = vpop.f32.mrb[0].mxu1 }
 0x147   :  { %v190_v18 = vadd.f32 %v189_v17, %v123_v15  ;;  %v191_v19 = vpop.f32.mrb[1].mxu1  ;;  %v3987_v15 = vld [vmem:[#allocation10 + $0x418] ss:$20 sps:$4 sm:$0xff]  }
 0x148   :  { %v192_v20 = vadd.f32 %v191_v19, %v127_v16  ;;  %v193_v21 = vpop.f32.mrb[2].mxu1  ;;  %v3992_v16 = vld [vmem:[#allocation10 + $0x43c] ss:$20 sps:$4 sm:$0xff]   ;;  %v3995_v17 = vld [vmem:[#allocation10 + $0x444] ss:$20 sps:$4 sm:$0xff]  }
 0x149   :  { %v236_v22 = vmax.f32 %v190_v18, 0.0  ;;  %v194_v23 = vpop.f32.mrb[3].mxu1  ;;  %v3990_v18 = vld [vmem:[#allocation10 + $0x438] ss:$20 sps:$4 sm:$0xff]   ;;  %v3993_v19 = vld [vmem:[#allocation10 + $0x440] ss:$20 sps:$4 sm:$0xff]  }
 0x14a   :  { %v237_v24 = vmax.f32 %v192_v20, 0.0  ;;  %v3998_v20 = vld [vmem:[#allocation10 + $0x464] ss:$20 sps:$4 sm:$0xff]   ;;  %v4001_v21 = vld [vmem:[#allocation10 + $0x46c] ss:$20 sps:$4 sm:$0xff]  }
 0x14b   :  { %v4666_v28 = vpack.c.bf16 %v236_v22, %v236_v22  ;;  %v4679_v22 = vsub.s32 2, %v4650_v11  ;;  %v3996_v23 = vld [vmem:[#allocation10 + $0x460] ss:$20 sps:$4 sm:$0xff]  }
 0x14c   :  { %v4664_v25 = vpack.c.bf16 %v237_v24, %v237_v24  ;;  %v3999_v24 = vld [vmem:[#allocation10 + $0x468] ss:$20 sps:$4 sm:$0xff]  }
 0x14e   :  { %1326 = vmatprep.mubr.bf16.mxu0 %v4664_v25  ;;  %1408 = vmatprep.mubr.bf16.mxu1 %v4664_v25  ;;  %v4670_v31 = vpop.f32.mrb[4].mxu1 }
 0x14f   :  { %1327 = vmatmul.mubr.bf16.vlgmr.msra.gmra.mrb[0].mxu0 %v4666_v28  ;;  %1409 = vmatmul.mubr.bf16.vlgmr.msra.gmra.mrb[8].mxu1 %v4666_v28  ;;  %v3756_v32 = vpop.f32.mrb[5].mxu1 }
 0x150   :  { %1336 = vmatpush1.bf16.msra.mxu0 %v3924_v26  ;;  %1418 = vmatpush1.bf16.msra.mxu1 %v3927_v27  ;;  %v233_v36 = vpop.f32.mrb[6].mxu1  ;;  %v4004_v26 = vld [vmem:[#allocation10 + $0x48c] ss:$20 sps:$4 sm:$0xff]   ;;  %v4007_v27 = vld [vmem:[#allocation10 + $0x494] ss:$20 sps:$4 sm:$0xff]  }
 0x151   :  { %1337 = vmatprep.subr.bf16.mxu0 %v3932_v29  ;;  %1419 = vmatprep.subr.bf16.mxu1 %v3935_v30  ;;  %v3757_v39 = vpop.f32.mrb[7].mxu1  ;;  %v131_v29 = vrot.slane %v4655_v13, %v4679_v22  ;;  %v4002_v30 = vld [vmem:[#allocation10 + $0x488] ss:$20 sps:$4 sm:$0xff]   ;;  %v4005_v32 = vld [vmem:[#allocation10 + $0x490] ss:$20 sps:$4 sm:$0xff]  }
 0x152   :  { %1367 = vmatprep.mubr.bf16.mxu0 %v4674_v33  ;;  %1449 = vmatprep.mubr.bf16.mxu1 %v4674_v33  ;;  %v4016_v39 = vld [vmem:[#allocation10 + $0x4dc] ss:$20 sps:$4 sm:$0xff]   ;;  %v4014_v13 = vld [vmem:[#allocation10 + $0x4d8] ss:$20 sps:$4 sm:$0xff]  }
 0x153   :  { %v231_v36 = vadd.f32 %v4670_v31, %v131_v29  ;;  %v4022_v31 = vld [vmem:[#allocation10 + $0x10] ss:$20 sps:$4 sm:$0xff]   ;;  %v4067_v29 = vld [vmem:[#allocation11 + $0x58] ss:$20 sps:$4 sm:$0xff]  }
 0x154   :  { %1338 = vmatpush1.bf16.msra.mxu0 %v3930_v34  ;;  %1420 = vmatpush1.bf16.msra.mxu1 %v3933_v35  ;;  %v4010_v34 = vld [vmem:[#allocation10 + $0x4b4] ss:$20 sps:$4 sm:$0xff]   ;;  %v4013_v35 = vld [vmem:[#allocation10 + $0x4bc] ss:$20 sps:$4 sm:$0xff]  }
 0x155   :  { %1339 = vmatprep.subr.bf16.mxu0 %v3938_v37  ;;  %1421 = vmatprep.subr.bf16.mxu1 %v3941_v38  ;;  %v4008_v37 = vld [vmem:[#allocation10 + $0x4b0] ss:$20 sps:$4 sm:$0xff]   ;;  %v4011_v38 = vld [vmem:[#allocation10 + $0x4b8] ss:$20 sps:$4 sm:$0xff]  }
 0x158   :  { %1340 = vmatpush1.bf16.msra.mxu0 %v3936_v40  ;;  %1422 = vmatpush1.bf16.msra.mxu1 %v3939_v41  ;;  %v4019_v40 = vld [vmem:[#allocation10 + $0x4e4] ss:$20 sps:$4 sm:$0xff]   ;;  %v238_v41 = vmax.f32 %v231_v36, 0.0  ;;  %v4081_v36 = vld [vmem:[#allocation11 + $0xac] ss:$20 sps:$4 sm:$0xff]  }
 0x159   :  { %1341 = vmatprep.subr.bf16.mxu0 %v3944_v42  ;;  %1423 = vmatprep.subr.bf16.mxu1 %v3947_v43  ;;  %v4017_v42 = vld [vmem:[#allocation10 + $0x4e0] ss:$20 sps:$4 sm:$0xff]   ;;  %v4020_v43 = vld [vmem:[#allocation10 + $0x150] ss:$20 sps:$4 sm:$0xff]  }
 0x15c   :  { %1342 = vmatpush1.bf16.msra.mxu0 %v3942_v44  ;;  %1424 = vmatpush1.bf16.msra.mxu1 %v3945_v45  ;;  %v4021_v44 = vld [vmem:[#allocation10 + $0x3d0] ss:$20 sps:$4 sm:$0xff]   ;;  %v4684_v45 = vpack.c.bf16 %v238_v41, %v238_v41  ;;  %v4082_v41 = vld [vmem:[#allocation11 + $0xc8] ss:$20 sps:$4 sm:$0xff]  }
 0x15d   :  { %1343 = vmatprep.subr.bf16.mxu0 %v3950_v46  ;;  %1425 = vmatprep.subr.bf16.mxu1 %v3953_v47  ;;  %v4023_v46 = vld [vmem:[#allocation10 + $0x290] ss:$20 sps:$4 sm:$0xff]   ;;  %v4024_v47 = vld [vmem:[#allocation10 + $0x178] ss:$20 sps:$4 sm:$0xff]  }
 0x160   :  { %1344 = vmatpush1.bf16.msra.mxu0 %v3948_v48  ;;  %1426 = vmatpush1.bf16.msra.mxu1 %v3951_v49  ;;  %v4025_v48 = vld [vmem:[#allocation10 + $0x3f8] ss:$20 sps:$4 sm:$0xff]  }
 0x161   :  { %1345 = vmatprep.subr.bf16.mxu0 %v3956_v50  ;;  %1427 = vmatprep.subr.bf16.mxu1 %v3959_v51  ;;  %v4026_v49 = vld [vmem:[#allocation10 + $0x38] ss:$20 sps:$4 sm:$0xff]   ;;  %v4028_v51 = vld [vmem:[#allocation10 + $0x1a0] ss:$20 sps:$4 sm:$0xff]  }
 0x162   :  { %v4027_v50 = vld [vmem:[#allocation10 + $0x2b8] ss:$20 sps:$4 sm:$0xff]  }
 0x164   :  { %1346 = vmatpush1.bf16.msra.mxu0 %v3954_v52  ;;  %1428 = vmatpush1.bf16.msra.mxu1 %v3957_v53  ;;  %v4029_v52 = vld [vmem:[#allocation10 + $0x420] ss:$20 sps:$4 sm:$0xff]  }
 0x165   :  { %1347 = vmatprep.subr.bf16.mxu0 %v3962_v54  ;;  %1429 = vmatprep.subr.bf16.mxu1 %v3965_v55  ;;  %v4030_v53 = vld [vmem:[#allocation10 + $0x60] ss:$20 sps:$4 sm:$0xff]   ;;  %v4032_v55 = vld [vmem:[#allocation10 + $0x1c8] ss:$20 sps:$4 sm:$0xff]  }
 0x166   :  { %v4031_v54 = vld [vmem:[#allocation10 + $0x2e0] ss:$20 sps:$4 sm:$0xff]  }
 0x168   :  { %1348 = vmatpush1.bf16.msra.mxu0 %v3960_v56  ;;  %1430 = vmatpush1.bf16.msra.mxu1 %v3963_v57  ;;  %v4033_v56 = vld [vmem:[#allocation10 + $0x448] ss:$20 sps:$4 sm:$0xff]  }
 0x169   :  { %1349 = vmatprep.subr.bf16.mxu0 %v3968_v58  ;;  %1431 = vmatprep.subr.bf16.mxu1 %v3971_v59  ;;  %v4034_v57 = vld [vmem:[#allocation10 + $0x88] ss:$20 sps:$4 sm:$0xff]   ;;  %v4036_v58 = vld [vmem:[#allocation10 + $0x1f0] ss:$20 sps:$4 sm:$0xff]  }
 0x16a   :  { %v4037_v59 = vld [vmem:[#allocation10 + $0x470] ss:$20 sps:$4 sm:$0xff]  }
 0x16c   :  { %1350 = vmatpush1.bf16.msra.mxu0 %v3966_v60  ;;  %1432 = vmatpush1.bf16.msra.mxu1 %v3969_v61  ;;  %v4038_v60 = vld [vmem:[#allocation10 + $0xb0] ss:$20 sps:$4 sm:$0xff]   ;;  %v4040_v61 = vld [vmem:[#allocation10 + $0x218] ss:$20 sps:$4 sm:$0xff]  }
 0x16d   :  { %1351 = vmatprep.subr.bf16.mxu0 %v3974_v62  ;;  %1433 = vmatprep.subr.bf16.mxu1 %v3977_v63  ;;  %v4041_v62 = vld [vmem:[#allocation10 + $0x498] ss:$20 sps:$4 sm:$0xff]  }
 0x16e   :  { %v4042_v63 = vld [vmem:[#allocation10 + $0xd8] ss:$20 sps:$4 sm:$0xff]  }
 0x170   :  { %1352 = vmatpush1.bf16.msra.mxu0 %v3972_v1  ;;  %1434 = vmatpush1.bf16.msra.mxu1 %v3975_v2  ;;  %v4043_v1 = vld [vmem:[#allocation10 + $0x358] ss:$20 sps:$4 sm:$0xff]   ;;  %v4044_v2 = vld [vmem:[#allocation10 + $0x240] ss:$20 sps:$4 sm:$0xff]  }
 0x171   :  { %1353 = vmatprep.subr.bf16.mxu0 %v3980_v3  ;;  %1435 = vmatprep.subr.bf16.mxu1 %v3983_v4  ;;  %v4045_v3 = vld [vmem:[#allocation10 + $0x4c0] ss:$20 sps:$4 sm:$0xff]  }
 0x172   :  { %v4046_v4 = vld [vmem:[#allocation10 + $0x100] ss:$20 sps:$4 sm:$0xff]  }
 0x174   :  { %1354 = vmatpush1.bf16.msra.mxu0 %v3978_v5  ;;  %1436 = vmatpush1.bf16.msra.mxu1 %v3981_v7  ;;  %v4047_v5 = vld [vmem:[#allocation10 + $0x380] ss:$20 sps:$4 sm:$0xff]   ;;  %v4048_v7 = vld [vmem:[#allocation10 + $0x268] ss:$20 sps:$4 sm:$0xff]  }
 0x175   :  { %1355 = vmatprep.subr.bf16.mxu0 %v3986_v8  ;;  %1437 = vmatprep.subr.bf16.mxu1 %v3989_v9  ;;  %v4049_v8 = vld [vmem:[#allocation10 + $0x4e8] ss:$20 sps:$4 sm:$0xff]  }
 0x176   :  { %v4050_v9 = vld [vmem:[#allocation10 + $0x128] ss:$20 sps:$4 sm:$0xff]  }
 0x178   :  { %1356 = vmatpush1.bf16.msra.mxu0 %v3984_v10  ;;  %1438 = vmatpush1.bf16.msra.mxu1 %v3987_v15  ;;  %v4051_v10 = vld [vmem:[#allocation10 + $0x3a8] ss:$20 sps:$4 sm:$0xff]   ;;  %v4054_v15 = vld [vmem:[#allocation11 + $0x4] ss:$20 sps:$4 sm:$0xff]  }
 0x179   :  { %1357 = vmatprep.subr.bf16.mxu0 %v3992_v16  ;;  %1439 = vmatprep.subr.bf16.mxu1 %v3995_v17  ;;  %v4057_v16 = vld [vmem:[#allocation11 + $0xc] ss:$20 sps:$4 sm:$0xff]  }
 0x17a   :  { %v4052_v17 = vld [vmem:[#allocation11] ss:$20 sps:$4 sm:$0xff]  }
 0x17c   :  { %1358 = vmatpush1.bf16.msra.mxu0 %v3990_v18  ;;  %1440 = vmatpush1.bf16.msra.mxu1 %v3993_v19  ;;  %v4055_v18 = vld [vmem:[#allocation11 + $0x8] ss:$20 sps:$4 sm:$0xff]   ;;  %v4060_v19 = vld [vmem:[#allocation11 + $0x2c] ss:$20 sps:$4 sm:$0xff]  }
 0x17d   :  { %1359 = vmatprep.subr.bf16.mxu0 %v3998_v20  ;;  %1441 = vmatprep.subr.bf16.mxu1 %v4001_v21  ;;  %v4063_v20 = vld [vmem:[#allocation11 + $0x34] ss:$20 sps:$4 sm:$0xff]  }
 0x17e   :  { %v4058_v21 = vld [vmem:[#allocation11 + $0x28] ss:$20 sps:$4 sm:$0xff]  }
 0x180   :  { %1360 = vmatpush1.bf16.msra.mxu0 %v3996_v23  ;;  %1442 = vmatpush1.bf16.msra.mxu1 %v3999_v24  ;;  %v4061_v23 = vld [vmem:[#allocation11 + $0x30] ss:$20 sps:$4 sm:$0xff]   ;;  %v4066_v24 = vld [vmem:[#allocation11 + $0x54] ss:$20 sps:$4 sm:$0xff]  }
 0x181   :  { %1361 = vmatprep.subr.bf16.mxu0 %v4004_v26  ;;  %1443 = vmatprep.subr.bf16.mxu1 %v4007_v27  ;;  %v4069_v26 = vld [vmem:[#allocation11 + $0x5c] ss:$20 sps:$4 sm:$0xff]  }
 0x182   :  { %v4064_v27 = vld [vmem:[#allocation11 + $0x50] ss:$20 sps:$4 sm:$0xff]  }
 0x184   :  { %1362 = vmatpush1.bf16.msra.mxu0 %v4002_v30  ;;  %1444 = vmatpush1.bf16.msra.mxu1 %v4005_v32  ;;  %v4072_v30 = vld [vmem:[#allocation11 + $0x7c] ss:$20 sps:$4 sm:$0xff]   ;;  %v4075_v32 = vld [vmem:[#allocation11 + $0x84] ss:$20 sps:$4 sm:$0xff]  }
 0x185   :  { %1363 = vmatprep.subr.bf16.mxu0 %v4010_v34  ;;  %1445 = vmatprep.subr.bf16.mxu1 %v4013_v35  ;;  %v4073_v34 = vld [vmem:[#allocation11 + $0x80] ss:$20 sps:$4 sm:$0xff]   ;;  %v4078_v35 = vld [vmem:[#allocation11 + $0xa4] ss:$20 sps:$4 sm:$0xff]  }
 0x188   :  { %1364 = vmatpush1.bf16.msra.mxu0 %v4008_v37  ;;  %1446 = vmatpush1.bf16.msra.mxu1 %v4011_v38  ;;  %v4076_v37 = vld [vmem:[#allocation11 + $0xa0] ss:$20 sps:$4 sm:$0xff]   ;;  %v4079_v38 = vld [vmem:[#allocation11 + $0xa8] ss:$20 sps:$4 sm:$0xff]  }
 0x189   :  { %1365 = vmatprep.subr.bf16.mxu0 %v4016_v39  ;;  %1447 = vmatprep.subr.bf16.mxu1 %v4019_v40  ;;  %v4084_v39 = vld [vmem:[#allocation11 + $0xcc] ss:$20 sps:$4 sm:$0xff]   ;;  %v4087_v40 = vld [vmem:[#allocation11 + $0xd4] ss:$20 sps:$4 sm:$0xff]  }
 0x18c   :  { %1366 = vmatpush1.bf16.msra.mxu0 %v4014_v13  ;;  %1448 = vmatpush1.bf16.msra.mxu1 %v4017_v42  ;;  %v4085_v13 = vld [vmem:[#allocation11 + $0xd0] ss:$20 sps:$4 sm:$0xff]   ;;  %v4090_v42 = vld [vmem:[#allocation11 + $0xf4] ss:$20 sps:$4 sm:$0xff]  }
 0x18d   :  { %3655 = vmatprep.subr.bf16.mxu0 %v4020_v43  ;;  %3677 = vmatprep.subr.bf16.mxu1 %v4021_v44  ;;  %v4093_v43 = vld [vmem:[#allocation11 + $0xfc] ss:$20 sps:$4 sm:$0xff]  }
 0x18e   :  { %v4088_v44 = vld [vmem:[#allocation11 + $0xf0] ss:$20 sps:$4 sm:$0xff]  }
 0x18f   :  { %1368 = vmatmul.mubr.bf16.vlgmr.msra.gmra.mrb[0].mxu0 %v4684_v45  ;;  %1450 = vmatmul.mubr.bf16.vlgmr.msra.gmra.mrb[8].mxu1 %v4684_v45 }
 0x190   :  { %3656 = vmatpush3.bf16.msra.mxu0 %v4022_v31  ;;  %1490 = vmatprep.mubr.bf16.mxu0 %v4664_v25  ;;  %v4035_v25 = vld [vmem:[#allocation10 + $0x308] ss:$20 sps:$4 sm:$0xff]  }
 0x191   :  { %3678 = vmatpush3.bf16.msra.mxu1 %v4023_v46  ;;  %3657 = vmatprep.subr.bf16.mxu0 %v4024_v47  ;;  %v4096_v31 = vld [vmem:[#allocation11 + $0x11c] ss:$20 sps:$4 sm:$0xff]   ;;  %v4099_v46 = vld [vmem:[#allocation11 + $0x124] ss:$20 sps:$4 sm:$0xff]  }
 0x192   :  { %3679 = vmatprep.subr.bf16.mxu1 %v4025_v48  ;;  %1530 = vmatprep.mubr.bf16.mxu1 %v4674_v33  ;;  %v4039_v33 = vld [vmem:[#allocation10 + $0x330] ss:$20 sps:$4 sm:$0xff]   ;;  %v4094_v47 = vld [vmem:[#allocation11 + $0x118] ss:$20 sps:$4 sm:$0xff]   ;;  %v4097_v48 = vld [vmem:[#allocation11 + $0x120] ss:$20 sps:$4 sm:$0xff]  }
 0x194   :  { %3658 = vmatpush3.bf16.msra.mxu0 %v4026_v49  ;;  %v4102_v49 = vld [vmem:[#allocation11 + $0x144] ss:$20 sps:$4 sm:$0xff]  }
 0x195   :  { %3680 = vmatpush3.bf16.msra.mxu1 %v4027_v50  ;;  %3659 = vmatprep.subr.bf16.mxu0 %v4028_v51  ;;  %v4105_v50 = vld [vmem:[#allocation11 + $0x14c] ss:$20 sps:$4 sm:$0xff]  }
 0x196   :  { %3681 = vmatprep.subr.bf16.mxu1 %v4029_v52  ;;  %v4100_v51 = vld [vmem:[#allocation11 + $0x140] ss:$20 sps:$4 sm:$0xff]   ;;  %v4103_v52 = vld [vmem:[#allocation11 + $0x148] ss:$20 sps:$4 sm:$0xff]  }
 0x198   :  { %3660 = vmatpush3.bf16.msra.mxu0 %v4030_v53  ;;  %v4108_v53 = vld [vmem:[#allocation11 + $0x16c] ss:$20 sps:$4 sm:$0xff]  }
 0x199   :  { %3682 = vmatpush3.bf16.msra.mxu1 %v4031_v54  ;;  %3661 = vmatprep.subr.bf16.mxu0 %v4032_v55  ;;  %v4111_v54 = vld [vmem:[#allocation11 + $0x174] ss:$20 sps:$4 sm:$0xff]  }
 0x19a   :  { %3683 = vmatprep.subr.bf16.mxu1 %v4033_v56  ;;  %v4106_v55 = vld [vmem:[#allocation11 + $0x168] ss:$20 sps:$4 sm:$0xff]   ;;  %v4109_v56 = vld [vmem:[#allocation11 + $0x170] ss:$20 sps:$4 sm:$0xff]  }
 0x19c   :  { %3662 = vmatpush3.bf16.msra.mxu0 %v4034_v57  ;;  %v4114_v57 = vld [vmem:[#allocation11 + $0x194] ss:$20 sps:$4 sm:$0xff]  }
 0x19d   :  { %3684 = vmatpush3.bf16.msra.mxu1 %v4035_v25  ;;  %3663 = vmatprep.subr.bf16.mxu0 %v4036_v58  ;;  %v4117_v25 = vld [vmem:[#allocation11 + $0x19c] ss:$20 sps:$4 sm:$0xff]  }
 0x19e   :  { %3685 = vmatprep.subr.bf16.mxu1 %v4037_v59  ;;  %v4112_v58 = vld [vmem:[#allocation11 + $0x190] ss:$20 sps:$4 sm:$0xff]   ;;  %v4115_v59 = vld [vmem:[#allocation11 + $0x198] ss:$20 sps:$4 sm:$0xff]  }
 0x1a0   :  { %3664 = vmatpush3.bf16.msra.mxu0 %v4038_v60  ;;  %v4120_v60 = vld [vmem:[#allocation11 + $0x1bc] ss:$20 sps:$4 sm:$0xff]  }
 0x1a1   :  { %3686 = vmatpush3.bf16.msra.mxu1 %v4039_v33  ;;  %3665 = vmatprep.subr.bf16.mxu0 %v4040_v61  ;;  %v4123_v33 = vld [vmem:[#allocation11 + $0x1c4] ss:$20 sps:$4 sm:$0xff]  }
 0x1a2   :  { %3687 = vmatprep.subr.bf16.mxu1 %v4041_v62  ;;  %v4118_v61 = vld [vmem:[#allocation11 + $0x1b8] ss:$20 sps:$4 sm:$0xff]   ;;  %v4121_v62 = vld [vmem:[#allocation11 + $0x1c0] ss:$20 sps:$4 sm:$0xff]  }
 0x1a4   :  { %3666 = vmatpush3.bf16.msra.mxu0 %v4042_v63  ;;  %v4126_v63 = vld [vmem:[#allocation11 + $0x1e4] ss:$20 sps:$4 sm:$0xff]  }
 0x1a5   :  { %3688 = vmatpush3.bf16.msra.mxu1 %v4043_v1  ;;  %3667 = vmatprep.subr.bf16.mxu0 %v4044_v2  ;;  %v4129_v1 = vld [vmem:[#allocation11 + $0x1ec] ss:$20 sps:$4 sm:$0xff]  }
 0x1a6   :  { %3689 = vmatprep.subr.bf16.mxu1 %v4045_v3  ;;  %v4124_v2 = vld [vmem:[#allocation11 + $0x1e0] ss:$20 sps:$4 sm:$0xff]   ;;  %v4127_v3 = vld [vmem:[#allocation11 + $0x1e8] ss:$20 sps:$4 sm:$0xff]  }
 0x1a8   :  { %3668 = vmatpush3.bf16.msra.mxu0 %v4046_v4  ;;  %v4132_v4 = vld [vmem:[#allocation11 + $0x20c] ss:$20 sps:$4 sm:$0xff]  }
 0x1a9   :  { %3690 = vmatpush3.bf16.msra.mxu1 %v4047_v5  ;;  %3669 = vmatprep.subr.bf16.mxu0 %v4048_v7  ;;  %v4135_v5 = vld [vmem:[#allocation11 + $0x214] ss:$20 sps:$4 sm:$0xff]  }
 0x1aa   :  { %3691 = vmatprep.subr.bf16.mxu1 %v4049_v8  ;;  %v4130_v7 = vld [vmem:[#allocation11 + $0x208] ss:$20 sps:$4 sm:$0xff]   ;;  %v4133_v8 = vld [vmem:[#allocation11 + $0x210] ss:$20 sps:$4 sm:$0xff]  }
 0x1ac   :  { %3670 = vmatpush3.bf16.msra.mxu0 %v4050_v9  ;;  %v4138_v9 = vld [vmem:[#allocation11 + $0x234] ss:$20 sps:$4 sm:$0xff]  }
 0x1ad   :  { %3692 = vmatpush3.bf16.msra.mxu1 %v4051_v10  ;;  %2850 = vmatprep.subr.bf16.mxu0 %v4054_v15  ;;  %v4141_v10 = vld [vmem:[#allocation11 + $0x23c] ss:$20 sps:$4 sm:$0xff]  }
 0x1ae   :  { %2973 = vmatprep.subr.bf16.mxu1 %v4057_v16  ;;  %v4136_v15 = vld [vmem:[#allocation11 + $0x230] ss:$20 sps:$4 sm:$0xff]   ;;  %v4139_v16 = vld [vmem:[#allocation11 + $0x238] ss:$20 sps:$4 sm:$0xff]  }
 0x1af   :  { %1491 = vmatmul.mubr.bf16.vlgmr.msra.gmra.mrb[4].mxu0 %v4666_v28  ;;  %v4070_v28 = vld [vmem:[#allocation11 + $0x78] ss:$20 sps:$4 sm:$0xff]  }
 0x1b0   :  { %1531 = vmatmul.mubr.bf16.vlgmr.msra.gmra.mrb[12].mxu1 %v4684_v45  ;;  %2851 = vmatpush1.bf16.msra.mxu0 %v4052_v17  ;;  %v4091_v45 = vld [vmem:[#allocation11 + $0xf8] ss:$20 sps:$4 sm:$0xff]   ;;  %v4144_v17 = vld [vmem:[#allocation11 + $0x25c] ss:$20 sps:$4 sm:$0xff]  }
 0x1b1   :  { %2974 = vmatpush1.bf16.msra.mxu1 %v4055_v18  ;;  %2852 = vmatprep.subr.bf16.mxu0 %v4060_v19  ;;  %v4147_v18 = vld [vmem:[#allocation11 + $0x264] ss:$20 sps:$4 sm:$0xff]  }
 0x1b2   :  { %2975 = vmatprep.subr.bf16.mxu1 %v4063_v20  ;;  %v4142_v19 = vld [vmem:[#allocation11 + $0x258] ss:$20 sps:$4 sm:$0xff]   ;;  %v4145_v20 = vld [vmem:[#allocation11 + $0x260] ss:$20 sps:$4 sm:$0xff]  }
 0x1b4   :  { %2853 = vmatpush1.bf16.msra.mxu0 %v4058_v21  ;;  %v4150_v21 = vld [vmem:[#allocation11 + $0x284] ss:$20 sps:$4 sm:$0xff]  }
 0x1b5   :  { %2976 = vmatpush1.bf16.msra.mxu1 %v4061_v23  ;;  %2854 = vmatprep.subr.bf16.mxu0 %v4066_v24  ;;  %v4153_v23 = vld [vmem:[#allocation11 + $0x28c] ss:$20 sps:$4 sm:$0xff]   ;;  %v4695_v24 = vld [vmem:[%s4793_s5] sm:$0x1f] }
 0x1b6   :  { %2977 = vmatprep.subr.bf16.mxu1 %v4069_v26  ;;  %v4698_v26 = vsub.s32 3, %v4650_v11 }
 0x1b8   :  { %2855 = vmatpush1.bf16.msra.mxu0 %v4064_v27  ;;  %v440_v27 = vrot.slane %v4695_v24, %v4653_v12 }
 0x1b9   :  { %2978 = vmatpush1.bf16.msra.mxu1 %v4067_v29  ;;  %2856 = vmatprep.subr.bf16.mxu0 %v4072_v30  ;;  %v444_v29 = vrot.slane %v4695_v24, %v4658_v14  ;;  %v452_v30 = vrot.slane %v4695_v24, %v4698_v26 }
 0x1ba   :  { %2979 = vmatprep.subr.bf16.mxu1 %v4075_v32 }
 0x1bc   :  { %2857 = vmatpush1.bf16.msra.mxu0 %v4070_v28 }
 0x1bd   :  { %2980 = vmatpush1.bf16.msra.mxu1 %v4073_v34  ;;  %2858 = vmatprep.subr.bf16.mxu0 %v4078_v35 }
 0x1be   :  { %2981 = vmatprep.subr.bf16.mxu1 %v4081_v36 }
 0x1c0   :  { %2859 = vmatpush1.bf16.msra.mxu0 %v4076_v37 }
 0x1c1   :  { %2982 = vmatpush1.bf16.msra.mxu1 %v4079_v38  ;;  %2860 = vmatprep.subr.bf16.mxu0 %v4084_v39 }
 0x1c2   :  { %2983 = vmatprep.subr.bf16.mxu1 %v4087_v40 }
 0x1c4   :  { %2861 = vmatpush1.bf16.msra.mxu0 %v4082_v41 }
 0x1c5   :  { %2984 = vmatpush1.bf16.msra.mxu1 %v4085_v13  ;;  %2862 = vmatprep.subr.bf16.mxu0 %v4090_v42 }
 0x1c6   :  { %2985 = vmatprep.subr.bf16.mxu1 %v4093_v43  ;;  %v4148_v43 = vld [vmem:[#allocation11 + $0x280] ss:$20 sps:$4 sm:$0xff]  }
 0x1c8   :  { %2863 = vmatpush1.bf16.msra.mxu0 %v4088_v44  ;;  %v4151_v44 = vld [vmem:[#allocation11 + $0x288] ss:$20 sps:$4 sm:$0xff]  }
 0x1c9   :  { %2986 = vmatpush1.bf16.msra.mxu1 %v4091_v45  ;;  %2864 = vmatprep.subr.bf16.mxu0 %v4096_v31  ;;  %v4156_v31 = vld [vmem:[#allocation11 + $0x2ac] ss:$20 sps:$4 sm:$0xff]  }
 0x1ca   :  { %2987 = vmatprep.subr.bf16.mxu1 %v4099_v46  ;;  %v4159_v46 = vld [vmem:[#allocation11 + $0x2b4] ss:$20 sps:$4 sm:$0xff]  }
 0x1cc   :  { %2865 = vmatpush1.bf16.msra.mxu0 %v4094_v47 }
 0x1cd   :  { %2988 = vmatpush1.bf16.msra.mxu1 %v4097_v48  ;;  %2866 = vmatprep.subr.bf16.mxu0 %v4102_v49  ;;  %v4154_v48 = vld [vmem:[#allocation11 + $0x2a8] ss:$20 sps:$4 sm:$0xff]   ;;  %v4157_v49 = vld [vmem:[#allocation11 + $0x2b0] ss:$20 sps:$4 sm:$0xff]  }
 0x1ce   :  { %2989 = vmatprep.subr.bf16.mxu1 %v4105_v50  ;;  %v4162_v50 = vld [vmem:[#allocation11 + $0x2d4] ss:$20 sps:$4 sm:$0xff]  }
 0x1d0   :  { %2867 = vmatpush1.bf16.msra.mxu0 %v4100_v51  ;;  %v4165_v51 = vld [vmem:[#allocation11 + $0x2dc] ss:$20 sps:$4 sm:$0xff]  }
 0x1d1   :  { %2990 = vmatpush1.bf16.msra.mxu1 %v4103_v52  ;;  %2868 = vmatprep.subr.bf16.mxu0 %v4108_v53  ;;  %v4160_v52 = vld [vmem:[#allocation11 + $0x2d0] ss:$20 sps:$4 sm:$0xff]   ;;  %v4163_v53 = vld [vmem:[#allocation11 + $0x2d8] ss:$20 sps:$4 sm:$0xff]  }
 0x1d2   :  { %2991 = vmatprep.subr.bf16.mxu1 %v4111_v54  ;;  %v4168_v54 = vld [vmem:[#allocation11 + $0x2fc] ss:$20 sps:$4 sm:$0xff]  }
 0x1d4   :  { %2869 = vmatpush1.bf16.msra.mxu0 %v4106_v55  ;;  %v4171_v55 = vld [vmem:[#allocation11 + $0x304] ss:$20 sps:$4 sm:$0xff]  }
 0x1d5   :  { %2992 = vmatpush1.bf16.msra.mxu1 %v4109_v56  ;;  %2870 = vmatprep.subr.bf16.mxu0 %v4114_v57  ;;  %v4166_v56 = vld [vmem:[#allocation11 + $0x2f8] ss:$20 sps:$4 sm:$0xff]   ;;  %v4169_v57 = vld [vmem:[#allocation11 + $0x300] ss:$20 sps:$4 sm:$0xff]  }
 0x1d6   :  { %2993 = vmatprep.subr.bf16.mxu1 %v4117_v25  ;;  %v4174_v25 = vld [vmem:[#allocation11 + $0x324] ss:$20 sps:$4 sm:$0xff]  }
 0x1d8   :  { %2871 = vmatpush1.bf16.msra.mxu0 %v4112_v58  ;;  %v4177_v58 = vld [vmem:[#allocation11 + $0x32c] ss:$20 sps:$4 sm:$0xff]  }
 0x1d9   :  { %2994 = vmatpush1.bf16.msra.mxu1 %v4115_v59  ;;  %2872 = vmatprep.subr.bf16.mxu0 %v4120_v60  ;;  %v4172_v59 = vld [vmem:[#allocation11 + $0x320] ss:$20 sps:$4 sm:$0xff]   ;;  %v4175_v60 = vld [vmem:[#allocation11 + $0x328] ss:$20 sps:$4 sm:$0xff]  }
 0x1da   :  { %2995 = vmatprep.subr.bf16.mxu1 %v4123_v33  ;;  %v4180_v33 = vld [vmem:[#allocation11 + $0x34c] ss:$20 sps:$4 sm:$0xff]  }
 0x1dc   :  { %2873 = vmatpush1.bf16.msra.mxu0 %v4118_v61  ;;  %v4183_v61 = vld [vmem:[#allocation11 + $0x354] ss:$20 sps:$4 sm:$0xff]  }
 0x1dd   :  { %2996 = vmatpush1.bf16.msra.mxu1 %v4121_v62  ;;  %2874 = vmatprep.subr.bf16.mxu0 %v4126_v63  ;;  %v4178_v62 = vld [vmem:[#allocation11 + $0x348] ss:$20 sps:$4 sm:$0xff]   ;;  %v4181_v63 = vld [vmem:[#allocation11 + $0x350] ss:$20 sps:$4 sm:$0xff]  }
 0x1de   :  { %2997 = vmatprep.subr.bf16.mxu1 %v4129_v1  ;;  %v4186_v1 = vld [vmem:[#allocation11 + $0x374] ss:$20 sps:$4 sm:$0xff]  }
 0x1e0   :  { %2875 = vmatpush1.bf16.msra.mxu0 %v4124_v2  ;;  %v4189_v2 = vld [vmem:[#allocation11 + $0x37c] ss:$20 sps:$4 sm:$0xff]  }
 0x1e1   :  { %2998 = vmatpush1.bf16.msra.mxu1 %v4127_v3  ;;  %2876 = vmatprep.subr.bf16.mxu0 %v4132_v4  ;;  %v4184_v3 = vld [vmem:[#allocation11 + $0x370] ss:$20 sps:$4 sm:$0xff]   ;;  %v4187_v4 = vld [vmem:[#allocation11 + $0x378] ss:$20 sps:$4 sm:$0xff]  }
 0x1e2   :  { %2999 = vmatprep.subr.bf16.mxu1 %v4135_v5  ;;  %v4721_v5 = vsub.s32 4, %v4650_v11 }
 0x1e4   :  { %2877 = vmatpush1.bf16.msra.mxu0 %v4130_v7  ;;  %v4192_v7 = vld [vmem:[#allocation11 + $0x39c] ss:$20 sps:$4 sm:$0xff]  }
 0x1e5   :  { %3000 = vmatpush1.bf16.msra.mxu1 %v4133_v8  ;;  %2878 = vmatprep.subr.bf16.mxu0 %v4138_v9  ;;  %v4195_v8 = vld [vmem:[#allocation11 + $0x3a4] ss:$20 sps:$4 sm:$0xff]  }
 0x1e6   :  { %3001 = vmatprep.subr.bf16.mxu1 %v4141_v10  ;;  %v456_v10 = vrot.slane %v4695_v24, %v4721_v5 }
 0x1e8   :  { %2879 = vmatpush1.bf16.msra.mxu0 %v4136_v15  ;;  %v4190_v15 = vld [vmem:[#allocation11 + $0x398] ss:$20 sps:$4 sm:$0xff]  }
 0x1e9   :  { %3002 = vmatpush1.bf16.msra.mxu1 %v4139_v16  ;;  %2880 = vmatprep.subr.bf16.mxu0 %v4144_v17  ;;  %v4193_v16 = vld [vmem:[#allocation11 + $0x3a0] ss:$20 sps:$4 sm:$0xff]  }
 0x1ea   :  { %3003 = vmatprep.subr.bf16.mxu1 %v4147_v18 }
 0x1ec   :  { %2881 = vmatpush1.bf16.msra.mxu0 %v4142_v19  ;;  %v4198_v19 = vld [vmem:[#allocation11 + $0x3c4] ss:$20 sps:$4 sm:$0xff]  }
 0x1ed   :  { %3004 = vmatpush1.bf16.msra.mxu1 %v4145_v20  ;;  %2891 = vmatprep.subr.bf16.mxu0 %v4150_v21  ;;  %v4201_v20 = vld [vmem:[#allocation11 + $0x3cc] ss:$20 sps:$4 sm:$0xff]  }
 0x1ee   :  { %3014 = vmatprep.subr.bf16.mxu1 %v4153_v23 }
 0x262   :  { %v1369_v32 = vpop.f32.mrb[0].mxu0  ;;  %v4706_v28 = vpop.f32.mrb[8].mxu1 }
 0x263   :  { %v3778_v34 = vadd.f32 %v1369_v32, %v440_v27  ;;  %v1371_v35 = vpop.f32.mrb[1].mxu0  ;;  %v1453_v36 = vpop.f32.mrb[9].mxu1 }
 0x264   :  { %v3779_v37 = vadd.f32 %v1371_v35, %v444_v29  ;;  %v1373_v38 = vpop.f32.mrb[2].mxu0  ;;  %v1455_v39 = vpop.f32.mrb[10].mxu1  ;;  %v3781_v40 = vadd.f32 %v1453_v36, %v452_v30  ;;  %v4196_v35 = vld [vmem:[#allocation11 + $0x3c0] ss:$20 sps:$4 sm:$0xff]   ;;  %v4199_v36 = vld [vmem:[#allocation11 + $0x3c8] ss:$20 sps:$4 sm:$0xff]  }
 0x265   :  { %v1374_v41 = vpop.f32.mrb[3].mxu0  ;;  %v1456_v13 = vpop.f32.mrb[11].mxu1  ;;  %v4710_v45 = vpack.c.bf16 %v3778_v34, %v3778_v34  ;;  %v4207_v38 = vld [vmem:[#allocation11 + $0x3f4] ss:$20 sps:$4 sm:$0xff]  }
 0x266   :  { %v4708_v42 = vpack.c.bf16 %v3779_v37, %v3779_v37  ;;  %v4714_v47 = vpack.c.bf16 %v3781_v40, %v3781_v40  ;;  %v4204_v37 = vld [vmem:[#allocation11 + $0x3ec] ss:$20 sps:$4 sm:$0xff]   ;;  %v4202_v40 = vld [vmem:[#allocation11 + $0x3e8] ss:$20 sps:$4 sm:$0xff]   ;;  %v4205_v41 = vld [vmem:[#allocation11 + $0x3f0] ss:$20 sps:$4 sm:$0xff]  }
 0x267   :  { %v4210_v13 = vld [vmem:[#allocation11 + $0x414] ss:$20 sps:$4 sm:$0xff]  }
 0x268   :  { %2882 = vmatprep.mubr.bf16.mxu0 %v4708_v42  ;;  %3005 = vmatprep.mubr.bf16.mxu1 %v4708_v42 }
 0x269   :  { %2883 = vmatmul.mubr.bf16.vlgmr.msra.gmra.mrb[8].mxu0 %v4710_v45  ;;  %3006 = vmatmul.mubr.bf16.vlgmr.msra.gmra.mrb[16].mxu1 %v4710_v45 }
 0x26a   :  { %2892 = vmatpush1.bf16.msra.mxu0 %v4148_v43  ;;  %3015 = vmatpush1.bf16.msra.mxu1 %v4151_v44  ;;  %v4213_v43 = vld [vmem:[#allocation11 + $0x41c] ss:$20 sps:$4 sm:$0xff]  }
 0x26b   :  { %2923 = vmatprep.mubr.bf16.mxu0 %v4714_v47  ;;  %3046 = vmatprep.mubr.bf16.mxu1 %v4714_v47  ;;  %v4208_v44 = vld [vmem:[#allocation11 + $0x410] ss:$20 sps:$4 sm:$0xff]  }
 0x26c   :  { %2893 = vmatprep.subr.bf16.mxu0 %v4156_v31  ;;  %3016 = vmatprep.subr.bf16.mxu1 %v4159_v46  ;;  %v4211_v31 = vld [vmem:[#allocation11 + $0x418] ss:$20 sps:$4 sm:$0xff]   ;;  %v4216_v46 = vld [vmem:[#allocation11 + $0x43c] ss:$20 sps:$4 sm:$0xff]  }
 0x26e   :  { %2894 = vmatpush1.bf16.msra.mxu0 %v4154_v48  ;;  %3017 = vmatpush1.bf16.msra.mxu1 %v4157_v49  ;;  %v4219_v48 = vld [vmem:[#allocation11 + $0x444] ss:$20 sps:$4 sm:$0xff]  }
 0x26f   :  { %2895 = vmatprep.subr.bf16.mxu0 %v4162_v50  ;;  %3018 = vmatprep.subr.bf16.mxu1 %v4165_v51  ;;  %v4214_v49 = vld [vmem:[#allocation11 + $0x438] ss:$20 sps:$4 sm:$0xff]   ;;  %v4217_v50 = vld [vmem:[#allocation11 + $0x440] ss:$20 sps:$4 sm:$0xff]  }
 0x270   :  { %v4222_v51 = vld [vmem:[#allocation11 + $0x464] ss:$20 sps:$4 sm:$0xff]  }
 0x272   :  { %2896 = vmatpush1.bf16.msra.mxu0 %v4160_v52  ;;  %3019 = vmatpush1.bf16.msra.mxu1 %v4163_v53  ;;  %v4225_v52 = vld [vmem:[#allocation11 + $0x46c] ss:$20 sps:$4 sm:$0xff]  }
 0x273   :  { %2897 = vmatprep.subr.bf16.mxu0 %v4168_v54  ;;  %3020 = vmatprep.subr.bf16.mxu1 %v4171_v55  ;;  %v4220_v53 = vld [vmem:[#allocation11 + $0x460] ss:$20 sps:$4 sm:$0xff]   ;;  %v4223_v54 = vld [vmem:[#allocation11 + $0x468] ss:$20 sps:$4 sm:$0xff]  }
 0x274   :  { %v4228_v55 = vld [vmem:[#allocation11 + $0x48c] ss:$20 sps:$4 sm:$0xff]  }
 0x276   :  { %2898 = vmatpush1.bf16.msra.mxu0 %v4166_v56  ;;  %3021 = vmatpush1.bf16.msra.mxu1 %v4169_v57  ;;  %v4231_v56 = vld [vmem:[#allocation11 + $0x494] ss:$20 sps:$4 sm:$0xff]  }
 0x277   :  { %2899 = vmatprep.subr.bf16.mxu0 %v4174_v25  ;;  %3022 = vmatprep.subr.bf16.mxu1 %v4177_v58  ;;  %v4226_v57 = vld [vmem:[#allocation11 + $0x488] ss:$20 sps:$4 sm:$0xff]   ;;  %v4229_v25 = vld [vmem:[#allocation11 + $0x490] ss:$20 sps:$4 sm:$0xff]  }
 0x278   :  { %v4234_v58 = vld [vmem:[#allocation11 + $0x4b4] ss:$20 sps:$4 sm:$0xff]  }
 0x27a   :  { %2900 = vmatpush1.bf16.msra.mxu0 %v4172_v59  ;;  %3023 = vmatpush1.bf16.msra.mxu1 %v4175_v60  ;;  %v4237_v59 = vld [vmem:[#allocation11 + $0x4bc] ss:$20 sps:$4 sm:$0xff]  }
 0x27b   :  { %2901 = vmatprep.subr.bf16.mxu0 %v4180_v33  ;;  %3024 = vmatprep.subr.bf16.mxu1 %v4183_v61  ;;  %v4232_v60 = vld [vmem:[#allocation11 + $0x4b0] ss:$20 sps:$4 sm:$0xff]   ;;  %v4235_v33 = vld [vmem:[#allocation11 + $0x4b8] ss:$20 sps:$4 sm:$0xff]   ;;  %v448_v61 = vrot.slane %v4695_v24, %v4679_v22 }
 0x27c   :  { %v4252_v24 = vld [vmem:[#allocation11 + $0x52c] ss:$20 sps:$4 sm:$0xff]  }
 0x27e   :  { %2902 = vmatpush1.bf16.msra.mxu0 %v4178_v62  ;;  %3025 = vmatpush1.bf16.msra.mxu1 %v4181_v63  ;;  %v4240_v62 = vld [vmem:[#allocation11 + $0x4dc] ss:$20 sps:$4 sm:$0xff]   ;;  %v4243_v63 = vld [vmem:[#allocation11 + $0x4e4] ss:$20 sps:$4 sm:$0xff]  }
 0x27f   :  { %2903 = vmatprep.subr.bf16.mxu0 %v4186_v1  ;;  %3026 = vmatprep.subr.bf16.mxu1 %v4189_v2  ;;  %v4238_v1 = vld [vmem:[#allocation11 + $0x4d8] ss:$20 sps:$4 sm:$0xff]   ;;  %v4241_v2 = vld [vmem:[#allocation11 + $0x4e0] ss:$20 sps:$4 sm:$0xff]  }
 0x282   :  { %2904 = vmatpush1.bf16.msra.mxu0 %v4184_v3  ;;  %3027 = vmatpush1.bf16.msra.mxu1 %v4187_v4  ;;  %v3671_v9 = vpop.f32.mrb[4].mxu0  ;;  %v3780_v3 = vadd.f32 %v4706_v28, %v448_v61  ;;  %v4246_v4 = vld [vmem:[#allocation11 + $0x504] ss:$20 sps:$4 sm:$0xff]   ;;  %v4250_v28 = vld [vmem:[#allocation11 + $0x528] ss:$20 sps:$4 sm:$0xff]  }
 0x283   :  { %v3693_v17 = vpop.f32.mrb[12].mxu1  ;;  %v3672_v18 = vpop.f32.mrb[5].mxu0  ;;  %2905 = vmatprep.subr.bf16.mxu0 %v4192_v7  ;;  %3028 = vmatprep.subr.bf16.mxu1 %v4195_v8  ;;  %v4249_v7 = vld [vmem:[#allocation11 + $0x50c] ss:$20 sps:$4 sm:$0xff]   ;;  %v4308_v61 = vld [vmem:[#allocation11 + $0x1f0] ss:$20 sps:$4 sm:$0xff]  }
 0x284   :  { %v3673_v11 = vadd.f32 %v3672_v18, %v3671_v9  ;;  %v3694_v21 = vpop.f32.mrb[13].mxu1  ;;  %v3674_v23 = vpop.f32.mrb[6].mxu0  ;;  %v4244_v8 = vld [vmem:[#allocation11 + $0x500] ss:$20 sps:$4 sm:$0xff]   ;;  %v4247_v9 = vld [vmem:[#allocation11 + $0x508] ss:$20 sps:$4 sm:$0xff]  }
 0x285   :  { %v3695_v27 = vadd.f32 %v3694_v21, %v3693_v17  ;;  %v3696_v29 = vpop.f32.mrb[14].mxu1  ;;  %v3675_v30 = vpop.f32.mrb[7].mxu0  ;;  %v4258_v17 = vld [vmem:[#allocation11 + $0x554] ss:$20 sps:$4 sm:$0xff]   ;;  %v4261_v18 = vld [vmem:[#allocation11 + $0x55c] ss:$20 sps:$4 sm:$0xff]  }
 0x286   :  { %v1493_v32 = vadd.f32 %v3673_v11, %v456_v10  ;;  %v3697_v34 = vpop.f32.mrb[15].mxu1  ;;  %2906 = vmatpush1.bf16.msra.mxu0 %v4190_v15  ;;  %3029 = vmatpush1.bf16.msra.mxu1 %v4193_v16  ;;  %v4730_v10 = vpack.c.bf16 %v3780_v3, %v3780_v3  ;;  %v4255_v15 = vld [vmem:[#allocation11 + $0x534] ss:$20 sps:$4 sm:$0xff]   ;;  %v4253_v16 = vld [vmem:[#allocation11 + $0x530] ss:$20 sps:$4 sm:$0xff]  }
 0x287   :  { %2907 = vmatprep.subr.bf16.mxu0 %v4198_v19  ;;  %3030 = vmatprep.subr.bf16.mxu1 %v4201_v20  ;;  %v4256_v19 = vld [vmem:[#allocation11 + $0x550] ss:$20 sps:$4 sm:$0xff]   ;;  %v4259_v20 = vld [vmem:[#allocation11 + $0x558] ss:$20 sps:$4 sm:$0xff]  }
 0x288   :  { %v4725_v39 = vadd.f32 %v3695_v27, %v1493_v32  ;;  %v4264_v11 = vld [vmem:[#allocation11 + $0x57c] ss:$20 sps:$4 sm:$0xff]   ;;  %v4267_v21 = vld [vmem:[#allocation11 + $0x584] ss:$20 sps:$4 sm:$0xff]   ;;  %v4265_v27 = vld [vmem:[#allocation11 + $0x580] ss:$20 sps:$4 sm:$0xff]  }
 0x289   :  { %v4262_v23 = vld [vmem:[#allocation11 + $0x578] ss:$20 sps:$4 sm:$0xff]   ;;  %v4268_v32 = vld [vmem:[#allocation11 + $0x5a0] ss:$20 sps:$4 sm:$0xff]  }
 0x28a   :  { %2908 = vmatpush1.bf16.msra.mxu0 %v4196_v35  ;;  %3031 = vmatpush1.bf16.msra.mxu1 %v4199_v36  ;;  %v4270_v29 = vld [vmem:[#allocation11 + $0x5a4] ss:$20 sps:$4 sm:$0xff]   ;;  %v4273_v30 = vld [vmem:[#allocation11 + $0x5ac] ss:$20 sps:$4 sm:$0xff]   ;;  %v4279_v35 = vld [vmem:[#allocation11 + $0x5d4] ss:$20 sps:$4 sm:$0xff]  }
 0x28b   :  { %2909 = vmatprep.subr.bf16.mxu0 %v4204_v37  ;;  %3032 = vmatprep.subr.bf16.mxu1 %v4207_v38  ;;  %v4276_v34 = vld [vmem:[#allocation11 + $0x5cc] ss:$20 sps:$4 sm:$0xff]   ;;  %v4274_v36 = vld [vmem:[#allocation11 + $0x5c8] ss:$20 sps:$4 sm:$0xff]   ;;  %v4277_v37 = vld [vmem:[#allocation11 + $0x5d0] ss:$20 sps:$4 sm:$0xff]  }
 0x28c   :  { %v4282_v38 = vld [vmem:[#allocation11 + $0x5f4] ss:$20 sps:$4 sm:$0xff]   ;;  %v4314_v3 = vld [vmem:[#allocation11 + $0xd8] ss:$20 sps:$4 sm:$0xff]  }
 0x28e   :  { %2910 = vmatpush1.bf16.msra.mxu0 %v4202_v40  ;;  %3033 = vmatpush1.bf16.msra.mxu1 %v4205_v41  ;;  %v4285_v40 = vld [vmem:[#allocation11 + $0x5fc] ss:$20 sps:$4 sm:$0xff]  }
 0x28f   :  { %2911 = vmatprep.subr.bf16.mxu0 %v4210_v13  ;;  %3034 = vmatprep.subr.bf16.mxu1 %v4213_v43  ;;  %v4280_v41 = vld [vmem:[#allocation11 + $0x5f0] ss:$20 sps:$4 sm:$0xff]   ;;  %v4283_v13 = vld [vmem:[#allocation11 + $0x5f8] ss:$20 sps:$4 sm:$0xff]  }
 0x290   :  { %v4288_v43 = vld [vmem:[#allocation11 + $0x61c] ss:$20 sps:$4 sm:$0xff]  }
 0x292   :  { %2912 = vmatpush1.bf16.msra.mxu0 %v4208_v44  ;;  %3035 = vmatpush1.bf16.msra.mxu1 %v4211_v31  ;;  %v4291_v44 = vld [vmem:[#allocation11 + $0x624] ss:$20 sps:$4 sm:$0xff]  }
 0x293   :  { %2913 = vmatprep.subr.bf16.mxu0 %v4216_v46  ;;  %3036 = vmatprep.subr.bf16.mxu1 %v4219_v48  ;;  %v4286_v31 = vld [vmem:[#allocation11 + $0x618] ss:$20 sps:$4 sm:$0xff]   ;;  %v4289_v46 = vld [vmem:[#allocation11 + $0x620] ss:$20 sps:$4 sm:$0xff]   ;;  %v4292_v48 = vld [vmem:[#allocation11 + $0x150] ss:$20 sps:$4 sm:$0xff]  }
 0x296   :  { %2914 = vmatpush1.bf16.msra.mxu0 %v4214_v49  ;;  %3037 = vmatpush1.bf16.msra.mxu1 %v4217_v50  ;;  %v4293_v49 = vld [vmem:[#allocation11 + $0x3d0] ss:$20 sps:$4 sm:$0xff]  }
 0x297   :  { %2915 = vmatprep.subr.bf16.mxu0 %v4222_v51  ;;  %3038 = vmatprep.subr.bf16.mxu1 %v4225_v52  ;;  %v4294_v50 = vld [vmem:[#allocation11 + $0x10] ss:$20 sps:$4 sm:$0xff]   ;;  %v4738_v51 = vpack.c.bf16 %v4725_v39, %v4725_v39  ;;  %v4301_v39 = vld [vmem:[#allocation11 + $0x420] ss:$20 sps:$4 sm:$0xff]  }
 0x298   :  { %v4295_v52 = vld [vmem:[#allocation11 + $0x290] ss:$20 sps:$4 sm:$0xff]  }
 0x29a   :  { %2916 = vmatpush1.bf16.msra.mxu0 %v4220_v53  ;;  %3039 = vmatpush1.bf16.msra.mxu1 %v4223_v54  ;;  %v4296_v53 = vld [vmem:[#allocation11 + $0x178] ss:$20 sps:$4 sm:$0xff]  }
 0x29b   :  { %2917 = vmatprep.subr.bf16.mxu0 %v4228_v55  ;;  %3040 = vmatprep.subr.bf16.mxu1 %v4231_v56  ;;  %v4297_v54 = vld [vmem:[#allocation11 + $0x3f8] ss:$20 sps:$4 sm:$0xff]  }
 0x29c   :  { %v4298_v55 = vld [vmem:[#allocation11 + $0x38] ss:$20 sps:$4 sm:$0xff]  }
 0x29d   :  { %v4299_v56 = vld [vmem:[#allocation11 + $0x2b8] ss:$20 sps:$4 sm:$0xff]  }
 0x29e   :  { %2918 = vmatpush1.bf16.msra.mxu0 %v4226_v57  ;;  %3041 = vmatpush1.bf16.msra.mxu1 %v4229_v25  ;;  %v4300_v57 = vld [vmem:[#allocation11 + $0x1a0] ss:$20 sps:$4 sm:$0xff]  }
 0x29f   :  { %2919 = vmatprep.subr.bf16.mxu0 %v4234_v58  ;;  %3042 = vmatprep.subr.bf16.mxu1 %v4237_v59  ;;  %v4302_v25 = vld [vmem:[#allocation11 + $0x60] ss:$20 sps:$4 sm:$0xff]   ;;  %v4304_v59 = vld [vmem:[#allocation11 + $0x1c8] ss:$20 sps:$4 sm:$0xff]  }
 0x2a0   :  { %v4303_v58 = vld [vmem:[#allocation11 + $0x2e0] ss:$20 sps:$4 sm:$0xff]  }
 0x2a2   :  { %2920 = vmatpush1.bf16.msra.mxu0 %v4232_v60  ;;  %3043 = vmatpush1.bf16.msra.mxu1 %v4235_v33  ;;  %v4305_v60 = vld [vmem:[#allocation11 + $0x448] ss:$20 sps:$4 sm:$0xff]  }
 0x2a3   :  { %2921 = vmatprep.subr.bf16.mxu0 %v4240_v62  ;;  %3044 = vmatprep.subr.bf16.mxu1 %v4243_v63  ;;  %v4306_v33 = vld [vmem:[#allocation11 + $0x88] ss:$20 sps:$4 sm:$0xff]   ;;  %v4310_v62 = vld [vmem:[#allocation11 + $0xb0] ss:$20 sps:$4 sm:$0xff]  }
 0x2a4   :  { %v4311_v63 = vld [vmem:[#allocation11 + $0x330] ss:$20 sps:$4 sm:$0xff]  }
 0x2a6   :  { %2922 = vmatpush1.bf16.msra.mxu0 %v4238_v1  ;;  %3045 = vmatpush1.bf16.msra.mxu1 %v4241_v2  ;;  %v4312_v1 = vld [vmem:[#allocation11 + $0x218] ss:$20 sps:$4 sm:$0xff]  }
 0x2a7   :  { %2932 = vmatprep.subr.bf16.mxu0 %v4246_v4  ;;  %3055 = vmatprep.subr.bf16.mxu1 %v4249_v7  ;;  %v4313_v2 = vld [vmem:[#allocation11 + $0x498] ss:$20 sps:$4 sm:$0xff]   ;;  %v4316_v7 = vld [vmem:[#allocation11 + $0x240] ss:$20 sps:$4 sm:$0xff]  }
 0x2a8   :  { %v4315_v4 = vld [vmem:[#allocation11 + $0x358] ss:$20 sps:$4 sm:$0xff]  }
 0x2a9   :  { %2924 = vmatmul.mubr.bf16.vlgmr.msra.gmra.mrb[8].mxu0 %v4730_v10  ;;  %3047 = vmatmul.mubr.bf16.vlgmr.msra.gmra.mrb[16].mxu1 %v4730_v10 }
 0x2aa   :  { %2933 = vmatpush1.bf16.msra.mxu0 %v4244_v8  ;;  %3056 = vmatpush1.bf16.msra.mxu1 %v4247_v9  ;;  %v4317_v8 = vld [vmem:[#allocation11 + $0x4c0] ss:$20 sps:$4 sm:$0xff]  }
 0x2ab   :  { %2934 = vmatprep.subr.bf16.mxu0 %v4252_v24  ;;  %3057 = vmatprep.subr.bf16.mxu1 %v4255_v15  ;;  %v4318_v9 = vld [vmem:[#allocation11 + $0x100] ss:$20 sps:$4 sm:$0xff]   ;;  %v4320_v15 = vld [vmem:[#allocation11 + $0x268] ss:$20 sps:$4 sm:$0xff]  }
 0x2ac   :  { %2964 = vmatprep.mubr.bf16.mxu0 %v4506_v0  ;;  %3087 = vmatprep.mubr.bf16.mxu1 %v4506_v0  ;;  %v4271_v0 = vld [vmem:[#allocation11 + $0x5a8] ss:$20 sps:$4 sm:$0xff]   ;;  %v4319_v24 = vld [vmem:[#allocation11 + $0x380] ss:$20 sps:$4 sm:$0xff]  }
 0x2ae   :  { %2935 = vmatpush1.bf16.msra.mxu0 %v4250_v28  ;;  %3058 = vmatpush1.bf16.msra.mxu1 %v4253_v16  ;;  %v4321_v28 = vld [vmem:[#allocation11 + $0x4e8] ss:$20 sps:$4 sm:$0xff]  }
 0x2af   :  { %2936 = vmatprep.subr.bf16.mxu0 %v4258_v17  ;;  %3059 = vmatprep.subr.bf16.mxu1 %v4261_v18  ;;  %v4322_v16 = vld [vmem:[#allocation11 + $0x128] ss:$20 sps:$4 sm:$0xff]   ;;  %v4324_v18 = vld [vmem:[#allocation11 + $0x510] ss:$20 sps:$4 sm:$0xff]  }
 0x2b0   :  { %v4323_v17 = vld [vmem:[#allocation11 + $0x3a8] ss:$20 sps:$4 sm:$0xff]  }
 0x2b2   :  { %2937 = vmatpush1.bf16.msra.mxu0 %v4256_v19  ;;  %3060 = vmatpush1.bf16.msra.mxu1 %v4259_v20  ;;  %v4325_v19 = vld [vmem:[#allocation11 + $0x538] ss:$20 sps:$4 sm:$0xff]   ;;  %v4326_v20 = vld [vmem:[#allocation11 + $0x560] ss:$20 sps:$4 sm:$0xff]  }
 0x2b3   :  { %2938 = vmatprep.subr.bf16.mxu0 %v4264_v11  ;;  %3061 = vmatprep.subr.bf16.mxu1 %v4267_v21  ;;  %v4327_v11 = vld [vmem:[#allocation11 + $0x588] ss:$20 sps:$4 sm:$0xff]   ;;  %v4328_v21 = vld [vmem:[#allocation11 + $0x5b0] ss:$20 sps:$4 sm:$0xff]  }
 0x2b6   :  { %2939 = vmatpush1.bf16.msra.mxu0 %v4262_v23  ;;  %3062 = vmatpush1.bf16.msra.mxu1 %v4265_v27  ;;  %v4331_v23 = vld [vmem:[#allocation11 + $0x628] ss:$20 sps:$4 sm:$0xff]  }
 0x2b7   :  { %2940 = vmatprep.subr.bf16.mxu0 %v4270_v29  ;;  %3063 = vmatprep.subr.bf16.mxu1 %v4273_v30  ;;  %v1783_v27 = vld [vmem:[%s4795_s7] sm:$0x1f] }
 0x2b8   :  { %v1788_v29 = vrot.slane %v1783_v27, %v4653_v12  ;;  %v1796_v30 = vrot.slane %v1783_v27, %v4679_v22 }
 0x2ba   :  { %2941 = vmatpush1.bf16.msra.mxu0 %v4268_v32  ;;  %3064 = vmatpush1.bf16.msra.mxu1 %v4271_v0  ;;  %v3221_v32 = vld [vmem:[%s4796_s8] sm:$0x1f]  ;;  %v1792_v0 = vrot.slane %v1783_v27, %v4658_v14 }
 0x2bb   :  { %2942 = vmatprep.subr.bf16.mxu0 %v4276_v34  ;;  %3065 = vmatprep.subr.bf16.mxu1 %v4279_v35  ;;  %v1800_v34 = vrot.slane %v1783_v27, %v4698_v26 }
 0x2be   :  { %2943 = vmatpush1.bf16.msra.mxu0 %v4274_v36  ;;  %3066 = vmatpush1.bf16.msra.mxu1 %v4277_v37  ;;  %v3226_v37 = vrot.slane %v3221_v32, %v4653_v12  ;;  %v3238_v12 = vrot.slane %v3221_v32, %v4698_v26 }
 0x2bf   :  { %2944 = vmatprep.subr.bf16.mxu0 %v4282_v38  ;;  %3067 = vmatprep.subr.bf16.mxu1 %v4285_v40 }
 0x2c2   :  { %2945 = vmatpush1.bf16.msra.mxu0 %v4280_v41  ;;  %3068 = vmatpush1.bf16.msra.mxu1 %v4283_v13 }
 0x2c3   :  { %2946 = vmatprep.subr.bf16.mxu0 %v4288_v43  ;;  %3069 = vmatprep.subr.bf16.mxu1 %v4291_v44  ;;  %v3230_v43 = vrot.slane %v3221_v32, %v4658_v14 }
 0x2c6   :  { %2947 = vmatpush1.bf16.msra.mxu0 %v4286_v31  ;;  %3070 = vmatpush1.bf16.msra.mxu1 %v4289_v46 }
 0x2c7   :  { %3699 = vmatprep.subr.bf16.mxu0 %v4292_v48  ;;  %3721 = vmatprep.subr.bf16.mxu1 %v4293_v49 }
 0x2c9   :  { %2965 = vmatmul.mubr.bf16.vlgmr.msra.gmra.mrb[8].mxu0 %v4738_v51  ;;  %3088 = vmatmul.mubr.bf16.vlgmr.msra.gmra.mrb[16].mxu1 %v4738_v51 }
 0x2ca   :  { %3700 = vmatpush3.bf16.msra.mxu0 %v4294_v50  ;;  %3128 = vmatprep.mubr.bf16.mxu0 %v4708_v42  ;;  %v4307_v42 = vld [vmem:[#allocation11 + $0x308] ss:$20 sps:$4 sm:$0xff]  }
 0x2cb   :  { %3722 = vmatpush3.bf16.msra.mxu1 %v4295_v52  ;;  %3168 = vmatprep.mubr.bf16.mxu1 %v4714_v47  ;;  %v4309_v47 = vld [vmem:[#allocation11 + $0x470] ss:$20 sps:$4 sm:$0xff]   ;;  %v3234_v52 = vrot.slane %v3221_v32, %v4679_v22 }
 0x2cc   :  { %3701 = vmatprep.subr.bf16.mxu0 %v4296_v53  ;;  %3723 = vmatprep.subr.bf16.mxu1 %v4297_v54 }
 0x2ce   :  { %3702 = vmatpush3.bf16.msra.mxu0 %v4298_v55 }
 0x2cf   :  { %3724 = vmatpush3.bf16.msra.mxu1 %v4299_v56  ;;  %3703 = vmatprep.subr.bf16.mxu0 %v4300_v57 }
 0x2d0   :  { %3725 = vmatprep.subr.bf16.mxu1 %v4301_v39 }
 0x2d2   :  { %3704 = vmatpush3.bf16.msra.mxu0 %v4302_v25 }
 0x2d3   :  { %3726 = vmatpush3.bf16.msra.mxu1 %v4303_v58  ;;  %3705 = vmatprep.subr.bf16.mxu0 %v4304_v59 }
 0x2d4   :  { %3727 = vmatprep.subr.bf16.mxu1 %v4305_v60  ;;  %v1804_v60 = vrot.slane %v1783_v27, %v4721_v5 }
 0x2d6   :  { %3706 = vmatpush3.bf16.msra.mxu0 %v4306_v33 }
 0x2d7   :  { %3728 = vmatpush3.bf16.msra.mxu1 %v4307_v42  ;;  %3707 = vmatprep.subr.bf16.mxu0 %v4308_v61 }
 0x2d8   :  { %3729 = vmatprep.subr.bf16.mxu1 %v4309_v47 }
 0x2da   :  { %3708 = vmatpush3.bf16.msra.mxu0 %v4310_v62 }
 0x2db   :  { %3730 = vmatpush3.bf16.msra.mxu1 %v4311_v63  ;;  %3709 = vmatprep.subr.bf16.mxu0 %v4312_v1 }
 0x2dc   :  { %3731 = vmatprep.subr.bf16.mxu1 %v4313_v2 }
 0x2de   :  { %3710 = vmatpush3.bf16.msra.mxu0 %v4314_v3 }
 0x2df   :  { %3732 = vmatpush3.bf16.msra.mxu1 %v4315_v4  ;;  %3711 = vmatprep.subr.bf16.mxu0 %v4316_v7 }
 0x2e0   :  { %3733 = vmatprep.subr.bf16.mxu1 %v4317_v8 }
 0x2e2   :  { %3712 = vmatpush3.bf16.msra.mxu0 %v4318_v9  ;;  %v3242_v9 = vrot.slane %v3221_v32, %v4721_v5 }
 0x2e3   :  { %3734 = vmatpush3.bf16.msra.mxu1 %v4319_v24  ;;  %3713 = vmatprep.subr.bf16.mxu0 %v4320_v15 }
 0x2e4   :  { %3735 = vmatprep.subr.bf16.mxu1 %v4321_v28 }
 0x2e6   :  { %3714 = vmatpush3.bf16.msra.mxu0 %v4322_v16 }
 0x2e7   :  { %3736 = vmatpush3.bf16.msra.mxu1 %v4323_v17  ;;  %3758 = vmatprep.subr.bf16.mxu0 %v4507_v6 }
 0x2e9   :  { %3129 = vmatmul.mubr.bf16.vlgmr.msra.gmra.mrb[12].mxu0 %v4710_v45  ;;  %v4329_v45 = vld [vmem:[#allocation11 + $0x5d8] ss:$20 sps:$4 sm:$0xff]  }
 0x2ea   :  { %3169 = vmatmul.mubr.bf16.vlgmr.msra.gmra.mrb[20].mxu1 %v4730_v10  ;;  %3759 = vmatpush3.bf16.msra.mxu0 %v4324_v18  ;;  %v4330_v10 = vld [vmem:[#allocation11 + $0x600] ss:$20 sps:$4 sm:$0xff]   ;;  %v3652_v18 = vld [vmem:[%s4797_s9] ss:$0 sm:$0xff] }
 0x2eb   :  { %3760 = vmatprep.subr.bf16.mxu0 %v4507_v6  ;;  %3774 = vmatprep.mubr.msk.bf16.mxu0 %vm4508_vm1, %v4507_v6 }
 0x2ee   :  { %3761 = vmatpush3.bf16.msra.mxu0 %v4325_v19 }
 0x2ef   :  { %3762 = vmatprep.subr.bf16.mxu0 %v4507_v6 }
 0x2f2   :  { %3763 = vmatpush3.bf16.msra.mxu0 %v4326_v20 }
 0x2f3   :  { %3764 = vmatprep.subr.bf16.mxu0 %v4507_v6 }
 0x2f6   :  { %3765 = vmatpush3.bf16.msra.mxu0 %v4327_v11 }
 0x2f7   :  { %3766 = vmatprep.subr.bf16.mxu0 %v4507_v6 }
 0x2fa   :  { %3767 = vmatpush3.bf16.msra.mxu0 %v4328_v21 }
 0x2fb   :  { %3768 = vmatprep.subr.bf16.mxu0 %v4507_v6 }
 0x2fe   :  { %3769 = vmatpush3.bf16.msra.mxu0 %v4329_v45 }
 0x2ff   :  { %3770 = vmatprep.subr.bf16.mxu0 %v4507_v6 }
 0x302   :  { %3771 = vmatpush3.bf16.msra.mxu0 %v4330_v10 }
 0x303   :  { %3772 = vmatprep.subr.bf16.mxu0 %v4507_v6 }
 0x306   :  { %3773 = vmatpush3.bf16.msra.mxu0 %v4331_v23 }
 0x309   :  { %3775 = vmatmul.mubr.bf16.vlgmr.msra.gmra.mrb[16].mxu0 %v4738_v51 }
 0x39c   :  { %v2966_v6 = vpop.f32.mrb[8].mxu0  ;;  %v3089_v35 = vpop.f32.mrb[16].mxu1 }
 0x39d   :  { %v3782_v36 = vadd.f32 %v2966_v6, %v1788_v29  ;;  %v3784_v38 = vadd.f32 %v3089_v35, %v1796_v30  ;;  %v2968_v40 = vpop.f32.mrb[9].mxu0  ;;  %v3091_v41 = vpop.f32.mrb[17].mxu1 }
 0x39e   :  { %v3783_v13 = vadd.f32 %v2968_v40, %v1792_v0  ;;  %v3785_v44 = vadd.f32 %v3091_v41, %v1800_v34  ;;  %v2970_v31 = vpop.f32.mrb[10].mxu0  ;;  %v3093_v46 = vpop.f32.mrb[18].mxu1 }
 0x39f   :  { %v3216_v48 = vmax.f32 %v3782_v36, 0.0  ;;  %v2971_v49 = vpop.f32.mrb[11].mxu0  ;;  %v3094_v50 = vpop.f32.mrb[19].mxu1  ;;  %v3218_v51 = vmax.f32 %v3784_v38, 0.0 }
 0x3a0   :  { %v3217_v53 = vmax.f32 %v3783_v13, 0.0  ;;  %v3219_v56 = vmax.f32 %v3785_v44, 0.0 }
 0x3a1   :  { %v3248_v54 = vmul.f32 %v3226_v37, %v3216_v48  ;;  %v3250_v57 = vmul.f32 %v3234_v52, %v3218_v51 }
 0x3a2   :  { %v3249_v55 = vmul.f32 %v3230_v43, %v3217_v53  ;;  %v3251_v25 = vmul.f32 %v3238_v12, %v3219_v56 }
 0x3a4   :  { %v3253_v39 = vadd.f32 %v3249_v55, %v3248_v54 }
 0x3a6   :  { %v3254_v58 = vadd.f32 %v3253_v39, %v3250_v57 }
 0x3a8   :  { %v3255_v14 = vadd.f32 %v3254_v58, %v3251_v25 }
 0x3bc   :  { %v3715_v59 = vpop.f32.mrb[12].mxu0 }
 0x3bd   :  { %v3737_v33 = vpop.f32.mrb[20].mxu1  ;;  %v3716_v42 = vpop.f32.mrb[13].mxu0 }
 0x3be   :  { %v3717_v61 = vadd.f32 %v3716_v42, %v3715_v59  ;;  %v3738_v47 = vpop.f32.mrb[21].mxu1  ;;  %v3718_v62 = vpop.f32.mrb[14].mxu0 }
 0x3bf   :  { %v3739_v22 = vadd.f32 %v3738_v47, %v3737_v33  ;;  %v3740_v63 = vpop.f32.mrb[22].mxu1  ;;  %v3719_v1 = vpop.f32.mrb[15].mxu0 }
 0x3c0   :  { %v3131_v2 = vadd.f32 %v3717_v61, %v1804_v60  ;;  %v3741_v3 = vpop.f32.mrb[23].mxu1 }
 0x3c2   :  { %v3171_v4 = vadd.f32 %v3739_v22, %v3131_v2 }
 0x3dc   :  { %v3210_v26 = vpop.f32.mrb[16].mxu0 }
 0x3dd   :  { %v3211_v7 = vadd.f32 %v3210_v26, %v3171_v4  ;;  %v3776_v8 = vpop.f32.mrb[17].mxu0 }
 0x3de   :  { %v3213_v24 = vpop.f32.mrb[18].mxu0 }
 0x3df   :  { %v3220_v15 = vmax.f32 %v3211_v7, 0.0  ;;  %v3777_v28 = vpop.f32.mrb[19].mxu0 }
 0x3e1   :  { %v3252_v16 = vmul.f32 %v3242_v9, %v3220_v15 }
 0x3e3   :  { %v3256_v17 = vadd.f32 %v3255_v14, %v3252_v16 }
 0x3e5   :  { %3257 = vadd.xlane.f32.xlu0 %v3256_v17 }
 0x472   :  { %v3258_v19 = vpop.xlane.xlu0 %3257 }
 0x473   :  { %v3266_v20 = vadd.f32 %v3652_v18, %v3258_v19 }
 0x475   :  { %v3267_v11 = vpack.c.bf16 %v3266_v20, %v3266_v20 }
 0x477   :  { %3268 = vst [vmem:[#allocation13] sm:$0xf] %v3267_v11 }
 0x478   :  { %4475 = shalt.err (!%p4472_p10)
}
 0x479   :  { %s4476_s2 = scalar_lea.hbm %s4798_s10, 64 }
 0x47a   :  { %p4477_p11 = scmp.ne.s32.totalorder %s4798_s10, %s4476_s2  ;;  %p4480_p12 = scmp.lt.u32.totalorder %s4476_s2, %s4798_s10 }
 0x47c   :  { %p4482_p13 = pnand %p4480_p12, %p4477_p11 }
 0x47e   :  { %4485 = shalt.err (!%p4482_p13)
}
 0x47f   :  { %3278 = dma.vmem_to_hbm [thread:$0]  %s3276_s28, 64, %s4798_s10, [#allocation4]  }
 0x480   :  { %4494 = dma.done.wait [#allocation4], 64  }
 0x481   :  { %4495 = vsyncadd [#allocation4], 4294967232 }
 0x482   :  { %3282 = vsyncpa [#allocation3], 1 }
 0x483   :  { %3283 = vsyncpa [#allocation6], 1 }
 0x484   :  { %3284 = vsyncpa [#allocation9], 1 }
 0x485   :  { %3285 = vsyncpa [#allocation12], 1 }
 0x486   :  { %3286 = vsyncpa [#allocation4], 1 }

// kernel: tpu_custom_call.1
= control target key start
LH: loop header
LB: loop body
LE: loop exit
PB: predicated region body
PF: predicated region fallthrough
CT: control target
= control target key end

     0   :  { %15 = vsyncpa [#allocation3], 0  ;;  %s4788_s0 = inlined_call_operand.hbm [shape: bf16[8,16], index: 0, kind: input, shape index: {}]   ;;  %s4789_s1 = inlined_call_operand.hbm [shape: bf16[8,128], index: 1, kind: input, shape index: {}]   ;;  %s4790_s2 = inlined_call_operand.hbm [shape: bf16[16,384], index: 2, kind: input, shape index: {}]   ;;  %s4791_s3 = inlined_call_operand.hbm [shape: f32[1,384], index: 3, kind: input, shape index: {}]   ;;  %s4792_s4 = inlined_call_operand.hbm [shape: bf16[512,640], index: 4, kind: input, shape index: {}]   ;;  %s4793_s5 = inlined_call_operand.vmem [shape: f32[1,640], index: 5, kind: input, shape index: {}]   ;;  %s4794_s6 = inlined_call_operand.hbm [shape: bf16[640,640], index: 6, kind: input, shape index: {}]   ;;  %s4795_s7 = inlined_call_operand.vmem [shape: f32[1,640], index: 7, kind: input, shape index: {}]   ;;  %s4796_s8 = inlined_call_operand.vmem [shape: f32[1,640], index: 8, kind: input, shape index: {}]   ;;  %s4797_s9 = inlined_call_operand.vmem [shape: f32[1,128], index: 9, kind: input, shape index: {}]   ;;  %s4798_s10 = inlined_call_operand.hbm [shape: bf16[8,128], index: 10, kind: output, shape index: {}]  }
   0x1   :  { %16 = vsyncpa [#allocation6], 0 }
   0x2   :  { %17 = vsyncpa [#allocation9], 0 }
   0x3   :  { %18 = vsyncpa [#allocation12], 0 }
   0x4   :  { %19 = vsyncpa [#allocation4], 0  ;;  %s4496_s13 = smov [#allocation5]   ;;  %s4497_s15 = smov [#allocation8]  }
   0x5   :  { %s36_s14 = sshll.u32 %s4496_s13, 4  ;;  %s58_s16 = sshll.u32 %s4497_s15, 4  ;;  %s37_s14 = int_to_ptr.vmem [resolvable:$true] %s36_s14  ;;  %s59_s16 = int_to_ptr.vmem [resolvable:$true] %s58_s16 }
   0x6   :  { %s4332_s19 = scalar_lea.hbm %s4789_s1, 64 }
   0x7   :  { %p4333_p0 = scmp.ne.s32.totalorder %s4789_s1, %s4332_s19  ;;  %p4336_p1 = scmp.lt.u32.totalorder %s4332_s19, %s4789_s1 }
   0x9   :  { %p4338_p2 = pnand %p4336_p1, %p4333_p0 }
   0xb   :  { %4341 = shalt.err (!%p4338_p2)
}
   0xc   :  { %s4342_s24 = scalar_lea.vmem %s37_s14, 64  ;;  %p4347_p4 = scmp.lt.s32.totalorder %s37_s14, %s37_s14 }
   0xd   :  { %p4343_p3 = scmp.ne.s32.totalorder %s37_s14, %s4342_s24  ;;  %p4348_p5 = scmp.lt.s32.totalorder %s4342_s24, %s4342_s24 }
   0xf   :  { %p4349_p6 = por %p4348_p5, %p4347_p4 }
  0x11   :  { %p4350_p7 = pnand %p4349_p6, %p4343_p3 }
  0x13   :  { %4353 = shalt.err (!%p4350_p7)
}
  0x14   :  { %39 = dma.hbm_to_vmem [thread:$0]  %s4789_s1, 64, %s37_s14, [#allocation6]  }
  0x15   :  { %s4354_s29 = scalar_lea.hbm %s4791_s3, 48 }
  0x16   :  { %p4355_p8 = scmp.ne.s32.totalorder %s4791_s3, %s4354_s29  ;;  %p4358_p9 = scmp.lt.u32.totalorder %s4354_s29, %s4791_s3 }
  0x18   :  { %p4360_p10 = pnand %p4358_p9, %p4355_p8 }
  0x1a   :  { %4363 = shalt.err (!%p4360_p10)
}
  0x1b   :  { %s4364_s15 = scalar_lea.vmem %s59_s16, 48  ;;  %s4368_s17 = scalar_lea.vmem %s59_s16, 64 }
  0x1c   :  { %p4365_p11 = scmp.ne.s32.totalorder %s59_s16, %s4364_s15  ;;  %p4369_p12 = scmp.lt.s32.totalorder %s59_s16, %s59_s16 }
  0x1d   :  { %p4370_p13 = scmp.lt.s32.totalorder %s4368_s17, %s4364_s15 }
  0x1f   :  { %p4371_p0 = por %p4370_p13, %p4369_p12 }
  0x21   :  { %p4372_p1 = pnand %p4371_p0, %p4365_p11 }
  0x23   :  { %4375 = shalt.err (!%p4372_p1)
}
  0x24   :  { %61 = dma.hbm_to_vmem [thread:$0]  %s4791_s3, 48, %s59_s16, [#allocation9]  }
  0x25   :  { %s4498_s18 = smov [#allocation2]   ;;  %s4499_s20 = smov [#allocation7]  }
  0x26   :  { %s26_s19 = sshll.u32 %s4498_s18, 4  ;;  %s45_s21 = sshll.u32 %s4499_s20, 4  ;;  %s27_s19 = int_to_ptr.vmem [resolvable:$true] %s26_s19  ;;  %s4589_s21 = int_to_ptr.vmem [resolvable:$true] %s45_s21 }
  0x27   :  { %s4376_s24 = scalar_lea.hbm %s4788_s0, 64 }
  0x28   :  { %p4377_p2 = scmp.ne.s32.totalorder %s4788_s0, %s4376_s24  ;;  %p4380_p3 = scmp.lt.u32.totalorder %s4376_s24, %s4788_s0 }
  0x2a   :  { %p4382_p4 = pnand %p4380_p3, %p4377_p2 }
  0x2c   :  { %4385 = shalt.err (!%p4382_p4)
}
  0x2d   :  { %s4386_s3 = scalar_lea.vmem %s27_s19, 64  ;;  %p4391_p6 = scmp.lt.s32.totalorder %s27_s19, %s27_s19 }
  0x2e   :  { %p4387_p5 = scmp.ne.s32.totalorder %s27_s19, %s4386_s3  ;;  %p4392_p7 = scmp.lt.s32.totalorder %s4386_s3, %s4386_s3 }
  0x30   :  { %p4393_p8 = por %p4392_p7, %p4391_p6 }
  0x32   :  { %p4394_p9 = pnand %p4393_p8, %p4387_p5 }
  0x34   :  { %4397 = shalt.err (!%p4394_p9)
}
  0x35   :  { %29 = dma.hbm_to_vmem [thread:$0]  %s4788_s0, 64, %s27_s19, [#allocation3]  }
  0x36   :  { %s4398_s12 = scalar_lea.hbm %s4790_s2, 384 }
  0x37   :  { %p4399_p10 = scmp.ne.s32.totalorder %s4790_s2, %s4398_s12  ;;  %p4402_p11 = scmp.lt.u32.totalorder %s4398_s12, %s4790_s2 }
  0x39   :  { %p4404_p12 = pnand %p4402_p11, %p4399_p10 }
  0x3b   :  { %4407 = shalt.err (!%p4404_p12)
}
  0x3c   :  { %s4408_s14 = scalar_lea.vmem %s4589_s21, 384  ;;  %p4413_p0 = scmp.lt.s32.totalorder %s4589_s21, %s4589_s21 }
  0x3d   :  { %p4409_p13 = scmp.ne.s32.totalorder %s4589_s21, %s4408_s14  ;;  %p4414_p1 = scmp.lt.s32.totalorder %s4408_s14, %s4408_s14 }
  0x3f   :  { %p4415_p2 = por %p4414_p1, %p4413_p0 }
  0x41   :  { %p4416_p3 = pnand %p4415_p2, %p4409_p13 }
  0x43   :  { %4419 = shalt.err (!%p4416_p3)
}
  0x44   :  { %s4500_s0 = smov 192   ;;  %s4501_s18 = smov 12  }
  0x45   :  { %51 = dma.hbm_to_vmem [thread:$0]  %s4790_s2, 384, %s4589_s21, [#allocation6], %s4500_s0, %s4500_s0, %s4501_s18  }
  0x46   :  { %s4502_s22 = smov [#allocation10]   ;;  %s4420_s26 = scalar_lea.hbm %s4792_s4, 20480 }
  0x47   :  { %s67_s23 = sshll.u32 %s4502_s22, 4  ;;  %p4421_p4 = scmp.ne.s32.totalorder %s4792_s4, %s4420_s26  ;;  %s68_s23 = int_to_ptr.vmem [resolvable:$true] %s67_s23 }
  0x48   :  { %p4424_p5 = scmp.lt.u32.totalorder %s4420_s26, %s4792_s4 }
  0x4a   :  { %p4426_p6 = pnand %p4424_p5, %p4421_p4 }
  0x4c   :  { %4429 = shalt.err (!%p4426_p6)
}
  0x4d   :  { %s4430_s29 = scalar_lea.vmem %s68_s23, 20480  ;;  %p4435_p8 = scmp.lt.s32.totalorder %s68_s23, %s68_s23 }
  0x4e   :  { %p4431_p7 = scmp.ne.s32.totalorder %s68_s23, %s4430_s29  ;;  %p4436_p9 = scmp.lt.s32.totalorder %s4430_s29, %s4430_s29 }
  0x50   :  { %p4437_p10 = por %p4436_p9, %p4435_p8 }
  0x52   :  { %p4438_p11 = pnand %p4437_p10, %p4431_p7 }
  0x54   :  { %4441 = shalt.err (!%p4438_p11)
}
  0x55   :  { %s4503_s2 = smov 320   ;;  %s4504_s21 = smov 20  }
  0x56   :  { %73 = dma.hbm_to_vmem [thread:$0]  %s4792_s4, 20480, %s68_s23, [#allocation9], %s4503_s2, %s4503_s2, %s4504_s21  }
  0x57   :  { %s4505_s12 = smov [#allocation11]   ;;  %s4442_s1 = scalar_lea.hbm %s4794_s6, 25600 }
  0x58   :  { %s81_s13 = sshll.u32 %s4505_s12, 4  ;;  %p4443_p12 = scmp.ne.s32.totalorder %s4794_s6, %s4442_s1  ;;  %s82_s13 = int_to_ptr.vmem [resolvable:$true] %s81_s13 }
  0x59   :  { %p4446_p13 = scmp.lt.u32.totalorder %s4442_s1, %s4794_s6 }
  0x5b   :  { %p4448_p0 = pnand %p4446_p13, %p4443_p12 }
  0x5d   :  { %4451 = shalt.err (!%p4448_p0)
}
  0x5e   :  { %s4452_s20 = scalar_lea.vmem %s82_s13, 25600  ;;  %p4457_p2 = scmp.lt.s32.totalorder %s82_s13, %s82_s13 }
  0x5f   :  { %p4453_p1 = scmp.ne.s32.totalorder %s82_s13, %s4452_s20  ;;  %p4458_p3 = scmp.lt.s32.totalorder %s4452_s20, %s4452_s20 }
  0x61   :  { %p4459_p4 = por %p4458_p3, %p4457_p2 }
  0x63   :  { %p4460_p5 = pnand %p4459_p4, %p4453_p1 }
  0x65   :  { %4463 = shalt.err (!%p4460_p5)
}
  0x66   :  { %87 = dma.hbm_to_vmem [thread:$0]  %s4794_s6, 25600, %s82_s13, [#allocation12], %s4503_s2, %s4503_s2, %s4504_s21  }
  0x67   :  { %4486 = dma.done.wait [#allocation3], 64  }
  0x68   :  { %4487 = vsyncadd [#allocation3], 4294967232 }
  0x69   :  { %4488 = dma.done.wait [#allocation6], 448  }
  0x6a   :  { %4489 = vsyncadd [#allocation6], 4294966848 }
  0x6b   :  { %4490 = dma.done.wait [#allocation9], 20528  }
  0x6c   :  { %4491 = vsyncadd [#allocation9], 4294946768 }
  0x6d   :  { %4492 = dma.done.wait [#allocation12], 25600  }
  0x6e   :  { %4493 = vsyncadd [#allocation12], 4294941696  ;;  %v4506_v0 = vmov 0   ;;  %v3824_v1 = vld [vmem:[#allocation7 + $0x4] ss:$12 sps:$4 sm:$0xff]   ;;  %vm151_vm0 = vcmask 130048  }
  0x6f   :  { %187 = vmatprep.mubr.bf16.mxu1 %v4506_v0  ;;  %v3826_v2 = vld [vmem:[#allocation7] ss:$12 sps:$4 sm:$0xff]   ;;  %v113_v3 = vld [vmem:[#allocation2] sm:$0xf]  ;;  %155 = vmatprep.subr.bf16.mxu1 %v3824_v1  ;;  %v3827_v4 = vld [vmem:[#allocation7 + $0x8] ss:$12 sps:$4 sm:$0xff]  }
  0x70   :  { %156 = vmatpush1.bf16.msra.mxu1 %v3826_v2  ;;  %v3828_v5 = vld [vmem:[#allocation10 + $0x4] ss:$20 sps:$4 sm:$0xff]   ;;  %v4507_v6 = vmov 0.0   ;;  %v3832_v7 = vld [vmem:[#allocation10 + $0xc] ss:$20 sps:$4 sm:$0xff]   ;;  %vm4508_vm1 = vmmov 0  }
  0x71   :  { %3752 = vmatprep.subr.bf16.mxu1 %v4507_v6  ;;  %1294 = vmatprep.subr.bf16.mxu0 %v3828_v5  ;;  %v3833_v8 = vld [vmem:[#allocation10] ss:$20 sps:$4 sm:$0xff]   ;;  %v3839_v10 = vld [vmem:[#allocation10 + $0x28] ss:$20 sps:$4 sm:$0xff]   ;;  %v3845_v14 = vld [vmem:[#allocation10 + $0x50] ss:$20 sps:$4 sm:$0xff]  }
  0x72   :  { %v3834_v9 = vld [vmem:[#allocation10 + $0x2c] ss:$20 sps:$4 sm:$0xff]   ;;  %1295 = vmatpush1.bf16.msra.mxu0 %v3833_v8  ;;  %v3840_v11 = vld [vmem:[#allocation10 + $0x54] ss:$20 sps:$4 sm:$0xff]   ;;  %v3846_v15 = vld [vmem:[#allocation10 + $0x7c] ss:$20 sps:$4 sm:$0xff]  }
  0x73   :  { %3290 = vmatmul.mubr.msk.bf16.vlgmr.msra.gmra.mrb[0].mxu1 %vm151_vm0, %v113_v3  ;;  %1296 = vmatprep.subr.bf16.mxu0 %v3834_v9  ;;  %v3830_v12 = vld [vmem:[#allocation10 + $0x8] ss:$20 sps:$4 sm:$0xff]   ;;  %v3836_v16 = vld [vmem:[#allocation10 + $0x30] ss:$20 sps:$4 sm:$0xff]   ;;  %v3851_v18 = vld [vmem:[#allocation10 + $0x78] ss:$20 sps:$4 sm:$0xff]  }
  0x74   :  { %3753 = vmatpush3.bf16.msra.mxu1 %v3827_v4  ;;  %3754 = vmatprep.mubr.msk.bf16.mxu1 %vm4508_vm1, %v4507_v6  ;;  %v3838_v13 = vld [vmem:[#allocation10 + $0x34] ss:$20 sps:$4 sm:$0xff]   ;;  %v3844_v17 = vld [vmem:[#allocation10 + $0x5c] ss:$20 sps:$4 sm:$0xff]   ;;  %v3852_v19 = vld [vmem:[#allocation10 + $0xa4] ss:$20 sps:$4 sm:$0xff]  }
  0x75   :  { %1376 = vmatprep.subr.bf16.mxu1 %v3832_v7  ;;  %v3842_v20 = vld [vmem:[#allocation10 + $0x58] ss:$20 sps:$4 sm:$0xff]   ;;  %v3857_v22 = vld [vmem:[#allocation10 + $0xa0] ss:$20 sps:$4 sm:$0xff]   ;;  %v3863_v26 = vld [vmem:[#allocation10 + $0xc8] ss:$20 sps:$4 sm:$0xff]  }
  0x76   :  { %1297 = vmatpush1.bf16.msra.mxu0 %v3839_v10  ;;  %v3850_v21 = vld [vmem:[#allocation10 + $0x84] ss:$20 sps:$4 sm:$0xff]   ;;  %v3858_v23 = vld [vmem:[#allocation10 + $0xcc] ss:$20 sps:$4 sm:$0xff]   ;;  %v3864_v27 = vld [vmem:[#allocation10 + $0xf4] ss:$20 sps:$4 sm:$0xff]   ;;  %v120_v10 = vlaneseq }
  0x77   :  { %1298 = vmatprep.subr.bf16.mxu0 %v3840_v11  ;;  %v3848_v24 = vld [vmem:[#allocation10 + $0x80] ss:$20 sps:$4 sm:$0xff]   ;;  %v3854_v28 = vld [vmem:[#allocation10 + $0xa8] ss:$20 sps:$4 sm:$0xff]   ;;  %v3869_v30 = vld [vmem:[#allocation10 + $0xf0] ss:$20 sps:$4 sm:$0xff]  }
  0x78   :  { %v3856_v25 = vld [vmem:[#allocation10 + $0xac] ss:$20 sps:$4 sm:$0xff]   ;;  %v3862_v29 = vld [vmem:[#allocation10 + $0xd4] ss:$20 sps:$4 sm:$0xff]   ;;  %v3870_v31 = vld [vmem:[#allocation10 + $0x11c] ss:$20 sps:$4 sm:$0xff]  }
  0x79   :  { %v3860_v32 = vld [vmem:[#allocation10 + $0xd0] ss:$20 sps:$4 sm:$0xff]   ;;  %v3875_v34 = vld [vmem:[#allocation10 + $0x118] ss:$20 sps:$4 sm:$0xff]   ;;  %v3881_v38 = vld [vmem:[#allocation10 + $0x140] ss:$20 sps:$4 sm:$0xff]  }
  0x7a   :  { %1299 = vmatpush1.bf16.msra.mxu0 %v3845_v14  ;;  %v3868_v33 = vld [vmem:[#allocation10 + $0xfc] ss:$20 sps:$4 sm:$0xff]   ;;  %v3876_v35 = vld [vmem:[#allocation10 + $0x144] ss:$20 sps:$4 sm:$0xff]   ;;  %v3882_v39 = vld [vmem:[#allocation10 + $0x16c] ss:$20 sps:$4 sm:$0xff]  }
  0x7b   :  { %3755 = vmatmul.mubr.msk.bf16.vlgmr.msra.gmra.mrb[4].mxu1 %vm151_vm0, %v113_v3  ;;  %1300 = vmatprep.subr.bf16.mxu0 %v3846_v15  ;;  %v3866_v36 = vld [vmem:[#allocation10 + $0xf8] ss:$20 sps:$4 sm:$0xff]   ;;  %v3872_v40 = vld [vmem:[#allocation10 + $0x120] ss:$20 sps:$4 sm:$0xff]   ;;  %v3887_v42 = vld [vmem:[#allocation10 + $0x168] ss:$20 sps:$4 sm:$0xff]  }
  0x7c   :  { %1377 = vmatpush1.bf16.msra.mxu1 %v3830_v12  ;;  %v3874_v37 = vld [vmem:[#allocation10 + $0x124] ss:$20 sps:$4 sm:$0xff]   ;;  %v3880_v41 = vld [vmem:[#allocation10 + $0x14c] ss:$20 sps:$4 sm:$0xff]   ;;  %v3888_v43 = vld [vmem:[#allocation10 + $0x194] ss:$20 sps:$4 sm:$0xff]  }
  0x7d   :  { %1378 = vmatprep.subr.bf16.mxu1 %v3838_v13  ;;  %v3878_v44 = vld [vmem:[#allocation10 + $0x148] ss:$20 sps:$4 sm:$0xff]   ;;  %v3893_v46 = vld [vmem:[#allocation10 + $0x190] ss:$20 sps:$4 sm:$0xff]   ;;  %v3899_v50 = vld [vmem:[#allocation10 + $0x1b8] ss:$20 sps:$4 sm:$0xff]  }
  0x7e   :  { %1301 = vmatpush1.bf16.msra.mxu0 %v3851_v18  ;;  %v3886_v45 = vld [vmem:[#allocation10 + $0x174] ss:$20 sps:$4 sm:$0xff]   ;;  %v3894_v47 = vld [vmem:[#allocation10 + $0x1bc] ss:$20 sps:$4 sm:$0xff]   ;;  %v3900_v51 = vld [vmem:[#allocation10 + $0x1e4] ss:$20 sps:$4 sm:$0xff]  }
  0x7f   :  { %1302 = vmatprep.subr.bf16.mxu0 %v3852_v19  ;;  %v3884_v48 = vld [vmem:[#allocation10 + $0x170] ss:$20 sps:$4 sm:$0xff]   ;;  %v3890_v52 = vld [vmem:[#allocation10 + $0x198] ss:$20 sps:$4 sm:$0xff]   ;;  %v3905_v54 = vld [vmem:[#allocation10 + $0x1e0] ss:$20 sps:$4 sm:$0xff]  }
  0x80   :  { %1379 = vmatpush1.bf16.msra.mxu1 %v3836_v16  ;;  %v3892_v49 = vld [vmem:[#allocation10 + $0x19c] ss:$20 sps:$4 sm:$0xff]   ;;  %v3898_v53 = vld [vmem:[#allocation10 + $0x1c4] ss:$20 sps:$4 sm:$0xff]   ;;  %v3906_v55 = vld [vmem:[#allocation10 + $0x20c] ss:$20 sps:$4 sm:$0xff]  }
  0x81   :  { %1380 = vmatprep.subr.bf16.mxu1 %v3844_v17  ;;  %v3896_v56 = vld [vmem:[#allocation10 + $0x1c0] ss:$20 sps:$4 sm:$0xff]   ;;  %v3911_v58 = vld [vmem:[#allocation10 + $0x208] ss:$20 sps:$4 sm:$0xff]   ;;  %v3908_v61 = vld [vmem:[#allocation10 + $0x210] ss:$20 sps:$4 sm:$0xff]  }
  0x82   :  { %1303 = vmatpush1.bf16.msra.mxu0 %v3857_v22  ;;  %v3904_v57 = vld [vmem:[#allocation10 + $0x1ec] ss:$20 sps:$4 sm:$0xff]   ;;  %v3902_v59 = vld [vmem:[#allocation10 + $0x1e8] ss:$20 sps:$4 sm:$0xff]   ;;  %v3917_v2 = vld [vmem:[#allocation10 + $0x230] ss:$20 sps:$4 sm:$0xff]  }
  0x83   :  { %1304 = vmatprep.subr.bf16.mxu0 %v3858_v23  ;;  %v3910_v60 = vld [vmem:[#allocation10 + $0x214] ss:$20 sps:$4 sm:$0xff]   ;;  %v3916_v63 = vld [vmem:[#allocation10 + $0x23c] ss:$20 sps:$4 sm:$0xff]   ;;  %v3914_v1 = vld [vmem:[#allocation10 + $0x238] ss:$20 sps:$4 sm:$0xff]  }
  0x84   :  { %1381 = vmatpush1.bf16.msra.mxu1 %v3842_v20  ;;  %v3912_v62 = vld [vmem:[#allocation10 + $0x234] ss:$20 sps:$4 sm:$0xff]   ;;  %v3918_v3 = vld [vmem:[#allocation10 + $0x25c] ss:$20 sps:$4 sm:$0xff]   ;;  %v3922_v4 = vld [vmem:[#allocation10 + $0x264] ss:$20 sps:$4 sm:$0xff]  }
  0x85   :  { %1382 = vmatprep.subr.bf16.mxu1 %v3850_v21  ;;  %v3920_v5 = vld [vmem:[#allocation10 + $0x260] ss:$20 sps:$4 sm:$0xff]   ;;  %v3923_v7 = vld [vmem:[#allocation10 + $0x258] ss:$20 sps:$4 sm:$0xff]   ;;  %v4650_v11 = vshrl.u32 %v120_v10, 7  ;;  %s4509_s27 = smov [#allocation13]  }
  0x86   :  { %1305 = vmatpush1.bf16.msra.mxu0 %v3863_v26  ;;  %v3926_v8 = vld [vmem:[#allocation10 + $0x284] ss:$20 sps:$4 sm:$0xff]   ;;  %v3929_v9 = vld [vmem:[#allocation10 + $0x28c] ss:$20 sps:$4 sm:$0xff]   ;;  %v4655_v13 = vld [vmem:[#allocation8] sm:$0x7] }
  0x87   :  { %1306 = vmatprep.subr.bf16.mxu0 %v3864_v27  ;;  %v4653_v12 = vsub.s32 0, %v4650_v11  ;;  %v4658_v14 = vsub.s32 1, %v4650_v11  ;;  %v3924_v26 = vld [vmem:[#allocation10 + $0x280] ss:$20 sps:$4 sm:$0xff]   ;;  %v3927_v27 = vld [vmem:[#allocation10 + $0x288] ss:$20 sps:$4 sm:$0xff]  }
  0x88   :  { %1383 = vmatpush1.bf16.msra.mxu1 %v3848_v24  ;;  %v3984_v10 = vld [vmem:[#allocation10 + $0x410] ss:$20 sps:$4 sm:$0xff]   ;;  %s3275_s28 = sshll.u32 %s4509_s27, 4  ;;  %s3276_s28 = int_to_ptr.vmem [resolvable:$true] %s3275_s28 }
  0x89   :  { %1384 = vmatprep.subr.bf16.mxu1 %v3856_v25  ;;  %v123_v15 = vrot.slane %v4655_v13, %v4653_v12  ;;  %v127_v16 = vrot.slane %v4655_v13, %v4658_v14  ;;  %s4464_s3 = scalar_lea.vmem %s3276_s28, 64  ;;  %p4469_p7 = scmp.lt.s32.totalorder %s3276_s28, %s3276_s28 }
  0x8a   :  { %1307 = vmatpush1.bf16.msra.mxu0 %v3869_v30  ;;  %v3935_v30 = vld [vmem:[#allocation10 + $0x2b4] ss:$20 sps:$4 sm:$0xff]   ;;  %p4465_p6 = scmp.ne.s32.totalorder %s3276_s28, %s4464_s3  ;;  %p4470_p8 = scmp.lt.s32.totalorder %s4464_s3, %s4464_s3 }
  0x8b   :  { %1308 = vmatprep.subr.bf16.mxu0 %v3870_v31 }
  0x8c   :  { %1385 = vmatpush1.bf16.msra.mxu1 %v3854_v28  ;;  %p4471_p9 = por %p4470_p8, %p4469_p7 }
  0x8d   :  { %1386 = vmatprep.subr.bf16.mxu1 %v3862_v29  ;;  %v3932_v29 = vld [vmem:[#allocation10 + $0x2ac] ss:$20 sps:$4 sm:$0xff]  }
  0x8e   :  { %1309 = vmatpush1.bf16.msra.mxu0 %v3875_v34  ;;  %v3930_v34 = vld [vmem:[#allocation10 + $0x2a8] ss:$20 sps:$4 sm:$0xff]   ;;  %p4472_p10 = pnand %p4471_p9, %p4465_p6 }
  0x8f   :  { %1310 = vmatprep.subr.bf16.mxu0 %v3876_v35  ;;  %v3933_v35 = vld [vmem:[#allocation10 + $0x2b0] ss:$20 sps:$4 sm:$0xff]  }
  0x90   :  { %1387 = vmatpush1.bf16.msra.mxu1 %v3860_v32 }
  0x91   :  { %1388 = vmatprep.subr.bf16.mxu1 %v3868_v33  ;;  %v4674_v33 = vld [vmem:[#allocation5] sm:$0xf] }
  0x92   :  { %1311 = vmatpush1.bf16.msra.mxu0 %v3881_v38  ;;  %v3941_v38 = vld [vmem:[#allocation10 + $0x2dc] ss:$20 sps:$4 sm:$0xff]  }
  0x93   :  { %1312 = vmatprep.subr.bf16.mxu0 %v3882_v39 }
  0x94   :  { %1389 = vmatpush1.bf16.msra.mxu1 %v3866_v36 }
  0x95   :  { %1390 = vmatprep.subr.bf16.mxu1 %v3874_v37  ;;  %v3938_v37 = vld [vmem:[#allocation10 + $0x2d4] ss:$20 sps:$4 sm:$0xff]  }
  0x96   :  { %1313 = vmatpush1.bf16.msra.mxu0 %v3887_v42  ;;  %v3944_v42 = vld [vmem:[#allocation10 + $0x2fc] ss:$20 sps:$4 sm:$0xff]  }
  0x97   :  { %1314 = vmatprep.subr.bf16.mxu0 %v3888_v43  ;;  %v3947_v43 = vld [vmem:[#allocation10 + $0x304] ss:$20 sps:$4 sm:$0xff]  }
  0x98   :  { %1391 = vmatpush1.bf16.msra.mxu1 %v3872_v40  ;;  %v3936_v40 = vld [vmem:[#allocation10 + $0x2d0] ss:$20 sps:$4 sm:$0xff]  }
  0x99   :  { %1392 = vmatprep.subr.bf16.mxu1 %v3880_v41  ;;  %v3939_v41 = vld [vmem:[#allocation10 + $0x2d8] ss:$20 sps:$4 sm:$0xff]  }
  0x9a   :  { %1315 = vmatpush1.bf16.msra.mxu0 %v3893_v46  ;;  %v3950_v46 = vld [vmem:[#allocation10 + $0x324] ss:$20 sps:$4 sm:$0xff]  }
  0x9b   :  { %1316 = vmatprep.subr.bf16.mxu0 %v3894_v47  ;;  %v3953_v47 = vld [vmem:[#allocation10 + $0x32c] ss:$20 sps:$4 sm:$0xff]  }
  0x9c   :  { %1393 = vmatpush1.bf16.msra.mxu1 %v3878_v44  ;;  %v3942_v44 = vld [vmem:[#allocation10 + $0x2f8] ss:$20 sps:$4 sm:$0xff]  }
  0x9d   :  { %1394 = vmatprep.subr.bf16.mxu1 %v3886_v45  ;;  %v3945_v45 = vld [vmem:[#allocation10 + $0x300] ss:$20 sps:$4 sm:$0xff]  }
  0x9e   :  { %1317 = vmatpush1.bf16.msra.mxu0 %v3899_v50  ;;  %v3956_v50 = vld [vmem:[#allocation10 + $0x34c] ss:$20 sps:$4 sm:$0xff]  }
  0x9f   :  { %1318 = vmatprep.subr.bf16.mxu0 %v3900_v51  ;;  %v3959_v51 = vld [vmem:[#allocation10 + $0x354] ss:$20 sps:$4 sm:$0xff]  }
  0xa0   :  { %1395 = vmatpush1.bf16.msra.mxu1 %v3884_v48  ;;  %v3948_v48 = vld [vmem:[#allocation10 + $0x320] ss:$20 sps:$4 sm:$0xff]  }
  0xa1   :  { %1396 = vmatprep.subr.bf16.mxu1 %v3892_v49  ;;  %v3951_v49 = vld [vmem:[#allocation10 + $0x328] ss:$20 sps:$4 sm:$0xff]  }
  0xa2   :  { %1319 = vmatpush1.bf16.msra.mxu0 %v3905_v54  ;;  %v3962_v54 = vld [vmem:[#allocation10 + $0x374] ss:$20 sps:$4 sm:$0xff]  }
  0xa3   :  { %1320 = vmatprep.subr.bf16.mxu0 %v3906_v55  ;;  %v3965_v55 = vld [vmem:[#allocation10 + $0x37c] ss:$20 sps:$4 sm:$0xff]  }
  0xa4   :  { %1397 = vmatpush1.bf16.msra.mxu1 %v3890_v52  ;;  %v3954_v52 = vld [vmem:[#allocation10 + $0x348] ss:$20 sps:$4 sm:$0xff]  }
  0xa5   :  { %1398 = vmatprep.subr.bf16.mxu1 %v3898_v53  ;;  %v3957_v53 = vld [vmem:[#allocation10 + $0x350] ss:$20 sps:$4 sm:$0xff]  }
  0xa6   :  { %1321 = vmatpush1.bf16.msra.mxu0 %v3911_v58  ;;  %v3968_v58 = vld [vmem:[#allocation10 + $0x39c] ss:$20 sps:$4 sm:$0xff]  }
  0xa7   :  { %1322 = vmatprep.subr.bf16.mxu0 %v3912_v62  ;;  %v3974_v62 = vld [vmem:[#allocation10 + $0x3c4] ss:$20 sps:$4 sm:$0xff]  }
  0xa8   :  { %1399 = vmatpush1.bf16.msra.mxu1 %v3896_v56  ;;  %v3960_v56 = vld [vmem:[#allocation10 + $0x370] ss:$20 sps:$4 sm:$0xff]  }
  0xa9   :  { %1400 = vmatprep.subr.bf16.mxu1 %v3904_v57  ;;  %v3963_v57 = vld [vmem:[#allocation10 + $0x378] ss:$20 sps:$4 sm:$0xff]  }
  0xaa   :  { %1323 = vmatpush1.bf16.msra.mxu0 %v3917_v2  ;;  %v3975_v2 = vld [vmem:[#allocation10 + $0x3c8] ss:$20 sps:$4 sm:$0xff]  }
  0xab   :  { %1324 = vmatprep.subr.bf16.mxu0 %v3918_v3  ;;  %v3980_v3 = vld [vmem:[#allocation10 + $0x3ec] ss:$20 sps:$4 sm:$0xff]  }
  0xac   :  { %1401 = vmatpush1.bf16.msra.mxu1 %v3902_v59  ;;  %v3971_v59 = vld [vmem:[#allocation10 + $0x3a4] ss:$20 sps:$4 sm:$0xff]  }
  0xad   :  { %1402 = vmatprep.subr.bf16.mxu1 %v3910_v60  ;;  %v3966_v60 = vld [vmem:[#allocation10 + $0x398] ss:$20 sps:$4 sm:$0xff]  }
  0xae   :  { %1325 = vmatpush1.bf16.msra.mxu0 %v3923_v7  ;;  %v3981_v7 = vld [vmem:[#allocation10 + $0x3f0] ss:$20 sps:$4 sm:$0xff]  }
  0xaf   :  { %1335 = vmatprep.subr.bf16.mxu0 %v3926_v8  ;;  %v3986_v8 = vld [vmem:[#allocation10 + $0x414] ss:$20 sps:$4 sm:$0xff]  }
  0xb0   :  { %1403 = vmatpush1.bf16.msra.mxu1 %v3908_v61  ;;  %v3969_v61 = vld [vmem:[#allocation10 + $0x3a0] ss:$20 sps:$4 sm:$0xff]  }
  0xb1   :  { %1404 = vmatprep.subr.bf16.mxu1 %v3916_v63  ;;  %v3977_v63 = vld [vmem:[#allocation10 + $0x3cc] ss:$20 sps:$4 sm:$0xff]  }
  0xb4   :  { %1405 = vmatpush1.bf16.msra.mxu1 %v3914_v1  ;;  %v3972_v1 = vld [vmem:[#allocation10 + $0x3c0] ss:$20 sps:$4 sm:$0xff]  }
  0xb5   :  { %1406 = vmatprep.subr.bf16.mxu1 %v3922_v4  ;;  %v3983_v4 = vld [vmem:[#allocation10 + $0x3f4] ss:$20 sps:$4 sm:$0xff]  }
  0xb8   :  { %1407 = vmatpush1.bf16.msra.mxu1 %v3920_v5  ;;  %v3978_v5 = vld [vmem:[#allocation10 + $0x3e8] ss:$20 sps:$4 sm:$0xff]  }
  0xb9   :  { %1417 = vmatprep.subr.bf16.mxu1 %v3929_v9  ;;  %v3989_v9 = vld [vmem:[#allocation10 + $0x41c] ss:$20 sps:$4 sm:$0xff]  }
 0x146   :  { %v189_v17 = vpop.f32.mrb[0].mxu1 }
 0x147   :  { %v190_v18 = vadd.f32 %v189_v17, %v123_v15  ;;  %v191_v19 = vpop.f32.mrb[1].mxu1  ;;  %v3987_v15 = vld [vmem:[#allocation10 + $0x418] ss:$20 sps:$4 sm:$0xff]  }
 0x148   :  { %v192_v20 = vadd.f32 %v191_v19, %v127_v16  ;;  %v193_v21 = vpop.f32.mrb[2].mxu1  ;;  %v3992_v16 = vld [vmem:[#allocation10 + $0x43c] ss:$20 sps:$4 sm:$0xff]   ;;  %v3995_v17 = vld [vmem:[#allocation10 + $0x444] ss:$20 sps:$4 sm:$0xff]  }
 0x149   :  { %v236_v22 = vmax.f32 %v190_v18, 0.0  ;;  %v194_v23 = vpop.f32.mrb[3].mxu1  ;;  %v3990_v18 = vld [vmem:[#allocation10 + $0x438] ss:$20 sps:$4 sm:$0xff]   ;;  %v3993_v19 = vld [vmem:[#allocation10 + $0x440] ss:$20 sps:$4 sm:$0xff]  }
 0x14a   :  { %v237_v24 = vmax.f32 %v192_v20, 0.0  ;;  %v3998_v20 = vld [vmem:[#allocation10 + $0x464] ss:$20 sps:$4 sm:$0xff]   ;;  %v4001_v21 = vld [vmem:[#allocation10 + $0x46c] ss:$20 sps:$4 sm:$0xff]  }
 0x14b   :  { %v4666_v28 = vpack.c.bf16 %v236_v22, %v236_v22  ;;  %v4679_v22 = vsub.s32 2, %v4650_v11  ;;  %v3996_v23 = vld [vmem:[#allocation10 + $0x460] ss:$20 sps:$4 sm:$0xff]  }
 0x14c   :  { %v4664_v25 = vpack.c.bf16 %v237_v24, %v237_v24  ;;  %v3999_v24 = vld [vmem:[#allocation10 + $0x468] ss:$20 sps:$4 sm:$0xff]  }
 0x14e   :  { %1326 = vmatprep.mubr.bf16.mxu0 %v4664_v25  ;;  %1408 = vmatprep.mubr.bf16.mxu1 %v4664_v25  ;;  %v4670_v31 = vpop.f32.mrb[4].mxu1 }
 0x14f   :  { %1327 = vmatmul.mubr.bf16.vlgmr.msra.gmra.mrb[0].mxu0 %v4666_v28  ;;  %1409 = vmatmul.mubr.bf16.vlgmr.msra.gmra.mrb[8].mxu1 %v4666_v28  ;;  %v3756_v32 = vpop.f32.mrb[5].mxu1 }
 0x150   :  { %1336 = vmatpush1.bf16.msra.mxu0 %v3924_v26  ;;  %1418 = vmatpush1.bf16.msra.mxu1 %v3927_v27  ;;  %v233_v36 = vpop.f32.mrb[6].mxu1  ;;  %v4004_v26 = vld [vmem:[#allocation10 + $0x48c] ss:$20 sps:$4 sm:$0xff]   ;;  %v4007_v27 = vld [vmem:[#allocation10 + $0x494] ss:$20 sps:$4 sm:$0xff]  }
 0x151   :  { %1337 = vmatprep.subr.bf16.mxu0 %v3932_v29  ;;  %1419 = vmatprep.subr.bf16.mxu1 %v3935_v30  ;;  %v3757_v39 = vpop.f32.mrb[7].mxu1  ;;  %v131_v29 = vrot.slane %v4655_v13, %v4679_v22  ;;  %v4002_v30 = vld [vmem:[#allocation10 + $0x488] ss:$20 sps:$4 sm:$0xff]   ;;  %v4005_v32 = vld [vmem:[#allocation10 + $0x490] ss:$20 sps:$4 sm:$0xff]  }
 0x152   :  { %1367 = vmatprep.mubr.bf16.mxu0 %v4674_v33  ;;  %1449 = vmatprep.mubr.bf16.mxu1 %v4674_v33  ;;  %v4016_v39 = vld [vmem:[#allocation10 + $0x4dc] ss:$20 sps:$4 sm:$0xff]   ;;  %v4014_v13 = vld [vmem:[#allocation10 + $0x4d8] ss:$20 sps:$4 sm:$0xff]  }
 0x153   :  { %v231_v36 = vadd.f32 %v4670_v31, %v131_v29  ;;  %v4022_v31 = vld [vmem:[#allocation10 + $0x10] ss:$20 sps:$4 sm:$0xff]   ;;  %v4067_v29 = vld [vmem:[#allocation11 + $0x58] ss:$20 sps:$4 sm:$0xff]  }
 0x154   :  { %1338 = vmatpush1.bf16.msra.mxu0 %v3930_v34  ;;  %1420 = vmatpush1.bf16.msra.mxu1 %v3933_v35  ;;  %v4010_v34 = vld [vmem:[#allocation10 + $0x4b4] ss:$20 sps:$4 sm:$0xff]   ;;  %v4013_v35 = vld [vmem:[#allocation10 + $0x4bc] ss:$20 sps:$4 sm:$0xff]  }
 0x155   :  { %1339 = vmatprep.subr.bf16.mxu0 %v3938_v37  ;;  %1421 = vmatprep.subr.bf16.mxu1 %v3941_v38  ;;  %v4008_v37 = vld [vmem:[#allocation10 + $0x4b0] ss:$20 sps:$4 sm:$0xff]   ;;  %v4011_v38 = vld [vmem:[#allocation10 + $0x4b8] ss:$20 sps:$4 sm:$0xff]  }
 0x158   :  { %1340 = vmatpush1.bf16.msra.mxu0 %v3936_v40  ;;  %1422 = vmatpush1.bf16.msra.mxu1 %v3939_v41  ;;  %v4019_v40 = vld [vmem:[#allocation10 + $0x4e4] ss:$20 sps:$4 sm:$0xff]   ;;  %v238_v41 = vmax.f32 %v231_v36, 0.0  ;;  %v4081_v36 = vld [vmem:[#allocation11 + $0xac] ss:$20 sps:$4 sm:$0xff]  }
 0x159   :  { %1341 = vmatprep.subr.bf16.mxu0 %v3944_v42  ;;  %1423 = vmatprep.subr.bf16.mxu1 %v3947_v43  ;;  %v4017_v42 = vld [vmem:[#allocation10 + $0x4e0] ss:$20 sps:$4 sm:$0xff]   ;;  %v4020_v43 = vld [vmem:[#allocation10 + $0x150] ss:$20 sps:$4 sm:$0xff]  }
 0x15c   :  { %1342 = vmatpush1.bf16.msra.mxu0 %v3942_v44  ;;  %1424 = vmatpush1.bf16.msra.mxu1 %v3945_v45  ;;  %v4021_v44 = vld [vmem:[#allocation10 + $0x3d0] ss:$20 sps:$4 sm:$0xff]   ;;  %v4684_v45 = vpack.c.bf16 %v238_v41, %v238_v41  ;;  %v4082_v41 = vld [vmem:[#allocation11 + $0xc8] ss:$20 sps:$4 sm:$0xff]  }
 0x15d   :  { %1343 = vmatprep.subr.bf16.mxu0 %v3950_v46  ;;  %1425 = vmatprep.subr.bf16.mxu1 %v3953_v47  ;;  %v4023_v46 = vld [vmem:[#allocation10 + $0x290] ss:$20 sps:$4 sm:$0xff]   ;;  %v4024_v47 = vld [vmem:[#allocation10 + $0x178] ss:$20 sps:$4 sm:$0xff]  }
 0x160   :  { %1344 = vmatpush1.bf16.msra.mxu0 %v3948_v48  ;;  %1426 = vmatpush1.bf16.msra.mxu1 %v3951_v49  ;;  %v4025_v48 = vld [vmem:[#allocation10 + $0x3f8] ss:$20 sps:$4 sm:$0xff]  }
 0x161   :  { %1345 = vmatprep.subr.bf16.mxu0 %v3956_v50  ;;  %1427 = vmatprep.subr.bf16.mxu1 %v3959_v51  ;;  %v4026_v49 = vld [vmem:[#allocation10 + $0x38] ss:$20 sps:$4 sm:$0xff]   ;;  %v4028_v51 = vld [vmem:[#allocation10 + $0x1a0] ss:$20 sps:$4 sm:$0xff]  }
 0x162   :  { %v4027_v50 = vld [vmem:[#allocation10 + $0x2b8] ss:$20 sps:$4 sm:$0xff]  }
 0x164   :  { %1346 = vmatpush1.bf16.msra.mxu0 %v3954_v52  ;;  %1428 = vmatpush1.bf16.msra.mxu1 %v3957_v53  ;;  %v4029_v52 = vld [vmem:[#allocation10 + $0x420] ss:$20 sps:$4 sm:$0xff]  }
 0x165   :  { %1347 = vmatprep.subr.bf16.mxu0 %v3962_v54  ;;  %1429 = vmatprep.subr.bf16.mxu1 %v3965_v55  ;;  %v4030_v53 = vld [vmem:[#allocation10 + $0x60] ss:$20 sps:$4 sm:$0xff]   ;;  %v4032_v55 = vld [vmem:[#allocation10 + $0x1c8] ss:$20 sps:$4 sm:$0xff]  }
 0x166   :  { %v4031_v54 = vld [vmem:[#allocation10 + $0x2e0] ss:$20 sps:$4 sm:$0xff]  }
 0x168   :  { %1348 = vmatpush1.bf16.msra.mxu0 %v3960_v56  ;;  %1430 = vmatpush1.bf16.msra.mxu1 %v3963_v57  ;;  %v4033_v56 = vld [vmem:[#allocation10 + $0x448] ss:$20 sps:$4 sm:$0xff]  }
 0x169   :  { %1349 = vmatprep.subr.bf16.mxu0 %v3968_v58  ;;  %1431 = vmatprep.subr.bf16.mxu1 %v3971_v59  ;;  %v4034_v57 = vld [vmem:[#allocation10 + $0x88] ss:$20 sps:$4 sm:$0xff]   ;;  %v4036_v58 = vld [vmem:[#allocation10 + $0x1f0] ss:$20 sps:$4 sm:$0xff]  }
 0x16a   :  { %v4037_v59 = vld [vmem:[#allocation10 + $0x470] ss:$20 sps:$4 sm:$0xff]  }
 0x16c   :  { %1350 = vmatpush1.bf16.msra.mxu0 %v3966_v60  ;;  %1432 = vmatpush1.bf16.msra.mxu1 %v3969_v61  ;;  %v4038_v60 = vld [vmem:[#allocation10 + $0xb0] ss:$20 sps:$4 sm:$0xff]   ;;  %v4040_v61 = vld [vmem:[#allocation10 + $0x218] ss:$20 sps:$4 sm:$0xff]  }
 0x16d   :  { %1351 = vmatprep.subr.bf16.mxu0 %v3974_v62  ;;  %1433 = vmatprep.subr.bf16.mxu1 %v3977_v63  ;;  %v4041_v62 = vld [vmem:[#allocation10 + $0x498] ss:$20 sps:$4 sm:$0xff]  }
 0x16e   :  { %v4042_v63 = vld [vmem:[#allocation10 + $0xd8] ss:$20 sps:$4 sm:$0xff]  }
 0x170   :  { %1352 = vmatpush1.bf16.msra.mxu0 %v3972_v1  ;;  %1434 = vmatpush1.bf16.msra.mxu1 %v3975_v2  ;;  %v4043_v1 = vld [vmem:[#allocation10 + $0x358] ss:$20 sps:$4 sm:$0xff]   ;;  %v4044_v2 = vld [vmem:[#allocation10 + $0x240] ss:$20 sps:$4 sm:$0xff]  }
 0x171   :  { %1353 = vmatprep.subr.bf16.mxu0 %v3980_v3  ;;  %1435 = vmatprep.subr.bf16.mxu1 %v3983_v4  ;;  %v4045_v3 = vld [vmem:[#allocation10 + $0x4c0] ss:$20 sps:$4 sm:$0xff]  }
 0x172   :  { %v4046_v4 = vld [vmem:[#allocation10 + $0x100] ss:$20 sps:$4 sm:$0xff]  }
 0x174   :  { %1354 = vmatpush1.bf16.msra.mxu0 %v3978_v5  ;;  %1436 = vmatpush1.bf16.msra.mxu1 %v3981_v7  ;;  %v4047_v5 = vld [vmem:[#allocation10 + $0x380] ss:$20 sps:$4 sm:$0xff]   ;;  %v4048_v7 = vld [vmem:[#allocation10 + $0x268] ss:$20 sps:$4 sm:$0xff]  }
 0x175   :  { %1355 = vmatprep.subr.bf16.mxu0 %v3986_v8  ;;  %1437 = vmatprep.subr.bf16.mxu1 %v3989_v9  ;;  %v4049_v8 = vld [vmem:[#allocation10 + $0x4e8] ss:$20 sps:$4 sm:$0xff]  }
 0x176   :  { %v4050_v9 = vld [vmem:[#allocation10 + $0x128] ss:$20 sps:$4 sm:$0xff]  }
 0x178   :  { %1356 = vmatpush1.bf16.msra.mxu0 %v3984_v10  ;;  %1438 = vmatpush1.bf16.msra.mxu1 %v3987_v15  ;;  %v4051_v10 = vld [vmem:[#allocation10 + $0x3a8] ss:$20 sps:$4 sm:$0xff]   ;;  %v4054_v15 = vld [vmem:[#allocation11 + $0x4] ss:$20 sps:$4 sm:$0xff]  }
 0x179   :  { %1357 = vmatprep.subr.bf16.mxu0 %v3992_v16  ;;  %1439 = vmatprep.subr.bf16.mxu1 %v3995_v17  ;;  %v4057_v16 = vld [vmem:[#allocation11 + $0xc] ss:$20 sps:$4 sm:$0xff]  }
 0x17a   :  { %v4052_v17 = vld [vmem:[#allocation11] ss:$20 sps:$4 sm:$0xff]  }
 0x17c   :  { %1358 = vmatpush1.bf16.msra.mxu0 %v3990_v18  ;;  %1440 = vmatpush1.bf16.msra.mxu1 %v3993_v19  ;;  %v4055_v18 = vld [vmem:[#allocation11 + $0x8] ss:$20 sps:$4 sm:$0xff]   ;;  %v4060_v19 = vld [vmem:[#allocation11 + $0x2c] ss:$20 sps:$4 sm:$0xff]  }
 0x17d   :  { %1359 = vmatprep.subr.bf16.mxu0 %v3998_v20  ;;  %1441 = vmatprep.subr.bf16.mxu1 %v4001_v21  ;;  %v4063_v20 = vld [vmem:[#allocation11 + $0x34] ss:$20 sps:$4 sm:$0xff]  }
 0x17e   :  { %v4058_v21 = vld [vmem:[#allocation11 + $0x28] ss:$20 sps:$4 sm:$0xff]  }
 0x180   :  { %1360 = vmatpush1.bf16.msra.mxu0 %v3996_v23  ;;  %1442 = vmatpush1.bf16.msra.mxu1 %v3999_v24  ;;  %v4061_v23 = vld [vmem:[#allocation11 + $0x30] ss:$20 sps:$4 sm:$0xff]   ;;  %v4066_v24 = vld [vmem:[#allocation11 + $0x54] ss:$20 sps:$4 sm:$0xff]  }
 0x181   :  { %1361 = vmatprep.subr.bf16.mxu0 %v4004_v26  ;;  %1443 = vmatprep.subr.bf16.mxu1 %v4007_v27  ;;  %v4069_v26 = vld [vmem:[#allocation11 + $0x5c] ss:$20 sps:$4 sm:$0xff]  }
 0x182   :  { %v4064_v27 = vld [vmem:[#allocation11 + $0x50] ss:$20 sps:$4 sm:$0xff]  }
 0x184   :  { %1362 = vmatpush1.bf16.msra.mxu0 %v4002_v30  ;;  %1444 = vmatpush1.bf16.msra.mxu1 %v4005_v32  ;;  %v4072_v30 = vld [vmem:[#allocation11 + $0x7c] ss:$20 sps:$4 sm:$0xff]   ;;  %v4075_v32 = vld [vmem:[#allocation11 + $0x84] ss:$20 sps:$4 sm:$0xff]  }
 0x185   :  { %1363 = vmatprep.subr.bf16.mxu0 %v4010_v34  ;;  %1445 = vmatprep.subr.bf16.mxu1 %v4013_v35  ;;  %v4073_v34 = vld [vmem:[#allocation11 + $0x80] ss:$20 sps:$4 sm:$0xff]   ;;  %v4078_v35 = vld [vmem:[#allocation11 + $0xa4] ss:$20 sps:$4 sm:$0xff]  }
 0x188   :  { %1364 = vmatpush1.bf16.msra.mxu0 %v4008_v37  ;;  %1446 = vmatpush1.bf16.msra.mxu1 %v4011_v38  ;;  %v4076_v37 = vld [vmem:[#allocation11 + $0xa0] ss:$20 sps:$4 sm:$0xff]   ;;  %v4079_v38 = vld [vmem:[#allocation11 + $0xa8] ss:$20 sps:$4 sm:$0xff]  }
 0x189   :  { %1365 = vmatprep.subr.bf16.mxu0 %v4016_v39  ;;  %1447 = vmatprep.subr.bf16.mxu1 %v4019_v40  ;;  %v4084_v39 = vld [vmem:[#allocation11 + $0xcc] ss:$20 sps:$4 sm:$0xff]   ;;  %v4087_v40 = vld [vmem:[#allocation11 + $0xd4] ss:$20 sps:$4 sm:$0xff]  }
 0x18c   :  { %1366 = vmatpush1.bf16.msra.mxu0 %v4014_v13  ;;  %1448 = vmatpush1.bf16.msra.mxu1 %v4017_v42  ;;  %v4085_v13 = vld [vmem:[#allocation11 + $0xd0] ss:$20 sps:$4 sm:$0xff]   ;;  %v4090_v42 = vld [vmem:[#allocation11 + $0xf4] ss:$20 sps:$4 sm:$0xff]  }
 0x18d   :  { %3655 = vmatprep.subr.bf16.mxu0 %v4020_v43  ;;  %3677 = vmatprep.subr.bf16.mxu1 %v4021_v44  ;;  %v4093_v43 = vld [vmem:[#allocation11 + $0xfc] ss:$20 sps:$4 sm:$0xff]  }
 0x18e   :  { %v4088_v44 = vld [vmem:[#allocation11 + $0xf0] ss:$20 sps:$4 sm:$0xff]  }
 0x18f   :  { %1368 = vmatmul.mubr.bf16.vlgmr.msra.gmra.mrb[0].mxu0 %v4684_v45  ;;  %1450 = vmatmul.mubr.bf16.vlgmr.msra.gmra.mrb[8].mxu1 %v4684_v45 }
 0x190   :  { %3656 = vmatpush3.bf16.msra.mxu0 %v4022_v31  ;;  %1490 = vmatprep.mubr.bf16.mxu0 %v4664_v25  ;;  %v4035_v25 = vld [vmem:[#allocation10 + $0x308] ss:$20 sps:$4 sm:$0xff]  }
 0x191   :  { %3678 = vmatpush3.bf16.msra.mxu1 %v4023_v46  ;;  %3657 = vmatprep.subr.bf16.mxu0 %v4024_v47  ;;  %v4096_v31 = vld [vmem:[#allocation11 + $0x11c] ss:$20 sps:$4 sm:$0xff]   ;;  %v4099_v46 = vld [vmem:[#allocation11 + $0x124] ss:$20 sps:$4 sm:$0xff]  }
 0x192   :  { %3679 = vmatprep.subr.bf16.mxu1 %v4025_v48  ;;  %1530 = vmatprep.mubr.bf16.mxu1 %v4674_v33  ;;  %v4039_v33 = vld [vmem:[#allocation10 + $0x330] ss:$20 sps:$4 sm:$0xff]   ;;  %v4094_v47 = vld [vmem:[#allocation11 + $0x118] ss:$20 sps:$4 sm:$0xff]   ;;  %v4097_v48 = vld [vmem:[#allocation11 + $0x120] ss:$20 sps:$4 sm:$0xff]  }
 0x194   :  { %3658 = vmatpush3.bf16.msra.mxu0 %v4026_v49  ;;  %v4102_v49 = vld [vmem:[#allocation11 + $0x144] ss:$20 sps:$4 sm:$0xff]  }
 0x195   :  { %3680 = vmatpush3.bf16.msra.mxu1 %v4027_v50  ;;  %3659 = vmatprep.subr.bf16.mxu0 %v4028_v51  ;;  %v4105_v50 = vld [vmem:[#allocation11 + $0x14c] ss:$20 sps:$4 sm:$0xff]  }
 0x196   :  { %3681 = vmatprep.subr.bf16.mxu1 %v4029_v52  ;;  %v4100_v51 = vld [vmem:[#allocation11 + $0x140] ss:$20 sps:$4 sm:$0xff]   ;;  %v4103_v52 = vld [vmem:[#allocation11 + $0x148] ss:$20 sps:$4 sm:$0xff]  }
 0x198   :  { %3660 = vmatpush3.bf16.msra.mxu0 %v4030_v53  ;;  %v4108_v53 = vld [vmem:[#allocation11 + $0x16c] ss:$20 sps:$4 sm:$0xff]  }
 0x199   :  { %3682 = vmatpush3.bf16.msra.mxu1 %v4031_v54  ;;  %3661 = vmatprep.subr.bf16.mxu0 %v4032_v55  ;;  %v4111_v54 = vld [vmem:[#allocation11 + $0x174] ss:$20 sps:$4 sm:$0xff]  }
 0x19a   :  { %3683 = vmatprep.subr.bf16.mxu1 %v4033_v56  ;;  %v4106_v55 = vld [vmem:[#allocation11 + $0x168] ss:$20 sps:$4 sm:$0xff]   ;;  %v4109_v56 = vld [vmem:[#allocation11 + $0x170] ss:$20 sps:$4 sm:$0xff]  }
 0x19c   :  { %3662 = vmatpush3.bf16.msra.mxu0 %v4034_v57  ;;  %v4114_v57 = vld [vmem:[#allocation11 + $0x194] ss:$20 sps:$4 sm:$0xff]  }
 0x19d   :  { %3684 = vmatpush3.bf16.msra.mxu1 %v4035_v25  ;;  %3663 = vmatprep.subr.bf16.mxu0 %v4036_v58  ;;  %v4117_v25 = vld [vmem:[#allocation11 + $0x19c] ss:$20 sps:$4 sm:$0xff]  }
 0x19e   :  { %3685 = vmatprep.subr.bf16.mxu1 %v4037_v59  ;;  %v4112_v58 = vld [vmem:[#allocation11 + $0x190] ss:$20 sps:$4 sm:$0xff]   ;;  %v4115_v59 = vld [vmem:[#allocation11 + $0x198] ss:$20 sps:$4 sm:$0xff]  }
 0x1a0   :  { %3664 = vmatpush3.bf16.msra.mxu0 %v4038_v60  ;;  %v4120_v60 = vld [vmem:[#allocation11 + $0x1bc] ss:$20 sps:$4 sm:$0xff]  }
 0x1a1   :  { %3686 = vmatpush3.bf16.msra.mxu1 %v4039_v33  ;;  %3665 = vmatprep.subr.bf16.mxu0 %v4040_v61  ;;  %v4123_v33 = vld [vmem:[#allocation11 + $0x1c4] ss:$20 sps:$4 sm:$0xff]  }
 0x1a2   :  { %3687 = vmatprep.subr.bf16.mxu1 %v4041_v62  ;;  %v4118_v61 = vld [vmem:[#allocation11 + $0x1b8] ss:$20 sps:$4 sm:$0xff]   ;;  %v4121_v62 = vld [vmem:[#allocation11 + $0x1c0] ss:$20 sps:$4 sm:$0xff]  }
 0x1a4   :  { %3666 = vmatpush3.bf16.msra.mxu0 %v4042_v63  ;;  %v4126_v63 = vld [vmem:[#allocation11 + $0x1e4] ss:$20 sps:$4 sm:$0xff]  }
 0x1a5   :  { %3688 = vmatpush3.bf16.msra.mxu1 %v4043_v1  ;;  %3667 = vmatprep.subr.bf16.mxu0 %v4044_v2  ;;  %v4129_v1 = vld [vmem:[#allocation11 + $0x1ec] ss:$20 sps:$4 sm:$0xff]  }
 0x1a6   :  { %3689 = vmatprep.subr.bf16.mxu1 %v4045_v3  ;;  %v4124_v2 = vld [vmem:[#allocation11 + $0x1e0] ss:$20 sps:$4 sm:$0xff]   ;;  %v4127_v3 = vld [vmem:[#allocation11 + $0x1e8] ss:$20 sps:$4 sm:$0xff]  }
 0x1a8   :  { %3668 = vmatpush3.bf16.msra.mxu0 %v4046_v4  ;;  %v4132_v4 = vld [vmem:[#allocation11 + $0x20c] ss:$20 sps:$4 sm:$0xff]  }
 0x1a9   :  { %3690 = vmatpush3.bf16.msra.mxu1 %v4047_v5  ;;  %3669 = vmatprep.subr.bf16.mxu0 %v4048_v7  ;;  %v4135_v5 = vld [vmem:[#allocation11 + $0x214] ss:$20 sps:$4 sm:$0xff]  }
 0x1aa   :  { %3691 = vmatprep.subr.bf16.mxu1 %v4049_v8  ;;  %v4130_v7 = vld [vmem:[#allocation11 + $0x208] ss:$20 sps:$4 sm:$0xff]   ;;  %v4133_v8 = vld [vmem:[#allocation11 + $0x210] ss:$20 sps:$4 sm:$0xff]  }
 0x1ac   :  { %3670 = vmatpush3.bf16.msra.mxu0 %v4050_v9  ;;  %v4138_v9 = vld [vmem:[#allocation11 + $0x234] ss:$20 sps:$4 sm:$0xff]  }
 0x1ad   :  { %3692 = vmatpush3.bf16.msra.mxu1 %v4051_v10  ;;  %2850 = vmatprep.subr.bf16.mxu0 %v4054_v15  ;;  %v4141_v10 = vld [vmem:[#allocation11 + $0x23c] ss:$20 sps:$4 sm:$0xff]  }
 0x1ae   :  { %2973 = vmatprep.subr.bf16.mxu1 %v4057_v16  ;;  %v4136_v15 = vld [vmem:[#allocation11 + $0x230] ss:$20 sps:$4 sm:$0xff]   ;;  %v4139_v16 = vld [vmem:[#allocation11 + $0x238] ss:$20 sps:$4 sm:$0xff]  }
 0x1af   :  { %1491 = vmatmul.mubr.bf16.vlgmr.msra.gmra.mrb[4].mxu0 %v4666_v28  ;;  %v4070_v28 = vld [vmem:[#allocation11 + $0x78] ss:$20 sps:$4 sm:$0xff]  }
 0x1b0   :  { %1531 = vmatmul.mubr.bf16.vlgmr.msra.gmra.mrb[12].mxu1 %v4684_v45  ;;  %2851 = vmatpush1.bf16.msra.mxu0 %v4052_v17  ;;  %v4091_v45 = vld [vmem:[#allocation11 + $0xf8] ss:$20 sps:$4 sm:$0xff]   ;;  %v4144_v17 = vld [vmem:[#allocation11 + $0x25c] ss:$20 sps:$4 sm:$0xff]  }
 0x1b1   :  { %2974 = vmatpush1.bf16.msra.mxu1 %v4055_v18  ;;  %2852 = vmatprep.subr.bf16.mxu0 %v4060_v19  ;;  %v4147_v18 = vld [vmem:[#allocation11 + $0x264] ss:$20 sps:$4 sm:$0xff]  }
 0x1b2   :  { %2975 = vmatprep.subr.bf16.mxu1 %v4063_v20  ;;  %v4142_v19 = vld [vmem:[#allocation11 + $0x258] ss:$20 sps:$4 sm:$0xff]   ;;  %v4145_v20 = vld [vmem:[#allocation11 + $0x260] ss:$20 sps:$4 sm:$0xff]  }
 0x1b4   :  { %2853 = vmatpush1.bf16.msra.mxu0 %v4058_v21  ;;  %v4150_v21 = vld [vmem:[#allocation11 + $0x284] ss:$20 sps:$4 sm:$0xff]  }
 0x1b5   :  { %2976 = vmatpush1.bf16.msra.mxu1 %v4061_v23  ;;  %2854 = vmatprep.subr.bf16.mxu0 %v4066_v24  ;;  %v4153_v23 = vld [vmem:[#allocation11 + $0x28c] ss:$20 sps:$4 sm:$0xff]   ;;  %v4695_v24 = vld [vmem:[%s4793_s5] sm:$0x1f] }
 0x1b6   :  { %2977 = vmatprep.subr.bf16.mxu1 %v4069_v26  ;;  %v4698_v26 = vsub.s32 3, %v4650_v11 }
 0x1b8   :  { %2855 = vmatpush1.bf16.msra.mxu0 %v4064_v27  ;;  %v440_v27 = vrot.slane %v4695_v24, %v4653_v12 }
 0x1b9   :  { %2978 = vmatpush1.bf16.msra.mxu1 %v4067_v29  ;;  %2856 = vmatprep.subr.bf16.mxu0 %v4072_v30  ;;  %v444_v29 = vrot.slane %v4695_v24, %v4658_v14  ;;  %v452_v30 = vrot.slane %v4695_v24, %v4698_v26 }
 0x1ba   :  { %2979 = vmatprep.subr.bf16.mxu1 %v4075_v32 }
 0x1bc   :  { %2857 = vmatpush1.bf16.msra.mxu0 %v4070_v28 }
 0x1bd   :  { %2980 = vmatpush1.bf16.msra.mxu1 %v4073_v34  ;;  %2858 = vmatprep.subr.bf16.mxu0 %v4078_v35 }
 0x1be   :  { %2981 = vmatprep.subr.bf16.mxu1 %v4081_v36 }
 0x1c0   :  { %2859 = vmatpush1.bf16.msra.mxu0 %v4076_v37 }
 0x1c1   :  { %2982 = vmatpush1.bf16.msra.mxu1 %v4079_v38  ;;  %2860 = vmatprep.subr.bf16.mxu0 %v4084_v39 }
 0x1c2   :  { %2983 = vmatprep.subr.bf16.mxu1 %v4087_v40 }
 0x1c4   :  { %2861 = vmatpush1.bf16.msra.mxu0 %v4082_v41 }
 0x1c5   :  { %2984 = vmatpush1.bf16.msra.mxu1 %v4085_v13  ;;  %2862 = vmatprep.subr.bf16.mxu0 %v4090_v42 }
 0x1c6   :  { %2985 = vmatprep.subr.bf16.mxu1 %v4093_v43  ;;  %v4148_v43 = vld [vmem:[#allocation11 + $0x280] ss:$20 sps:$4 sm:$0xff]  }
 0x1c8   :  { %2863 = vmatpush1.bf16.msra.mxu0 %v4088_v44  ;;  %v4151_v44 = vld [vmem:[#allocation11 + $0x288] ss:$20 sps:$4 sm:$0xff]  }
 0x1c9   :  { %2986 = vmatpush1.bf16.msra.mxu1 %v4091_v45  ;;  %2864 = vmatprep.subr.bf16.mxu0 %v4096_v31  ;;  %v4156_v31 = vld [vmem:[#allocation11 + $0x2ac] ss:$20 sps:$4 sm:$0xff]  }
 0x1ca   :  { %2987 = vmatprep.subr.bf16.mxu1 %v4099_v46  ;;  %v4159_v46 = vld [vmem:[#allocation11 + $0x2b4] ss:$20 sps:$4 sm:$0xff]  }
 0x1cc   :  { %2865 = vmatpush1.bf16.msra.mxu0 %v4094_v47 }
 0x1cd   :  { %2988 = vmatpush1.bf16.msra.mxu1 %v4097_v48  ;;  %2866 = vmatprep.subr.bf16.mxu0 %v4102_v49  ;;  %v4154_v48 = vld [vmem:[#allocation11 + $0x2a8] ss:$20 sps:$4 sm:$0xff]   ;;  %v4157_v49 = vld [vmem:[#allocation11 + $0x2b0] ss:$20 sps:$4 sm:$0xff]  }
 0x1ce   :  { %2989 = vmatprep.subr.bf16.mxu1 %v4105_v50  ;;  %v4162_v50 = vld [vmem:[#allocation11 + $0x2d4] ss:$20 sps:$4 sm:$0xff]  }
 0x1d0   :  { %2867 = vmatpush1.bf16.msra.mxu0 %v4100_v51  ;;  %v4165_v51 = vld [vmem:[#allocation11 + $0x2dc] ss:$20 sps:$4 sm:$0xff]  }
 0x1d1   :  { %2990 = vmatpush1.bf16.msra.mxu1 %v4103_v52  ;;  %2868 = vmatprep.subr.bf16.mxu0 %v4108_v53  ;;  %v4160_v52 = vld [vmem:[#allocation11 + $0x2d0] ss:$20 sps:$4 sm:$0xff]   ;;  %v4163_v53 = vld [vmem:[#allocation11 + $0x2d8] ss:$20 sps:$4 sm:$0xff]  }
 0x1d2   :  { %2991 = vmatprep.subr.bf16.mxu1 %v4111_v54  ;;  %v4168_v54 = vld [vmem:[#allocation11 + $0x2fc] ss:$20 sps:$4 sm:$0xff]  }
 0x1d4   :  { %2869 = vmatpush1.bf16.msra.mxu0 %v4106_v55  ;;  %v4171_v55 = vld [vmem:[#allocation11 + $0x304] ss:$20 sps:$4 sm:$0xff]  }
 0x1d5   :  { %2992 = vmatpush1.bf16.msra.mxu1 %v4109_v56  ;;  %2870 = vmatprep.subr.bf16.mxu0 %v4114_v57  ;;  %v4166_v56 = vld [vmem:[#allocation11 + $0x2f8] ss:$20 sps:$4 sm:$0xff]   ;;  %v4169_v57 = vld [vmem:[#allocation11 + $0x300] ss:$20 sps:$4 sm:$0xff]  }
 0x1d6   :  { %2993 = vmatprep.subr.bf16.mxu1 %v4117_v25  ;;  %v4174_v25 = vld [vmem:[#allocation11 + $0x324] ss:$20 sps:$4 sm:$0xff]  }
 0x1d8   :  { %2871 = vmatpush1.bf16.msra.mxu0 %v4112_v58  ;;  %v4177_v58 = vld [vmem:[#allocation11 + $0x32c] ss:$20 sps:$4 sm:$0xff]  }
 0x1d9   :  { %2994 = vmatpush1.bf16.msra.mxu1 %v4115_v59  ;;  %2872 = vmatprep.subr.bf16.mxu0 %v4120_v60  ;;  %v4172_v59 = vld [vmem:[#allocation11 + $0x320] ss:$20 sps:$4 sm:$0xff]   ;;  %v4175_v60 = vld [vmem:[#allocation11 + $0x328] ss:$20 sps:$4 sm:$0xff]  }
 0x1da   :  { %2995 = vmatprep.subr.bf16.mxu1 %v4123_v33  ;;  %v4180_v33 = vld [vmem:[#allocation11 + $0x34c] ss:$20 sps:$4 sm:$0xff]  }
 0x1dc   :  { %2873 = vmatpush1.bf16.msra.mxu0 %v4118_v61  ;;  %v4183_v61 = vld [vmem:[#allocation11 + $0x354] ss:$20 sps:$4 sm:$0xff]  }
 0x1dd   :  { %2996 = vmatpush1.bf16.msra.mxu1 %v4121_v62  ;;  %2874 = vmatprep.subr.bf16.mxu0 %v4126_v63  ;;  %v4178_v62 = vld [vmem:[#allocation11 + $0x348] ss:$20 sps:$4 sm:$0xff]   ;;  %v4181_v63 = vld [vmem:[#allocation11 + $0x350] ss:$20 sps:$4 sm:$0xff]  }
 0x1de   :  { %2997 = vmatprep.subr.bf16.mxu1 %v4129_v1  ;;  %v4186_v1 = vld [vmem:[#allocation11 + $0x374] ss:$20 sps:$4 sm:$0xff]  }
 0x1e0   :  { %2875 = vmatpush1.bf16.msra.mxu0 %v4124_v2  ;;  %v4189_v2 = vld [vmem:[#allocation11 + $0x37c] ss:$20 sps:$4 sm:$0xff]  }
 0x1e1   :  { %2998 = vmatpush1.bf16.msra.mxu1 %v4127_v3  ;;  %2876 = vmatprep.subr.bf16.mxu0 %v4132_v4  ;;  %v4184_v3 = vld [vmem:[#allocation11 + $0x370] ss:$20 sps:$4 sm:$0xff]   ;;  %v4187_v4 = vld [vmem:[#allocation11 + $0x378] ss:$20 sps:$4 sm:$0xff]  }
 0x1e2   :  { %2999 = vmatprep.subr.bf16.mxu1 %v4135_v5  ;;  %v4721_v5 = vsub.s32 4, %v4650_v11 }
 0x1e4   :  { %2877 = vmatpush1.bf16.msra.mxu0 %v4130_v7  ;;  %v4192_v7 = vld [vmem:[#allocation11 + $0x39c] ss:$20 sps:$4 sm:$0xff]  }
 0x1e5   :  { %3000 = vmatpush1.bf16.msra.mxu1 %v4133_v8  ;;  %2878 = vmatprep.subr.bf16.mxu0 %v4138_v9  ;;  %v4195_v8 = vld [vmem:[#allocation11 + $0x3a4] ss:$20 sps:$4 sm:$0xff]  }
 0x1e6   :  { %3001 = vmatprep.subr.bf16.mxu1 %v4141_v10  ;;  %v456_v10 = vrot.slane %v4695_v24, %v4721_v5 }
 0x1e8   :  { %2879 = vmatpush1.bf16.msra.mxu0 %v4136_v15  ;;  %v4190_v15 = vld [vmem:[#allocation11 + $0x398] ss:$20 sps:$4 sm:$0xff]  }
 0x1e9   :  { %3002 = vmatpush1.bf16.msra.mxu1 %v4139_v16  ;;  %2880 = vmatprep.subr.bf16.mxu0 %v4144_v17  ;;  %v4193_v16 = vld [vmem:[#allocation11 + $0x3a0] ss:$20 sps:$4 sm:$0xff]  }
 0x1ea   :  { %3003 = vmatprep.subr.bf16.mxu1 %v4147_v18 }
 0x1ec   :  { %2881 = vmatpush1.bf16.msra.mxu0 %v4142_v19  ;;  %v4198_v19 = vld [vmem:[#allocation11 + $0x3c4] ss:$20 sps:$4 sm:$0xff]  }
 0x1ed   :  { %3004 = vmatpush1.bf16.msra.mxu1 %v4145_v20  ;;  %2891 = vmatprep.subr.bf16.mxu0 %v4150_v21  ;;  %v4201_v20 = vld [vmem:[#allocation11 + $0x3cc] ss:$20 sps:$4 sm:$0xff]  }
 0x1ee   :  { %3014 = vmatprep.subr.bf16.mxu1 %v4153_v23 }
 0x262   :  { %v1369_v32 = vpop.f32.mrb[0].mxu0  ;;  %v4706_v28 = vpop.f32.mrb[8].mxu1 }
 0x263   :  { %v3778_v34 = vadd.f32 %v1369_v32, %v440_v27  ;;  %v1371_v35 = vpop.f32.mrb[1].mxu0  ;;  %v1453_v36 = vpop.f32.mrb[9].mxu1 }
 0x264   :  { %v3779_v37 = vadd.f32 %v1371_v35, %v444_v29  ;;  %v1373_v38 = vpop.f32.mrb[2].mxu0  ;;  %v1455_v39 = vpop.f32.mrb[10].mxu1  ;;  %v3781_v40 = vadd.f32 %v1453_v36, %v452_v30  ;;  %v4196_v35 = vld [vmem:[#allocation11 + $0x3c0] ss:$20 sps:$4 sm:$0xff]   ;;  %v4199_v36 = vld [vmem:[#allocation11 + $0x3c8] ss:$20 sps:$4 sm:$0xff]  }
 0x265   :  { %v1374_v41 = vpop.f32.mrb[3].mxu0  ;;  %v1456_v13 = vpop.f32.mrb[11].mxu1  ;;  %v4710_v45 = vpack.c.bf16 %v3778_v34, %v3778_v34  ;;  %v4207_v38 = vld [vmem:[#allocation11 + $0x3f4] ss:$20 sps:$4 sm:$0xff]  }
 0x266   :  { %v4708_v42 = vpack.c.bf16 %v3779_v37, %v3779_v37  ;;  %v4714_v47 = vpack.c.bf16 %v3781_v40, %v3781_v40  ;;  %v4204_v37 = vld [vmem:[#allocation11 + $0x3ec] ss:$20 sps:$4 sm:$0xff]   ;;  %v4202_v40 = vld [vmem:[#allocation11 + $0x3e8] ss:$20 sps:$4 sm:$0xff]   ;;  %v4205_v41 = vld [vmem:[#allocation11 + $0x3f0] ss:$20 sps:$4 sm:$0xff]  }
 0x267   :  { %v4210_v13 = vld [vmem:[#allocation11 + $0x414] ss:$20 sps:$4 sm:$0xff]  }
 0x268   :  { %2882 = vmatprep.mubr.bf16.mxu0 %v4708_v42  ;;  %3005 = vmatprep.mubr.bf16.mxu1 %v4708_v42 }
 0x269   :  { %2883 = vmatmul.mubr.bf16.vlgmr.msra.gmra.mrb[8].mxu0 %v4710_v45  ;;  %3006 = vmatmul.mubr.bf16.vlgmr.msra.gmra.mrb[16].mxu1 %v4710_v45 }
 0x26a   :  { %2892 = vmatpush1.bf16.msra.mxu0 %v4148_v43  ;;  %3015 = vmatpush1.bf16.msra.mxu1 %v4151_v44  ;;  %v4213_v43 = vld [vmem:[#allocation11 + $0x41c] ss:$20 sps:$4 sm:$0xff]  }
 0x26b   :  { %2923 = vmatprep.mubr.bf16.mxu0 %v4714_v47  ;;  %3046 = vmatprep.mubr.bf16.mxu1 %v4714_v47  ;;  %v4208_v44 = vld [vmem:[#allocation11 + $0x410] ss:$20 sps:$4 sm:$0xff]  }
 0x26c   :  { %2893 = vmatprep.subr.bf16.mxu0 %v4156_v31  ;;  %3016 = vmatprep.subr.bf16.mxu1 %v4159_v46  ;;  %v4211_v31 = vld [vmem:[#allocation11 + $0x418] ss:$20 sps:$4 sm:$0xff]   ;;  %v4216_v46 = vld [vmem:[#allocation11 + $0x43c] ss:$20 sps:$4 sm:$0xff]  }
 0x26e   :  { %2894 = vmatpush1.bf16.msra.mxu0 %v4154_v48  ;;  %3017 = vmatpush1.bf16.msra.mxu1 %v4157_v49  ;;  %v4219_v48 = vld [vmem:[#allocation11 + $0x444] ss:$20 sps:$4 sm:$0xff]  }
 0x26f   :  { %2895 = vmatprep.subr.bf16.mxu0 %v4162_v50  ;;  %3018 = vmatprep.subr.bf16.mxu1 %v4165_v51  ;;  %v4214_v49 = vld [vmem:[#allocation11 + $0x438] ss:$20 sps:$4 sm:$0xff]   ;;  %v4217_v50 = vld [vmem:[#allocation11 + $0x440] ss:$20 sps:$4 sm:$0xff]  }
 0x270   :  { %v4222_v51 = vld [vmem:[#allocation11 + $0x464] ss:$20 sps:$4 sm:$0xff]  }
 0x272   :  { %2896 = vmatpush1.bf16.msra.mxu0 %v4160_v52  ;;  %3019 = vmatpush1.bf16.msra.mxu1 %v4163_v53  ;;  %v4225_v52 = vld [vmem:[#allocation11 + $0x46c] ss:$20 sps:$4 sm:$0xff]  }
 0x273   :  { %2897 = vmatprep.subr.bf16.mxu0 %v4168_v54  ;;  %3020 = vmatprep.subr.bf16.mxu1 %v4171_v55  ;;  %v4220_v53 = vld [vmem:[#allocation11 + $0x460] ss:$20 sps:$4 sm:$0xff]   ;;  %v4223_v54 = vld [vmem:[#allocation11 + $0x468] ss:$20 sps:$4 sm:$0xff]  }
 0x274   :  { %v4228_v55 = vld [vmem:[#allocation11 + $0x48c] ss:$20 sps:$4 sm:$0xff]  }
 0x276   :  { %2898 = vmatpush1.bf16.msra.mxu0 %v4166_v56  ;;  %3021 = vmatpush1.bf16.msra.mxu1 %v4169_v57  ;;  %v4231_v56 = vld [vmem:[#allocation11 + $0x494] ss:$20 sps:$4 sm:$0xff]  }
 0x277   :  { %2899 = vmatprep.subr.bf16.mxu0 %v4174_v25  ;;  %3022 = vmatprep.subr.bf16.mxu1 %v4177_v58  ;;  %v4226_v57 = vld [vmem:[#allocation11 + $0x488] ss:$20 sps:$4 sm:$0xff]   ;;  %v4229_v25 = vld [vmem:[#allocation11 + $0x490] ss:$20 sps:$4 sm:$0xff]  }
 0x278   :  { %v4234_v58 = vld [vmem:[#allocation11 + $0x4b4] ss:$20 sps:$4 sm:$0xff]  }
 0x27a   :  { %2900 = vmatpush1.bf16.msra.mxu0 %v4172_v59  ;;  %3023 = vmatpush1.bf16.msra.mxu1 %v4175_v60  ;;  %v4237_v59 = vld [vmem:[#allocation11 + $0x4bc] ss:$20 sps:$4 sm:$0xff]  }
 0x27b   :  { %2901 = vmatprep.subr.bf16.mxu0 %v4180_v33  ;;  %3024 = vmatprep.subr.bf16.mxu1 %v4183_v61  ;;  %v4232_v60 = vld [vmem:[#allocation11 + $0x4b0] ss:$20 sps:$4 sm:$0xff]   ;;  %v4235_v33 = vld [vmem:[#allocation11 + $0x4b8] ss:$20 sps:$4 sm:$0xff]   ;;  %v448_v61 = vrot.slane %v4695_v24, %v4679_v22 }
 0x27c   :  { %v4252_v24 = vld [vmem:[#allocation11 + $0x52c] ss:$20 sps:$4 sm:$0xff]  }
 0x27e   :  { %2902 = vmatpush1.bf16.msra.mxu0 %v4178_v62  ;;  %3025 = vmatpush1.bf16.msra.mxu1 %v4181_v63  ;;  %v4240_v62 = vld [vmem:[#allocation11 + $0x4dc] ss:$20 sps:$4 sm:$0xff]   ;;  %v4243_v63 = vld [vmem:[#allocation11 + $0x4e4] ss:$20 sps:$4 sm:$0xff]  }
 0x27f   :  { %2903 = vmatprep.subr.bf16.mxu0 %v4186_v1  ;;  %3026 = vmatprep.subr.bf16.mxu1 %v4189_v2  ;;  %v4238_v1 = vld [vmem:[#allocation11 + $0x4d8] ss:$20 sps:$4 sm:$0xff]   ;;  %v4241_v2 = vld [vmem:[#allocation11 + $0x4e0] ss:$20 sps:$4 sm:$0xff]  }
 0x282   :  { %2904 = vmatpush1.bf16.msra.mxu0 %v4184_v3  ;;  %3027 = vmatpush1.bf16.msra.mxu1 %v4187_v4  ;;  %v3671_v9 = vpop.f32.mrb[4].mxu0  ;;  %v3780_v3 = vadd.f32 %v4706_v28, %v448_v61  ;;  %v4246_v4 = vld [vmem:[#allocation11 + $0x504] ss:$20 sps:$4 sm:$0xff]   ;;  %v4250_v28 = vld [vmem:[#allocation11 + $0x528] ss:$20 sps:$4 sm:$0xff]  }
 0x283   :  { %v3693_v17 = vpop.f32.mrb[12].mxu1  ;;  %v3672_v18 = vpop.f32.mrb[5].mxu0  ;;  %2905 = vmatprep.subr.bf16.mxu0 %v4192_v7  ;;  %3028 = vmatprep.subr.bf16.mxu1 %v4195_v8  ;;  %v4249_v7 = vld [vmem:[#allocation11 + $0x50c] ss:$20 sps:$4 sm:$0xff]   ;;  %v4308_v61 = vld [vmem:[#allocation11 + $0x1f0] ss:$20 sps:$4 sm:$0xff]  }
 0x284   :  { %v3673_v11 = vadd.f32 %v3672_v18, %v3671_v9  ;;  %v3694_v21 = vpop.f32.mrb[13].mxu1  ;;  %v3674_v23 = vpop.f32.mrb[6].mxu0  ;;  %v4244_v8 = vld [vmem:[#allocation11 + $0x500] ss:$20 sps:$4 sm:$0xff]   ;;  %v4247_v9 = vld [vmem:[#allocation11 + $0x508] ss:$20 sps:$4 sm:$0xff]  }
 0x285   :  { %v3695_v27 = vadd.f32 %v3694_v21, %v3693_v17  ;;  %v3696_v29 = vpop.f32.mrb[14].mxu1  ;;  %v3675_v30 = vpop.f32.mrb[7].mxu0  ;;  %v4258_v17 = vld [vmem:[#allocation11 + $0x554] ss:$20 sps:$4 sm:$0xff]   ;;  %v4261_v18 = vld [vmem:[#allocation11 + $0x55c] ss:$20 sps:$4 sm:$0xff]  }
 0x286   :  { %v1493_v32 = vadd.f32 %v3673_v11, %v456_v10  ;;  %v3697_v34 = vpop.f32.mrb[15].mxu1  ;;  %2906 = vmatpush1.bf16.msra.mxu0 %v4190_v15  ;;  %3029 = vmatpush1.bf16.msra.mxu1 %v4193_v16  ;;  %v4730_v10 = vpack.c.bf16 %v3780_v3, %v3780_v3  ;;  %v4255_v15 = vld [vmem:[#allocation11 + $0x534] ss:$20 sps:$4 sm:$0xff]   ;;  %v4253_v16 = vld [vmem:[#allocation11 + $0x530] ss:$20 sps:$4 sm:$0xff]  }
 0x287   :  { %2907 = vmatprep.subr.bf16.mxu0 %v4198_v19  ;;  %3030 = vmatprep.subr.bf16.mxu1 %v4201_v20  ;;  %v4256_v19 = vld [vmem:[#allocation11 + $0x550] ss:$20 sps:$4 sm:$0xff]   ;;  %v4259_v20 = vld [vmem:[#allocation11 + $0x558] ss:$20 sps:$4 sm:$0xff]  }
 0x288   :  { %v4725_v39 = vadd.f32 %v3695_v27, %v1493_v32  ;;  %v4264_v11 = vld [vmem:[#allocation11 + $0x57c] ss:$20 sps:$4 sm:$0xff]   ;;  %v4267_v21 = vld [vmem:[#allocation11 + $0x584] ss:$20 sps:$4 sm:$0xff]   ;;  %v4265_v27 = vld [vmem:[#allocation11 + $0x580] ss:$20 sps:$4 sm:$0xff]  }
 0x289   :  { %v4262_v23 = vld [vmem:[#allocation11 + $0x578] ss:$20 sps:$4 sm:$0xff]   ;;  %v4268_v32 = vld [vmem:[#allocation11 + $0x5a0] ss:$20 sps:$4 sm:$0xff]  }
 0x28a   :  { %2908 = vmatpush1.bf16.msra.mxu0 %v4196_v35  ;;  %3031 = vmatpush1.bf16.msra.mxu1 %v4199_v36  ;;  %v4270_v29 = vld [vmem:[#allocation11 + $0x5a4] ss:$20 sps:$4 sm:$0xff]   ;;  %v4273_v30 = vld [vmem:[#allocation11 + $0x5ac] ss:$20 sps:$4 sm:$0xff]   ;;  %v4279_v35 = vld [vmem:[#allocation11 + $0x5d4] ss:$20 sps:$4 sm:$0xff]  }
 0x28b   :  { %2909 = vmatprep.subr.bf16.mxu0 %v4204_v37  ;;  %3032 = vmatprep.subr.bf16.mxu1 %v4207_v38  ;;  %v4276_v34 = vld [vmem:[#allocation11 + $0x5cc] ss:$20 sps:$4 sm:$0xff]   ;;  %v4274_v36 = vld [vmem:[#allocation11 + $0x5c8] ss:$20 sps:$4 sm:$0xff]   ;;  %v4277_v37 = vld [vmem:[#allocation11 + $0x5d0] ss:$20 sps:$4 sm:$0xff]  }
 0x28c   :  { %v4282_v38 = vld [vmem:[#allocation11 + $0x5f4] ss:$20 sps:$4 sm:$0xff]   ;;  %v4314_v3 = vld [vmem:[#allocation11 + $0xd8] ss:$20 sps:$4 sm:$0xff]  }
 0x28e   :  { %2910 = vmatpush1.bf16.msra.mxu0 %v4202_v40  ;;  %3033 = vmatpush1.bf16.msra.mxu1 %v4205_v41  ;;  %v4285_v40 = vld [vmem:[#allocation11 + $0x5fc] ss:$20 sps:$4 sm:$0xff]  }
 0x28f   :  { %2911 = vmatprep.subr.bf16.mxu0 %v4210_v13  ;;  %3034 = vmatprep.subr.bf16.mxu1 %v4213_v43  ;;  %v4280_v41 = vld [vmem:[#allocation11 + $0x5f0] ss:$20 sps:$4 sm:$0xff]   ;;  %v4283_v13 = vld [vmem:[#allocation11 + $0x5f8] ss:$20 sps:$4 sm:$0xff]  }
 0x290   :  { %v4288_v43 = vld [vmem:[#allocation11 + $0x61c] ss:$20 sps:$4 sm:$0xff]  }
 0x292   :  { %2912 = vmatpush1.bf16.msra.mxu0 %v4208_v44  ;;  %3035 = vmatpush1.bf16.msra.mxu1 %v4211_v31  ;;  %v4291_v44 = vld [vmem:[#allocation11 + $0x624] ss:$20 sps:$4 sm:$0xff]  }
 0x293   :  { %2913 = vmatprep.subr.bf16.mxu0 %v4216_v46  ;;  %3036 = vmatprep.subr.bf16.mxu1 %v4219_v48  ;;  %v4286_v31 = vld [vmem:[#allocation11 + $0x618] ss:$20 sps:$4 sm:$0xff]   ;;  %v4289_v46 = vld [vmem:[#allocation11 + $0x620] ss:$20 sps:$4 sm:$0xff]   ;;  %v4292_v48 = vld [vmem:[#allocation11 + $0x150] ss:$20 sps:$4 sm:$0xff]  }
 0x296   :  { %2914 = vmatpush1.bf16.msra.mxu0 %v4214_v49  ;;  %3037 = vmatpush1.bf16.msra.mxu1 %v4217_v50  ;;  %v4293_v49 = vld [vmem:[#allocation11 + $0x3d0] ss:$20 sps:$4 sm:$0xff]  }
 0x297   :  { %2915 = vmatprep.subr.bf16.mxu0 %v4222_v51  ;;  %3038 = vmatprep.subr.bf16.mxu1 %v4225_v52  ;;  %v4294_v50 = vld [vmem:[#allocation11 + $0x10] ss:$20 sps:$4 sm:$0xff]   ;;  %v4738_v51 = vpack.c.bf16 %v4725_v39, %v4725_v39  ;;  %v4301_v39 = vld [vmem:[#allocation11 + $0x420] ss:$20 sps:$4 sm:$0xff]  }
 0x298   :  { %v4295_v52 = vld [vmem:[#allocation11 + $0x290] ss:$20 sps:$4 sm:$0xff]  }
 0x29a   :  { %2916 = vmatpush1.bf16.msra.mxu0 %v4220_v53  ;;  %3039 = vmatpush1.bf16.msra.mxu1 %v4223_v54  ;;  %v4296_v53 = vld [vmem:[#allocation11 + $0x178] ss:$20 sps:$4 sm:$0xff]  }
 0x29b   :  { %2917 = vmatprep.subr.bf16.mxu0 %v4228_v55  ;;  %3040 = vmatprep.subr.bf16.mxu1 %v4231_v56  ;;  %v4297_v54 = vld [vmem:[#allocation11 + $0x3f8] ss:$20 sps:$4 sm:$0xff]  }
 0x29c   :  { %v4298_v55 = vld [vmem:[#allocation11 + $0x38] ss:$20 sps:$4 sm:$0xff]  }
 0x29d   :  { %v4299_v56 = vld [vmem:[#allocation11 + $0x2b8] ss:$20 sps:$4 sm:$0xff]  }
 0x29e   :  { %2918 = vmatpush1.bf16.msra.mxu0 %v4226_v57  ;;  %3041 = vmatpush1.bf16.msra.mxu1 %v4229_v25  ;;  %v4300_v57 = vld [vmem:[#allocation11 + $0x1a0] ss:$20 sps:$4 sm:$0xff]  }
 0x29f   :  { %2919 = vmatprep.subr.bf16.mxu0 %v4234_v58  ;;  %3042 = vmatprep.subr.bf16.mxu1 %v4237_v59  ;;  %v4302_v25 = vld [vmem:[#allocation11 + $0x60] ss:$20 sps:$4 sm:$0xff]   ;;  %v4304_v59 = vld [vmem:[#allocation11 + $0x1c8] ss:$20 sps:$4 sm:$0xff]  }
 0x2a0   :  { %v4303_v58 = vld [vmem:[#allocation11 + $0x2e0] ss:$20 sps:$4 sm:$0xff]  }
 0x2a2   :  { %2920 = vmatpush1.bf16.msra.mxu0 %v4232_v60  ;;  %3043 = vmatpush1.bf16.msra.mxu1 %v4235_v33  ;;  %v4305_v60 = vld [vmem:[#allocation11 + $0x448] ss:$20 sps:$4 sm:$0xff]  }
 0x2a3   :  { %2921 = vmatprep.subr.bf16.mxu0 %v4240_v62  ;;  %3044 = vmatprep.subr.bf16.mxu1 %v4243_v63  ;;  %v4306_v33 = vld [vmem:[#allocation11 + $0x88] ss:$20 sps:$4 sm:$0xff]   ;;  %v4310_v62 = vld [vmem:[#allocation11 + $0xb0] ss:$20 sps:$4 sm:$0xff]  }
 0x2a4   :  { %v4311_v63 = vld [vmem:[#allocation11 + $0x330] ss:$20 sps:$4 sm:$0xff]  }
 0x2a6   :  { %2922 = vmatpush1.bf16.msra.mxu0 %v4238_v1  ;;  %3045 = vmatpush1.bf16.msra.mxu1 %v4241_v2  ;;  %v4312_v1 = vld [vmem:[#allocation11 + $0x218] ss:$20 sps:$4 sm:$0xff]  }
 0x2a7   :  { %2932 = vmatprep.subr.bf16.mxu0 %v4246_v4  ;;  %3055 = vmatprep.subr.bf16.mxu1 %v4249_v7  ;;  %v4313_v2 = vld [vmem:[#allocation11 + $0x498] ss:$20 sps:$4 sm:$0xff]   ;;  %v4316_v7 = vld [vmem:[#allocation11 + $0x240] ss:$20 sps:$4 sm:$0xff]  }
 0x2a8   :  { %v4315_v4 = vld [vmem:[#allocation11 + $0x358] ss:$20 sps:$4 sm:$0xff]  }
 0x2a9   :  { %2924 = vmatmul.mubr.bf16.vlgmr.msra.gmra.mrb[8].mxu0 %v4730_v10  ;;  %3047 = vmatmul.mubr.bf16.vlgmr.msra.gmra.mrb[16].mxu1 %v4730_v10 }
 0x2aa   :  { %2933 = vmatpush1.bf16.msra.mxu0 %v4244_v8  ;;  %3056 = vmatpush1.bf16.msra.mxu1 %v4247_v9  ;;  %v4317_v8 = vld [vmem:[#allocation11 + $0x4c0] ss:$20 sps:$4 sm:$0xff]  }
 0x2ab   :  { %2934 = vmatprep.subr.bf16.mxu0 %v4252_v24  ;;  %3057 = vmatprep.subr.bf16.mxu1 %v4255_v15  ;;  %v4318_v9 = vld [vmem:[#allocation11 + $0x100] ss:$20 sps:$4 sm:$0xff]   ;;  %v4320_v15 = vld [vmem:[#allocation11 + $0x268] ss:$20 sps:$4 sm:$0xff]  }
 0x2ac   :  { %2964 = vmatprep.mubr.bf16.mxu0 %v4506_v0  ;;  %3087 = vmatprep.mubr.bf16.mxu1 %v4506_v0  ;;  %v4271_v0 = vld [vmem:[#allocation11 + $0x5a8] ss:$20 sps:$4 sm:$0xff]   ;;  %v4319_v24 = vld [vmem:[#allocation11 + $0x380] ss:$20 sps:$4 sm:$0xff]  }
 0x2ae   :  { %2935 = vmatpush1.bf16.msra.mxu0 %v4250_v28  ;;  %3058 = vmatpush1.bf16.msra.mxu1 %v4253_v16  ;;  %v4321_v28 = vld [vmem:[#allocation11 + $0x4e8] ss:$20 sps:$4 sm:$0xff]  }
 0x2af   :  { %2936 = vmatprep.subr.bf16.mxu0 %v4258_v17  ;;  %3059 = vmatprep.subr.bf16.mxu1 %v4261_v18  ;;  %v4322_v16 = vld [vmem:[#allocation11 + $0x128] ss:$20 sps:$4 sm:$0xff]   ;;  %v4324_v18 = vld [vmem:[#allocation11 + $0x510] ss:$20 sps:$4 sm:$0xff]  }
 0x2b0   :  { %v4323_v17 = vld [vmem:[#allocation11 + $0x3a8] ss:$20 sps:$4 sm:$0xff]  }
 0x2b2   :  { %2937 = vmatpush1.bf16.msra.mxu0 %v4256_v19  ;;  %3060 = vmatpush1.bf16.msra.mxu1 %v4259_v20  ;;  %v4325_v19 = vld [vmem:[#allocation11 + $0x538] ss:$20 sps:$4 sm:$0xff]   ;;  %v4326_v20 = vld [vmem:[#allocation11 + $0x560] ss:$20 sps:$4 sm:$0xff]  }
 0x2b3   :  { %2938 = vmatprep.subr.bf16.mxu0 %v4264_v11  ;;  %3061 = vmatprep.subr.bf16.mxu1 %v4267_v21  ;;  %v4327_v11 = vld [vmem:[#allocation11 + $0x588] ss:$20 sps:$4 sm:$0xff]   ;;  %v4328_v21 = vld [vmem:[#allocation11 + $0x5b0] ss:$20 sps:$4 sm:$0xff]  }
 0x2b6   :  { %2939 = vmatpush1.bf16.msra.mxu0 %v4262_v23  ;;  %3062 = vmatpush1.bf16.msra.mxu1 %v4265_v27  ;;  %v4331_v23 = vld [vmem:[#allocation11 + $0x628] ss:$20 sps:$4 sm:$0xff]  }
 0x2b7   :  { %2940 = vmatprep.subr.bf16.mxu0 %v4270_v29  ;;  %3063 = vmatprep.subr.bf16.mxu1 %v4273_v30  ;;  %v1783_v27 = vld [vmem:[%s4795_s7] sm:$0x1f] }
 0x2b8   :  { %v1788_v29 = vrot.slane %v1783_v27, %v4653_v12  ;;  %v1796_v30 = vrot.slane %v1783_v27, %v4679_v22 }
 0x2ba   :  { %2941 = vmatpush1.bf16.msra.mxu0 %v4268_v32  ;;  %3064 = vmatpush1.bf16.msra.mxu1 %v4271_v0  ;;  %v3221_v32 = vld [vmem:[%s4796_s8] sm:$0x1f]  ;;  %v1792_v0 = vrot.slane %v1783_v27, %v4658_v14 }
 0x2bb   :  { %2942 = vmatprep.subr.bf16.mxu0 %v4276_v34  ;;  %3065 = vmatprep.subr.bf16.mxu1 %v4279_v35  ;;  %v1800_v34 = vrot.slane %v1783_v27, %v4698_v26 }
 0x2be   :  { %2943 = vmatpush1.bf16.msra.mxu0 %v4274_v36  ;;  %3066 = vmatpush1.bf16.msra.mxu1 %v4277_v37  ;;  %v3226_v37 = vrot.slane %v3221_v32, %v4653_v12  ;;  %v3238_v12 = vrot.slane %v3221_v32, %v4698_v26 }
 0x2bf   :  { %2944 = vmatprep.subr.bf16.mxu0 %v4282_v38  ;;  %3067 = vmatprep.subr.bf16.mxu1 %v4285_v40 }
 0x2c2   :  { %2945 = vmatpush1.bf16.msra.mxu0 %v4280_v41  ;;  %3068 = vmatpush1.bf16.msra.mxu1 %v4283_v13 }
 0x2c3   :  { %2946 = vmatprep.subr.bf16.mxu0 %v4288_v43  ;;  %3069 = vmatprep.subr.bf16.mxu1 %v4291_v44  ;;  %v3230_v43 = vrot.slane %v3221_v32, %v4658_v14 }
 0x2c6   :  { %2947 = vmatpush1.bf16.msra.mxu0 %v4286_v31  ;;  %3070 = vmatpush1.bf16.msra.mxu1 %v4289_v46 }
 0x2c7   :  { %3699 = vmatprep.subr.bf16.mxu0 %v4292_v48  ;;  %3721 = vmatprep.subr.bf16.mxu1 %v4293_v49 }
 0x2c9   :  { %2965 = vmatmul.mubr.bf16.vlgmr.msra.gmra.mrb[8].mxu0 %v4738_v51  ;;  %3088 = vmatmul.mubr.bf16.vlgmr.msra.gmra.mrb[16].mxu1 %v4738_v51 }
 0x2ca   :  { %3700 = vmatpush3.bf16.msra.mxu0 %v4294_v50  ;;  %3128 = vmatprep.mubr.bf16.mxu0 %v4708_v42  ;;  %v4307_v42 = vld [vmem:[#allocation11 + $0x308] ss:$20 sps:$4 sm:$0xff]  }
 0x2cb   :  { %3722 = vmatpush3.bf16.msra.mxu1 %v4295_v52  ;;  %3168 = vmatprep.mubr.bf16.mxu1 %v4714_v47  ;;  %v4309_v47 = vld [vmem:[#allocation11 + $0x470] ss:$20 sps:$4 sm:$0xff]   ;;  %v3234_v52 = vrot.slane %v3221_v32, %v4679_v22 }
 0x2cc   :  { %3701 = vmatprep.subr.bf16.mxu0 %v4296_v53  ;;  %3723 = vmatprep.subr.bf16.mxu1 %v4297_v54 }
 0x2ce   :  { %3702 = vmatpush3.bf16.msra.mxu0 %v4298_v55 }
 0x2cf   :  { %3724 = vmatpush3.bf16.msra.mxu1 %v4299_v56  ;;  %3703 = vmatprep.subr.bf16.mxu0 %v4300_v57 }
 0x2d0   :  { %3725 = vmatprep.subr.bf16.mxu1 %v4301_v39 }
 0x2d2   :  { %3704 = vmatpush3.bf16.msra.mxu0 %v4302_v25 }
 0x2d3   :  { %3726 = vmatpush3.bf16.msra.mxu1 %v4303_v58  ;;  %3705 = vmatprep.subr.bf16.mxu0 %v4304_v59 }
 0x2d4   :  { %3727 = vmatprep.subr.bf16.mxu1 %v4305_v60  ;;  %v1804_v60 = vrot.slane %v1783_v27, %v4721_v5 }
 0x2d6   :  { %3706 = vmatpush3.bf16.msra.mxu0 %v4306_v33 }
 0x2d7   :  { %3728 = vmatpush3.bf16.msra.mxu1 %v4307_v42  ;;  %3707 = vmatprep.subr.bf16.mxu0 %v4308_v61 }
 0x2d8   :  { %3729 = vmatprep.subr.bf16.mxu1 %v4309_v47 }
 0x2da   :  { %3708 = vmatpush3.bf16.msra.mxu0 %v4310_v62 }
 0x2db   :  { %3730 = vmatpush3.bf16.msra.mxu1 %v4311_v63  ;;  %3709 = vmatprep.subr.bf16.mxu0 %v4312_v1 }
 0x2dc   :  { %3731 = vmatprep.subr.bf16.mxu1 %v4313_v2 }
 0x2de   :  { %3710 = vmatpush3.bf16.msra.mxu0 %v4314_v3 }
 0x2df   :  { %3732 = vmatpush3.bf16.msra.mxu1 %v4315_v4  ;;  %3711 = vmatprep.subr.bf16.mxu0 %v4316_v7 }
 0x2e0   :  { %3733 = vmatprep.subr.bf16.mxu1 %v4317_v8 }
 0x2e2   :  { %3712 = vmatpush3.bf16.msra.mxu0 %v4318_v9  ;;  %v3242_v9 = vrot.slane %v3221_v32, %v4721_v5 }
 0x2e3   :  { %3734 = vmatpush3.bf16.msra.mxu1 %v4319_v24  ;;  %3713 = vmatprep.subr.bf16.mxu0 %v4320_v15 }
 0x2e4   :  { %3735 = vmatprep.subr.bf16.mxu1 %v4321_v28 }
 0x2e6   :  { %3714 = vmatpush3.bf16.msra.mxu0 %v4322_v16 }
 0x2e7   :  { %3736 = vmatpush3.bf16.msra.mxu1 %v4323_v17  ;;  %3758 = vmatprep.subr.bf16.mxu0 %v4507_v6 }
 0x2e9   :  { %3129 = vmatmul.mubr.bf16.vlgmr.msra.gmra.mrb[12].mxu0 %v4710_v45  ;;  %v4329_v45 = vld [vmem:[#allocation11 + $0x5d8] ss:$20 sps:$4 sm:$0xff]  }
 0x2ea   :  { %3169 = vmatmul.mubr.bf16.vlgmr.msra.gmra.mrb[20].mxu1 %v4730_v10  ;;  %3759 = vmatpush3.bf16.msra.mxu0 %v4324_v18  ;;  %v4330_v10 = vld [vmem:[#allocation11 + $0x600] ss:$20 sps:$4 sm:$0xff]   ;;  %v3652_v18 = vld [vmem:[%s4797_s9] ss:$0 sm:$0xff] }
 0x2eb   :  { %3760 = vmatprep.subr.bf16.mxu0 %v4507_v6  ;;  %3774 = vmatprep.mubr.msk.bf16.mxu0 %vm4508_vm1, %v4507_v6 }
 0x2ee   :  { %3761 = vmatpush3.bf16.msra.mxu0 %v4325_v19 }
 0x2ef   :  { %3762 = vmatprep.subr.bf16.mxu0 %v4507_v6 }
 0x2f2   :  { %3763 = vmatpush3.bf16.msra.mxu0 %v4326_v20 }
 0x2f3   :  { %3764 = vmatprep.subr.bf16.mxu0 %v4507_v6 }
 0x2f6   :  { %3765 = vmatpush3.bf16.msra.mxu0 %v4327_v11 }
 0x2f7   :  { %3766 = vmatprep.subr.bf16.mxu0 %v4507_v6 }
 0x2fa   :  { %3767 = vmatpush3.bf16.msra.mxu0 %v4328_v21 }
 0x2fb   :  { %3768 = vmatprep.subr.bf16.mxu0 %v4507_v6 }
 0x2fe   :  { %3769 = vmatpush3.bf16.msra.mxu0 %v4329_v45 }
 0x2ff   :  { %3770 = vmatprep.subr.bf16.mxu0 %v4507_v6 }
 0x302   :  { %3771 = vmatpush3.bf16.msra.mxu0 %v4330_v10 }
 0x303   :  { %3772 = vmatprep.subr.bf16.mxu0 %v4507_v6 }
 0x306   :  { %3773 = vmatpush3.bf16.msra.mxu0 %v4331_v23 }
 0x309   :  { %3775 = vmatmul.mubr.bf16.vlgmr.msra.gmra.mrb[16].mxu0 %v4738_v51 }
 0x39c   :  { %v2966_v6 = vpop.f32.mrb[8].mxu0  ;;  %v3089_v35 = vpop.f32.mrb[16].mxu1 }
 0x39d   :  { %v3782_v36 = vadd.f32 %v2966_v6, %v1788_v29  ;;  %v3784_v38 = vadd.f32 %v3089_v35, %v1796_v30  ;;  %v2968_v40 = vpop.f32.mrb[9].mxu0  ;;  %v3091_v41 = vpop.f32.mrb[17].mxu1 }
 0x39e   :  { %v3783_v13 = vadd.f32 %v2968_v40, %v1792_v0  ;;  %v3785_v44 = vadd.f32 %v3091_v41, %v1800_v34  ;;  %v2970_v31 = vpop.f32.mrb[10].mxu0  ;;  %v3093_v46 = vpop.f32.mrb[18].mxu1 }
 0x39f   :  { %v3216_v48 = vmax.f32 %v3782_v36, 0.0  ;;  %v2971_v49 = vpop.f32.mrb[11].mxu0  ;;  %v3094_v50 = vpop.f32.mrb[19].mxu1  ;;  %v3218_v51 = vmax.f32 %v3784_v38, 0.0 }
 0x3a0   :  { %v3217_v53 = vmax.f32 %v3783_v13, 0.0  ;;  %v3219_v56 = vmax.f32 %v3785_v44, 0.0 }
 0x3a1   :  { %v3248_v54 = vmul.f32 %v3226_v37, %v3216_v48  ;;  %v3250_v57 = vmul.f32 %v3234_v52, %v3218_v51 }
 0x3a2   :  { %v3249_v55 = vmul.f32 %v3230_v43, %v3217_v53  ;;  %v3251_v25 = vmul.f32 %v3238_v12, %v3219_v56 }
 0x3a4   :  { %v3253_v39 = vadd.f32 %v3249_v55, %v3248_v54 }
 0x3a6   :  { %v3254_v58 = vadd.f32 %v3253_v39, %v3250_v57 }
 0x3a8   :  { %v3255_v14 = vadd.f32 %v3254_v58, %v3251_v25 }
 0x3bc   :  { %v3715_v59 = vpop.f32.mrb[12].mxu0 }
 0x3bd   :  { %v3737_v33 = vpop.f32.mrb[20].mxu1  ;;  %v3716_v42 = vpop.f32.mrb[13].mxu0 }
 0x3be   :  { %v3717_v61 = vadd.f32 %v3716_v42, %v3715_v59  ;;  %v3738_v47 = vpop.f32.mrb[21].mxu1  ;;  %v3718_v62 = vpop.f32.mrb[14].mxu0 }
 0x3bf   :  { %v3739_v22 = vadd.f32 %v3738_v47, %v3737_v33  ;;  %v3740_v63 = vpop.f32.mrb[22].mxu1  ;;  %v3719_v1 = vpop.f32.mrb[15].mxu0 }
 0x3c0   :  { %v3131_v2 = vadd.f32 %v3717_v61, %v1804_v60  ;;  %v3741_v3 = vpop.f32.mrb[23].mxu1 }
 0x3c2   :  { %v3171_v4 = vadd.f32 %v3739_v22, %v3131_v2 }
 0x3dc   :  { %v3210_v26 = vpop.f32.mrb[16].mxu0 }
 0x3dd   :  { %v3211_v7 = vadd.f32 %v3210_v26, %v3171_v4  ;;  %v3776_v8 = vpop.f32.mrb[17].mxu0 }
 0x3de   :  { %v3213_v24 = vpop.f32.mrb[18].mxu0 }
 0x3df   :  { %v3220_v15 = vmax.f32 %v3211_v7, 0.0  ;;  %v3777_v28 = vpop.f32.mrb[19].mxu0 }
 0x3e1   :  { %v3252_v16 = vmul.f32 %v3242_v9, %v3220_v15 }
 0x3e3   :  { %v3256_v17 = vadd.f32 %v3255_v14, %v3252_v16 }
 0x3e5   :  { %3257 = vadd.xlane.f32.xlu0 %v3256_v17 }
 0x472   :  { %v3258_v19 = vpop.xlane.xlu0 %3257 }
 0x473   :  { %v3266_v20 = vadd.f32 %v3652_v18, %v3258_v19 }
 0x475   :  { %v3267_v11 = vpack.c.bf16 %v3266_v20, %v3266_v20 }
 0x477   :  { %3268 = vst [vmem:[#allocation13] sm:$0xf] %v3267_v11 }
 0x478   :  { %4475 = shalt.err (!%p4472_p10)
}
 0x479   :  { %s4476_s2 = scalar_lea.hbm %s4798_s10, 64 }
 0x47a   :  { %p4477_p11 = scmp.ne.s32.totalorder %s4798_s10, %s4476_s2  ;;  %p4480_p12 = scmp.lt.u32.totalorder %s4476_s2, %s4798_s10 }
 0x47c   :  { %p4482_p13 = pnand %p4480_p12, %p4477_p11 }
 0x47e   :  { %4485 = shalt.err (!%p4482_p13)
}
 0x47f   :  { %3278 = dma.vmem_to_hbm [thread:$0]  %s3276_s28, 64, %s4798_s10, [#allocation4]  }
 0x480   :  { %4494 = dma.done.wait [#allocation4], 64  }
 0x481   :  { %4495 = vsyncadd [#allocation4], 4294967232 }
 0x482   :  { %3282 = vsyncpa [#allocation3], 1 }
 0x483   :  { %3283 = vsyncpa [#allocation6], 1 }
 0x484   :  { %3284 = vsyncpa [#allocation9], 1 }
 0x485   :  { %3285 = vsyncpa [#allocation12], 1 }
 0x486   :  { %3286 = vsyncpa [#allocation4], 1 }

</bundles_post_ra>
